<compile_context>
chip_gen: v7x
topology: tpu7x:2x2x1
jax: 0.10.0
libtpu: 0.0.40
codegen_flags: <defaults>
</compile_context>

<pallas_src>
import numpy as np
import jax
import jax.numpy as jnp
from jax import lax
from jax.experimental import pallas as pl
from jax.experimental.pallas import tpu as pltpu

H = W = 15          # spatial size implied by xs.view(-1, 10*3*3) in the module
C_Z = 256           # zf channels
C_X = 256           # xf channels (concat -> 512 = localization conv in-channels)
HW = H * W


def _tree_sum(terms):
    """Pairwise tree reduction of a list of arrays (shorter dep chain)."""
    while len(terms) > 1:
        nxt = []
        for i in range(0, len(terms) - 1, 2):
            nxt.append(terms[i] + terms[i + 1])
        if len(terms) % 2:
            nxt.append(terms[-1])
        terms = nxt
    return terms[0]


# ---------------------------------------------------------------------------
# Fused kernel: localization + fc_loc + affine_grid + grid_sample, Bb elems/step
# ---------------------------------------------------------------------------
def _stn_kernel(zf_ref, xf_ref,
                w1a_ref, w1b_ref, b1_ref, w2_ref, b2_ref,
                selw_ref, mask_ref, rmat_ref, fc1b_ref, fc2w_ref, fc2b_ref,
                xn_ref, yn_ref, qx_ref, qy_ref,
                out_ref, theta_ref):
    f32 = jnp.float32
    w1a = w1a_ref[...]          # (200, 256)  rows = (kh*5+kw)*8 + cout
    w1b = w1b_ref[...]          # (200, 256)
    b1 = b1_ref[...]            # (8, 1)
    w2p = w2_ref[...]           # (400, 8)    rows = (kh*5+kw)*16 + cout (padded)
    b2 = b2_ref[...]            # (16, 1)
    selw = selw_ref[...]        # (65, 512)   fc1 weights scattered on valid pool pixels
    mask = mask_ref[...]        # (16, 512)   channel-diagonal mask
    rmat = rmat_ref[...]        # (512, 32)   column regrouping
    fc1b = fc1b_ref[...]        # (1, 32)
    fc2w = fc2w_ref[...]        # (32, 8)
    fc2b = fc2b_ref[...]        # (1, 8)
    xn = xn_ref[...]            # (1, 225) affine_grid base x per output pixel
    yn = yn_ref[...]            # (1, 225)
    qx = qx_ref[...]            # (225, 1) input-pixel column index
    qy = qy_ref[...]            # (225, 1) input-pixel row index

    bb = out_ref.shape[0]
    for bi in range(bb):
        zf2d = zf_ref[bi]                                   # (256, 225) NC(HW)
        xf2d = xf_ref[bi]                                   # (256, 225)

        # --- localization[0]: Conv2d(512,8,5) as one tap-packed matmul ------
        y = (jnp.dot(w1a, zf2d, preferred_element_type=f32) +
             jnp.dot(w1b, xf2d, preferred_element_type=f32))        # (200, 225)
        # Tap accumulation in the stride-15 embedded pixel space: sublane-
        # aligned 8-row groups, static lane shifts, pairwise tree sum.
        terms = []
        for kh in range(5):
            for kw in range(5):
                t = kh * 5 + kw
                s = kh * W + kw
                terms.append(y[t * 8:(t + 1) * 8, s:s + 161])
        acc1 = _tree_sum(terms) + b1                                 # (8, 161)

        # --- MaxPool2d(2, stride=1) -> ReLU (valid at p = oh*15+ow, oh,ow<=9)
        p1 = jnp.maximum(jnp.maximum(acc1[:, 0:145], acc1[:, 1:146]),
                         jnp.maximum(acc1[:, 15:160], acc1[:, 16:161]))
        p1 = jnp.maximum(p1, 0.0)                                    # (8, 145)

        # --- localization[3]: Conv2d(8,10,5) as one tap-packed matmul --------
        y2 = jnp.dot(w2p, p1, preferred_element_type=f32)            # (400, 145)
        terms2 = []
        for kh in range(5):
            for kw in range(5):
                t = kh * 5 + kw
                s = kh * W + kw
                terms2.append(y2[t * 16:(t + 1) * 16, s:s + 81])
        acc2 = _tree_sum(terms2) + b2                                # (16, 81)

        # --- MaxPool2d(2, stride=2) -> ReLU (valid at p = 30*i + 2*j) --------
        pm = jnp.maximum(jnp.maximum(acc2[:, 0:65], acc2[:, 1:66]),
                         jnp.maximum(acc2[:, 15:80], acc2[:, 16:81]))
        pm = jnp.maximum(pm, 0.0)                                    # (16, 65)

        # --- flatten(c,i,j) + fc_loc[0] as pure matmuls (no reshapes) --------
        # g[c, c2*32+o] = sum_p pm[c,p] * fc1w[o, c2*9+ij]  (p = valid pool pos)
        g = jnp.dot(pm, selw, preferred_element_type=f32)            # (16, 512)
        hc = jnp.dot(g * mask, rmat, preferred_element_type=f32)     # (16, 32)
        h = jnp.maximum(jnp.sum(hc, axis=0, keepdims=True) + fc1b, 0.0)  # (1,32)
        th = jnp.dot(h, fc2w, preferred_element_type=f32) + fc2b     # (1, 8)
        theta_ref[bi] = th

        # --- F.affine_grid + F.grid_sample (bilinear, zeros, align=False) ----
        # All index math stays in f32 (exact integer compares below).
        xs = xn * th[:, 0:1] + yn * th[:, 1:2] + th[:, 2:3]          # (1, 225)
        ys = xn * th[:, 3:4] + yn * th[:, 4:5] + th[:, 5:6]
        ix = ((xs + 1.0) * W - 1.0) * 0.5
        iy = ((ys + 1.0) * H - 1.0) * 0.5
        ix0 = jnp.floor(ix)
        iy0 = jnp.floor(iy)
        wx1 = ix - ix0
        wx0 = 1.0 - wx1
        wy1 = iy - iy0
        wy0 = 1.0 - wy1
        # St[q, p]: bilinear weight of input pixel q for output pixel p.
        # Out-of-range corners never match an index -> zero padding for free.
        sx = (jnp.where(qx == ix0, wx0, 0.0) +
              jnp.where(qx == ix0 + 1.0, wx1, 0.0))                  # (225, 225)
        sy = (jnp.where(qy == iy0, wy0, 0.0) +
              jnp.where(qy == iy0 + 1.0, wy1, 0.0))                  # (225, 225)
        st = sx * sy
        out_ref[bi] = jnp.dot(zf2d, st, preferred_element_type=f32)  # (256, 225)


# ---------------------------------------------------------------------------
# Wrapper
# ---------------------------------------------------------------------------
def _pick_bb(batch):
    # Largest block <= 4 (v5e VMEM headroom) that divides B and keeps the grid
    # length >= 2 so v7x's two TensorCores both get work.
    for bb in (4, 3, 2):
        if batch % bb == 0 and batch // bb >= 2:
            return bb
    return 1


def _stn_forward_impl(zf, xf, p):
    """zf, xf: NCHW float32 (B, 256, 15, 15). Returns (sampled_zf NCHW, theta (B,2,3))."""
    B = zf.shape[0]
    # Free reshapes (no transpose): channels stay on the sublane axis.
    zf_flat = zf.reshape(B, C_Z, HW)
    xf_flat = xf.reshape(B, C_X, HW)

    weights = (p["w1a"], p["w1b"], p["b1"], p["w2p"], p["b2"],
               p["selw"], p["mask"], p["rmat"], p["fc1b"], p["fc2w"], p["fc2b"],
               p["xn"], p["yn"], p["qx"], p["qy"])

    Bb = _pick_bb(B)
    grid = (B // Bb,)

    in_specs = [pl.BlockSpec((Bb, C_Z, HW), lambda b: (b, 0, 0)),
                pl.BlockSpec((Bb, C_X, HW), lambda b: (b, 0, 0))]
    in_specs += [pl.BlockSpec(w.shape, lambda b, _n=w.ndim: (0,) * _n)
                 for w in weights]

    out_flat, theta_pad = pl.pallas_call(
        _stn_kernel,
        grid=grid,
        in_specs=in_specs,
        out_specs=(pl.BlockSpec((Bb, C_Z, HW), lambda b: (b, 0, 0)),
                   pl.BlockSpec((Bb, 1, 8), lambda b: (b, 0, 0))),
        out_shape=(jax.ShapeDtypeStruct((B, C_Z, HW), jnp.float32),
                   jax.ShapeDtypeStruct((B, 1, 8), jnp.float32)),
        compiler_params=pltpu.CompilerParams(
            dimension_semantics=("parallel",)),
    )(zf_flat, xf_flat, *weights)

    out = out_flat.reshape(B, C_Z, H, W)            # free reshape, already NCHW
    theta = theta_pad[:, 0, :6].reshape(B, 2, 3)
    return out, theta


stn_forward = jax.jit(_stn_forward_impl)


# ---------------------------------------------------------------------------
# Parameters: PyTorch-layout init + re-packing for the kernel
# ---------------------------------------------------------------------------
def init_torch_params(key):
    ks = jax.random.split(key, 6)

    def u(k, shape, fan_in):
        bnd = 1.0 / np.sqrt(fan_in)
        return jax.random.uniform(k, shape, jnp.float32, -bnd, bnd)

    return dict(
        w1=u(ks[0], (8, 512, 5, 5), 512 * 25),    # localization[0]: Conv2d(512,8,5)
        b1=u(ks[1], (8,), 512 * 25),
        w2=u(ks[2], (10, 8, 5, 5), 8 * 25),       # localization[3]: Conv2d(8,10,5)
        b2=u(ks[3], (10,), 8 * 25),
        fc1w=u(ks[4], (32, 90), 90),              # fc_loc[0]: Linear(90,32)
        fc1b=u(ks[5], (32,), 90),
        fc2w=jnp.zeros((6, 32), jnp.float32),     # fc_loc[2].weight.zero_()
        fc2b=jnp.array([1, 0, 0, 0, 1, 0], jnp.float32),
    )


def pack_params(tp):
    # conv1: (cout, cin, kh, kw) -> rows = (kh*5+kw)*8 + cout, cols = cin,
    # split into zf/xf channel halves (torch.cat puts zf first).
    w1 = jnp.transpose(tp["w1"], (2, 3, 0, 1)).reshape(200, 512)
    w1a = w1[:, :C_Z]
    w1b = w1[:, C_Z:]

    # conv2: (cout, cin, kh, kw) -> rows = (kh*5+kw)*16 + cout (cout padded 10->16)
    w2 = jnp.transpose(tp["w2"], (2, 3, 0, 1))                  # (5,5,10,8)
    w2 = jnp.pad(w2, ((0, 0), (0, 0), (0, 6), (0, 0))).reshape(400, 8)

    # fc_loc[0] folded with the 3x3 pooled-position extraction:
    #   SelW[p, c*32 + o] = fc1w[o, c*9 + 3*i + j]  at p = 30*i + 2*j, else 0
    #   Mask[c, c2*32 + o] = (c == c2)
    #   R[c2*32 + o, o2]   = (o == o2)
    fc1w = np.asarray(tp["fc1w"], np.float32)                   # (32, 90)
    selw = np.zeros((65, 16 * 32), np.float32)
    for c in range(10):
        for i in range(3):
            for j in range(3):
                p_pos = 30 * i + 2 * j
                selw[p_pos, c * 32:(c + 1) * 32] = fc1w[:, c * 9 + 3 * i + j]
    mask = np.zeros((16, 16 * 32), np.float32)
    for c in range(16):
        mask[c, c * 32:(c + 1) * 32] = 1.0
    rmat = np.tile(np.eye(32, dtype=np.float32), (16, 1))       # (512, 32)

    # Constant grid / index rows & columns (f32 integer-exact).
    pidx = np.arange(HW)
    xn = ((2.0 * (pidx % W) + 1.0) / W - 1.0).astype(np.float32).reshape(1, HW)
    yn = ((2.0 * (pidx // W) + 1.0) / H - 1.0).astype(np.float32).reshape(1, HW)
    qx = (pidx % W).astype(np.float32).reshape(HW, 1)
    qy = (pidx // W).astype(np.float32).reshape(HW, 1)

    return dict(
        w1a=w1a,
        w1b=w1b,
        b1=tp["b1"].reshape(8, 1),
        w2p=w2,
        b2=jnp.pad(tp["b2"], (0, 6)).reshape(16, 1),
        selw=jnp.asarray(selw),
        mask=jnp.asarray(mask),
        rmat=jnp.asarray(rmat),
        fc1b=tp["fc1b"].reshape(1, 32),
        fc2w=jnp.pad(tp["fc2w"].T, ((0, 0), (0, 2))),           # (32, 8)
        fc2b=jnp.pad(tp["fc2b"], (0, 2)).reshape(1, 8),
        xn=jnp.asarray(xn),
        yn=jnp.asarray(yn),
        qx=jnp.asarray(qx),
        qy=jnp.asarray(qy),
    )


# ---------------------------------------------------------------------------
# Pure-JAX reference of the module forward (for correctness checking)
# ---------------------------------------------------------------------------
def ref_forward(zf, xf, tp):
    B = zf.shape[0]
    dn = ("NCHW", "OIHW", "NCHW")
    hi = lax.Precision.HIGHEST
    x = jnp.concatenate([zf, xf], axis=1)
    y = lax.conv_general_dilated(x, tp["w1"], (1, 1), "VALID",
                                 dimension_numbers=dn, precision=hi)
    y = y + tp["b1"][None, :, None, None]
    y = lax.reduce_window(y, -jnp.inf, lax.max, (1, 1, 2, 2), (1, 1, 1, 1), "VALID")
    y = jnp.maximum(y, 0.0)
    y = lax.conv_general_dilated(y, tp["w2"], (1, 1), "VALID",
                                 dimension_numbers=dn, precision=hi)
    y = y + tp["b2"][None, :, None, None]
    y = lax.reduce_window(y, -jnp.inf, lax.max, (1, 1, 2, 2), (1, 1, 2, 2), "VALID")
    y = jnp.maximum(y, 0.0)                                     # (B, 10, 3, 3)
    feat = y.reshape(B, 90)
    h = jnp.maximum(jnp.dot(feat, tp["fc1w"].T, precision=hi) + tp["fc1b"][None, :], 0.0)
    theta = jnp.dot(h, tp["fc2w"].T, precision=hi) + tp["fc2b"][None, :]   # (B, 6)

    # affine_grid + grid_sample (bilinear, zeros, align_corners=False)
    xn = (2.0 * jnp.arange(W, dtype=jnp.float32) + 1.0) / W - 1.0
    yn = (2.0 * jnp.arange(H, dtype=jnp.float32) + 1.0) / H - 1.0
    xg = jnp.broadcast_to(xn[None, :], (H, W))
    yg = jnp.broadcast_to(yn[:, None], (H, W))
    xs = theta[:, 0, None, None] * xg + theta[:, 1, None, None] * yg + theta[:, 2, None, None]
    ys = theta[:, 3, None, None] * xg + theta[:, 4, None, None] * yg + theta[:, 5, None, None]
    ix = ((xs + 1.0) * W - 1.0) * 0.5
    iy = ((ys + 1.0) * H - 1.0) * 0.5
    ix0 = jnp.floor(ix)
    iy0 = jnp.floor(iy)
    wx1 = ix - ix0
    wx0 = 1.0 - wx1
    wy1 = iy - iy0
    wy0 = 1.0 - wy1
    zf_nhwc = jnp.transpose(zf, (0, 2, 3, 1))                   # (B, H, W, C)
    bidx = jnp.arange(B)[:, None, None]

    def tap(yy, xx, wgt):
        valid = (xx >= 0.0) & (xx <= W - 1.0) & (yy >= 0.0) & (yy <= H - 1.0)
        xc = jnp.clip(xx, 0.0, W - 1.0).astype(jnp.int32)
        yc = jnp.clip(yy, 0.0, H - 1.0).astype(jnp.int32)
        vals = zf_nhwc[bidx, yc, xc]                            # (B, H, W, C)
        return jnp.where(valid, wgt, 0.0)[..., None] * vals

    out = (tap(iy0, ix0, wy0 * wx0) + tap(iy0, ix0 + 1.0, wy0 * wx1) +
           tap(iy0 + 1.0, ix0, wy1 * wx0) + tap(iy0 + 1.0, ix0 + 1.0, wy1 * wx1))
    return jnp.transpose(out, (0, 3, 1, 2)), theta.reshape(B, 2, 3)


if __name__ == "__main__":
    key = jax.random.PRNGKey(0)
    kp, kz, kx, kw = jax.random.split(key, 4)
    tp = init_torch_params(kp)

    B = 2
    zf = jax.random.normal(kz, (B, C_Z, H, W), jnp.float32)
    xf = jax.random.normal(kx, (B, C_X, H, W), jnp.float32)

    # Check 1: module-faithful init (fc_loc[2] zero weight + identity bias)
    # -> theta is the identity transform and grid_sample must reproduce zf.
    out, theta = stn_forward(zf, xf, pack_params(tp))
    out = jax.block_until_ready(out)
    theta = jax.block_until_ready(theta)
    assert out.shape == (B, C_Z, H, W) and theta.shape == (B, 2, 3)
    ident = jnp.tile(jnp.array([[1., 0., 0.], [0., 1., 0.]], jnp.float32), (B, 1, 1))
    assert np.allclose(np.asarray(theta), np.asarray(ident), atol=1e-5)
    assert np.allclose(np.asarray(out), np.asarray(zf), atol=1e-4)

    # Check 2: non-trivial theta (scale/rotate/translate, with out-of-range
    # sampling) -> compare the full fused kernel against the pure-JAX reference.
    tp2 = dict(tp)
    tp2["fc2w"] = 0.05 * jax.random.normal(kw, (6, 32), jnp.float32)
    tp2["fc2b"] = jnp.array([0.9, 0.2, 0.15, -0.25, 1.1, -0.1], jnp.float32)
    out2, theta2 = stn_forward(zf, xf, pack_params(tp2))
    out2 = jax.block_until_ready(out2)
    theta2 = jax.block_until_ready(theta2)
    ref_out, ref_theta = ref_forward(zf, xf, tp2)
    assert np.allclose(np.asarray(theta2), np.asarray(ref_theta), rtol=2e-3, atol=2e-3)
    assert np.allclose(np.asarray(out2), np.asarray(ref_out), rtol=2e-3, atol=2e-3)

    print("KERNEL_OK")
</pallas_src>

<mosaic_0001>
module attributes {stable_mosaic.version = 11 : i64} {
  func.func @_stn_kernel(%arg0: i32, %arg1: memref<1x256x225xf32, #tpu.memory_space<vmem>>, %arg2: memref<1x256x225xf32, #tpu.memory_space<vmem>>, %arg3: memref<200x256xf32, #tpu.memory_space<vmem>>, %arg4: memref<200x256xf32, #tpu.memory_space<vmem>>, %arg5: memref<8x1xf32, #tpu.memory_space<vmem>>, %arg6: memref<400x8xf32, #tpu.memory_space<vmem>>, %arg7: memref<16x1xf32, #tpu.memory_space<vmem>>, %arg8: memref<65x512xf32, #tpu.memory_space<vmem>>, %arg9: memref<16x512xf32, #tpu.memory_space<vmem>>, %arg10: memref<512x32xf32, #tpu.memory_space<vmem>>, %arg11: memref<1x32xf32, #tpu.memory_space<vmem>>, %arg12: memref<32x8xf32, #tpu.memory_space<vmem>>, %arg13: memref<1x8xf32, #tpu.memory_space<vmem>>, %arg14: memref<1x225xf32, #tpu.memory_space<vmem>>, %arg15: memref<1x225xf32, #tpu.memory_space<vmem>>, %arg16: memref<225x1xf32, #tpu.memory_space<vmem>>, %arg17: memref<225x1xf32, #tpu.memory_space<vmem>>, %arg18: memref<1x256x225xf32, #tpu.memory_space<vmem>>, %arg19: memref<1x1x8xf32, #tpu.memory_space<vmem>>) attributes {dimension_semantics = [#tpu.dimension_semantics<parallel>], iteration_bounds = array<i64: 2>, scalar_prefetch = 0 : i64, scratch_operands = 0 : i64, tpu.core_type = #tpu.core_type<tc>, window_params = [{transform_indices = @transform_0, window_bounds = array<i64: 1, 256, 225>}, {transform_indices = @transform_1, window_bounds = array<i64: 1, 256, 225>}, {pipeline_mode = #tpu.pipeline_mode<synchronous>, transform_indices = @transform_2, window_bounds = array<i64: 200, 256>}, {pipeline_mode = #tpu.pipeline_mode<synchronous>, transform_indices = @transform_3, window_bounds = array<i64: 200, 256>}, {pipeline_mode = #tpu.pipeline_mode<synchronous>, transform_indices = @transform_4, window_bounds = array<i64: 8, 1>}, {pipeline_mode = #tpu.pipeline_mode<synchronous>, transform_indices = @transform_5, window_bounds = array<i64: 400, 8>}, {pipeline_mode = #tpu.pipeline_mode<synchronous>, transform_indices = @transform_6, window_bounds = array<i64: 16, 1>}, {pipeline_mode = #tpu.pipeline_mode<synchronous>, transform_indices = @transform_7, window_bounds = array<i64: 65, 512>}, {pipeline_mode = #tpu.pipeline_mode<synchronous>, transform_indices = @transform_8, window_bounds = array<i64: 16, 512>}, {pipeline_mode = #tpu.pipeline_mode<synchronous>, transform_indices = @transform_9, window_bounds = array<i64: 512, 32>}, {pipeline_mode = #tpu.pipeline_mode<synchronous>, transform_indices = @transform_10, window_bounds = array<i64: 1, 32>}, {pipeline_mode = #tpu.pipeline_mode<synchronous>, transform_indices = @transform_11, window_bounds = array<i64: 32, 8>}, {pipeline_mode = #tpu.pipeline_mode<synchronous>, transform_indices = @transform_12, window_bounds = array<i64: 1, 8>}, {pipeline_mode = #tpu.pipeline_mode<synchronous>, transform_indices = @transform_13, window_bounds = array<i64: 1, 225>}, {pipeline_mode = #tpu.pipeline_mode<synchronous>, transform_indices = @transform_14, window_bounds = array<i64: 1, 225>}, {pipeline_mode = #tpu.pipeline_mode<synchronous>, transform_indices = @transform_15, window_bounds = array<i64: 225, 1>}, {pipeline_mode = #tpu.pipeline_mode<synchronous>, transform_indices = @transform_16, window_bounds = array<i64: 225, 1>}, {transform_indices = @transform_17, window_bounds = array<i64: 1, 256, 225>}, {transform_indices = @transform_18, window_bounds = array<i64: 1, 1, 8>}]} {
    %c0 = arith.constant 0 : index
    %c0_0 = arith.constant 0 : index
    %0 = vector.load %arg3[%c0, %c0_0] : memref<200x256xf32, #tpu.memory_space<vmem>>, vector<200x256xf32>
    %c0_1 = arith.constant 0 : index
    %c0_2 = arith.constant 0 : index
    %1 = vector.load %arg4[%c0_1, %c0_2] : memref<200x256xf32, #tpu.memory_space<vmem>>, vector<200x256xf32>
    %c0_3 = arith.constant 0 : index
    %c0_4 = arith.constant 0 : index
    %2 = vector.load %arg5[%c0_3, %c0_4] : memref<8x1xf32, #tpu.memory_space<vmem>>, vector<8x1xf32>
    %c0_5 = arith.constant 0 : index
    %c0_6 = arith.constant 0 : index
    %3 = vector.load %arg6[%c0_5, %c0_6] : memref<400x8xf32, #tpu.memory_space<vmem>>, vector<400x8xf32>
    %c0_7 = arith.constant 0 : index
    %c0_8 = arith.constant 0 : index
    %4 = vector.load %arg7[%c0_7, %c0_8] : memref<16x1xf32, #tpu.memory_space<vmem>>, vector<16x1xf32>
    %c0_9 = arith.constant 0 : index
    %c0_10 = arith.constant 0 : index
    %5 = vector.load %arg8[%c0_9, %c0_10] : memref<65x512xf32, #tpu.memory_space<vmem>>, vector<65x512xf32>
    %c0_11 = arith.constant 0 : index
    %c0_12 = arith.constant 0 : index
    %6 = vector.load %arg9[%c0_11, %c0_12] : memref<16x512xf32, #tpu.memory_space<vmem>>, vector<16x512xf32>
    %c0_13 = arith.constant 0 : index
    %c0_14 = arith.constant 0 : index
    %7 = vector.load %arg10[%c0_13, %c0_14] : memref<512x32xf32, #tpu.memory_space<vmem>>, vector<512x32xf32>
    %c0_15 = arith.constant 0 : index
    %c0_16 = arith.constant 0 : index
    %8 = vector.load %arg11[%c0_15, %c0_16] : memref<1x32xf32, #tpu.memory_space<vmem>>, vector<1x32xf32>
    %c0_17 = arith.constant 0 : index
    %c0_18 = arith.constant 0 : index
    %9 = vector.load %arg12[%c0_17, %c0_18] : memref<32x8xf32, #tpu.memory_space<vmem>>, vector<32x8xf32>
    %c0_19 = arith.constant 0 : index
    %c0_20 = arith.constant 0 : index
    %10 = vector.load %arg13[%c0_19, %c0_20] : memref<1x8xf32, #tpu.memory_space<vmem>>, vector<1x8xf32>
    %c0_21 = arith.constant 0 : index
    %c0_22 = arith.constant 0 : index
    %11 = vector.load %arg14[%c0_21, %c0_22] : memref<1x225xf32, #tpu.memory_space<vmem>>, vector<1x225xf32>
    %c0_23 = arith.constant 0 : index
    %c0_24 = arith.constant 0 : index
    %12 = vector.load %arg15[%c0_23, %c0_24] : memref<1x225xf32, #tpu.memory_space<vmem>>, vector<1x225xf32>
    %c0_25 = arith.constant 0 : index
    %c0_26 = arith.constant 0 : index
    %13 = vector.load %arg16[%c0_25, %c0_26] : memref<225x1xf32, #tpu.memory_space<vmem>>, vector<225x1xf32>
    %c0_27 = arith.constant 0 : index
    %c0_28 = arith.constant 0 : index
    %14 = vector.load %arg17[%c0_27, %c0_28] : memref<225x1xf32, #tpu.memory_space<vmem>>, vector<225x1xf32>
    %c0_29 = arith.constant 0 : index
    %c0_30 = arith.constant 0 : index
    %c0_31 = arith.constant 0 : index
    %15 = vector.load %arg1[%c0_29, %c0_30, %c0_31] : memref<1x256x225xf32, #tpu.memory_space<vmem>>, vector<1x256x225xf32>
    %16 = vector.shape_cast %15 : vector<1x256x225xf32> to vector<256x225xf32>
    %c0_32 = arith.constant 0 : index
    %c0_33 = arith.constant 0 : index
    %c0_34 = arith.constant 0 : index
    %17 = vector.load %arg2[%c0_32, %c0_33, %c0_34] : memref<1x256x225xf32, #tpu.memory_space<vmem>>, vector<1x256x225xf32>
    %18 = vector.shape_cast %17 : vector<1x256x225xf32> to vector<256x225xf32>
    %cst = arith.constant dense<0.000000e+00> : vector<200x225xf32>
    %19 = tpu.matmul %0, %16, %cst {dimension_numbers = #tpu.dot_dimension_numbers<[1], [0], [0], [1], [0, 0, 1, 1], [], []>} : vector<200x256xf32>, vector<256x225xf32>, vector<200x225xf32> -> vector<200x225xf32>
    %cst_35 = arith.constant dense<0.000000e+00> : vector<200x225xf32>
    %20 = tpu.matmul %1, %18, %cst_35 {dimension_numbers = #tpu.dot_dimension_numbers<[1], [0], [0], [1], [0, 0, 1, 1], [], []>} : vector<200x256xf32>, vector<256x225xf32>, vector<200x225xf32> -> vector<200x225xf32>
    %21 = arith.addf %19, %20 : vector<200x225xf32>
    %22 = vector.extract_strided_slice %21 {offsets = [0, 0], sizes = [8, 161], strides = [1, 1]} : vector<200x225xf32> to vector<8x161xf32>
    %23 = vector.extract_strided_slice %21 {offsets = [8, 1], sizes = [8, 161], strides = [1, 1]} : vector<200x225xf32> to vector<8x161xf32>
    %24 = vector.extract_strided_slice %21 {offsets = [16, 2], sizes = [8, 161], strides = [1, 1]} : vector<200x225xf32> to vector<8x161xf32>
    %25 = vector.extract_strided_slice %21 {offsets = [24, 3], sizes = [8, 161], strides = [1, 1]} : vector<200x225xf32> to vector<8x161xf32>
    %26 = vector.extract_strided_slice %21 {offsets = [32, 4], sizes = [8, 161], strides = [1, 1]} : vector<200x225xf32> to vector<8x161xf32>
    %27 = vector.extract_strided_slice %21 {offsets = [40, 15], sizes = [8, 161], strides = [1, 1]} : vector<200x225xf32> to vector<8x161xf32>
    %28 = vector.extract_strided_slice %21 {offsets = [48, 16], sizes = [8, 161], strides = [1, 1]} : vector<200x225xf32> to vector<8x161xf32>
    %29 = vector.extract_strided_slice %21 {offsets = [56, 17], sizes = [8, 161], strides = [1, 1]} : vector<200x225xf32> to vector<8x161xf32>
    %30 = vector.extract_strided_slice %21 {offsets = [64, 18], sizes = [8, 161], strides = [1, 1]} : vector<200x225xf32> to vector<8x161xf32>
    %31 = vector.extract_strided_slice %21 {offsets = [72, 19], sizes = [8, 161], strides = [1, 1]} : vector<200x225xf32> to vector<8x161xf32>
    %32 = vector.extract_strided_slice %21 {offsets = [80, 30], sizes = [8, 161], strides = [1, 1]} : vector<200x225xf32> to vector<8x161xf32>
    %33 = vector.extract_strided_slice %21 {offsets = [88, 31], sizes = [8, 161], strides = [1, 1]} : vector<200x225xf32> to vector<8x161xf32>
    %34 = vector.extract_strided_slice %21 {offsets = [96, 32], sizes = [8, 161], strides = [1, 1]} : vector<200x225xf32> to vector<8x161xf32>
    %35 = vector.extract_strided_slice %21 {offsets = [104, 33], sizes = [8, 161], strides = [1, 1]} : vector<200x225xf32> to vector<8x161xf32>
    %36 = vector.extract_strided_slice %21 {offsets = [112, 34], sizes = [8, 161], strides = [1, 1]} : vector<200x225xf32> to vector<8x161xf32>
    %37 = vector.extract_strided_slice %21 {offsets = [120, 45], sizes = [8, 161], strides = [1, 1]} : vector<200x225xf32> to vector<8x161xf32>
    %38 = vector.extract_strided_slice %21 {offsets = [128, 46], sizes = [8, 161], strides = [1, 1]} : vector<200x225xf32> to vector<8x161xf32>
    %39 = vector.extract_strided_slice %21 {offsets = [136, 47], sizes = [8, 161], strides = [1, 1]} : vector<200x225xf32> to vector<8x161xf32>
    %40 = vector.extract_strided_slice %21 {offsets = [144, 48], sizes = [8, 161], strides = [1, 1]} : vector<200x225xf32> to vector<8x161xf32>
    %41 = vector.extract_strided_slice %21 {offsets = [152, 49], sizes = [8, 161], strides = [1, 1]} : vector<200x225xf32> to vector<8x161xf32>
    %42 = vector.extract_strided_slice %21 {offsets = [160, 60], sizes = [8, 161], strides = [1, 1]} : vector<200x225xf32> to vector<8x161xf32>
    %43 = vector.extract_strided_slice %21 {offsets = [168, 61], sizes = [8, 161], strides = [1, 1]} : vector<200x225xf32> to vector<8x161xf32>
    %44 = vector.extract_strided_slice %21 {offsets = [176, 62], sizes = [8, 161], strides = [1, 1]} : vector<200x225xf32> to vector<8x161xf32>
    %45 = vector.extract_strided_slice %21 {offsets = [184, 63], sizes = [8, 161], strides = [1, 1]} : vector<200x225xf32> to vector<8x161xf32>
    %46 = vector.extract_strided_slice %21 {offsets = [192, 64], sizes = [8, 161], strides = [1, 1]} : vector<200x225xf32> to vector<8x161xf32>
    %47 = arith.addf %22, %23 : vector<8x161xf32>
    %48 = arith.addf %24, %25 : vector<8x161xf32>
    %49 = arith.addf %26, %27 : vector<8x161xf32>
    %50 = arith.addf %28, %29 : vector<8x161xf32>
    %51 = arith.addf %30, %31 : vector<8x161xf32>
    %52 = arith.addf %32, %33 : vector<8x161xf32>
    %53 = arith.addf %34, %35 : vector<8x161xf32>
    %54 = arith.addf %36, %37 : vector<8x161xf32>
    %55 = arith.addf %38, %39 : vector<8x161xf32>
    %56 = arith.addf %40, %41 : vector<8x161xf32>
    %57 = arith.addf %42, %43 : vector<8x161xf32>
    %58 = arith.addf %44, %45 : vector<8x161xf32>
    %59 = arith.addf %47, %48 : vector<8x161xf32>
    %60 = arith.addf %49, %50 : vector<8x161xf32>
    %61 = arith.addf %51, %52 : vector<8x161xf32>
    %62 = arith.addf %53, %54 : vector<8x161xf32>
    %63 = arith.addf %55, %56 : vector<8x161xf32>
    %64 = arith.addf %57, %58 : vector<8x161xf32>
    %65 = arith.addf %59, %60 : vector<8x161xf32>
    %66 = arith.addf %61, %62 : vector<8x161xf32>
    %67 = arith.addf %63, %64 : vector<8x161xf32>
    %68 = arith.addf %65, %66 : vector<8x161xf32>
    %69 = arith.addf %67, %46 : vector<8x161xf32>
    %70 = arith.addf %68, %69 : vector<8x161xf32>
    %71 = vector.broadcast %2 : vector<8x1xf32> to vector<8x161xf32>
    %72 = arith.addf %70, %71 : vector<8x161xf32>
    %73 = vector.extract_strided_slice %72 {offsets = [0, 0], sizes = [8, 145], strides = [1, 1]} : vector<8x161xf32> to vector<8x145xf32>
    %74 = vector.extract_strided_slice %72 {offsets = [0, 1], sizes = [8, 145], strides = [1, 1]} : vector<8x161xf32> to vector<8x145xf32>
    %75 = arith.maximumf %73, %74 : vector<8x145xf32>
    %76 = vector.extract_strided_slice %72 {offsets = [0, 15], sizes = [8, 145], strides = [1, 1]} : vector<8x161xf32> to vector<8x145xf32>
    %77 = vector.extract_strided_slice %72 {offsets = [0, 16], sizes = [8, 145], strides = [1, 1]} : vector<8x161xf32> to vector<8x145xf32>
    %78 = arith.maximumf %76, %77 : vector<8x145xf32>
    %79 = arith.maximumf %75, %78 : vector<8x145xf32>
    %cst_36 = arith.constant 0.000000e+00 : f32
    %80 = vector.broadcast %cst_36 : f32 to vector<8x145xf32>
    %81 = arith.maximumf %79, %80 : vector<8x145xf32>
    %cst_37 = arith.constant dense<0.000000e+00> : vector<400x145xf32>
    %82 = tpu.matmul %3, %81, %cst_37 {dimension_numbers = #tpu.dot_dimension_numbers<[1], [0], [0], [1], [0, 0, 1, 1], [], []>} : vector<400x8xf32>, vector<8x145xf32>, vector<400x145xf32> -> vector<400x145xf32>
    %83 = vector.extract_strided_slice %82 {offsets = [0, 0], sizes = [16, 81], strides = [1, 1]} : vector<400x145xf32> to vector<16x81xf32>
    %84 = vector.extract_strided_slice %82 {offsets = [16, 1], sizes = [16, 81], strides = [1, 1]} : vector<400x145xf32> to vector<16x81xf32>
    %85 = vector.extract_strided_slice %82 {offsets = [32, 2], sizes = [16, 81], strides = [1, 1]} : vector<400x145xf32> to vector<16x81xf32>
    %86 = vector.extract_strided_slice %82 {offsets = [48, 3], sizes = [16, 81], strides = [1, 1]} : vector<400x145xf32> to vector<16x81xf32>
    %87 = vector.extract_strided_slice %82 {offsets = [64, 4], sizes = [16, 81], strides = [1, 1]} : vector<400x145xf32> to vector<16x81xf32>
    %88 = vector.extract_strided_slice %82 {offsets = [80, 15], sizes = [16, 81], strides = [1, 1]} : vector<400x145xf32> to vector<16x81xf32>
    %89 = vector.extract_strided_slice %82 {offsets = [96, 16], sizes = [16, 81], strides = [1, 1]} : vector<400x145xf32> to vector<16x81xf32>
    %90 = vector.extract_strided_slice %82 {offsets = [112, 17], sizes = [16, 81], strides = [1, 1]} : vector<400x145xf32> to vector<16x81xf32>
    %91 = vector.extract_strided_slice %82 {offsets = [128, 18], sizes = [16, 81], strides = [1, 1]} : vector<400x145xf32> to vector<16x81xf32>
    %92 = vector.extract_strided_slice %82 {offsets = [144, 19], sizes = [16, 81], strides = [1, 1]} : vector<400x145xf32> to vector<16x81xf32>
    %93 = vector.extract_strided_slice %82 {offsets = [160, 30], sizes = [16, 81], strides = [1, 1]} : vector<400x145xf32> to vector<16x81xf32>
    %94 = vector.extract_strided_slice %82 {offsets = [176, 31], sizes = [16, 81], strides = [1, 1]} : vector<400x145xf32> to vector<16x81xf32>
    %95 = vector.extract_strided_slice %82 {offsets = [192, 32], sizes = [16, 81], strides = [1, 1]} : vector<400x145xf32> to vector<16x81xf32>
    %96 = vector.extract_strided_slice %82 {offsets = [208, 33], sizes = [16, 81], strides = [1, 1]} : vector<400x145xf32> to vector<16x81xf32>
    %97 = vector.extract_strided_slice %82 {offsets = [224, 34], sizes = [16, 81], strides = [1, 1]} : vector<400x145xf32> to vector<16x81xf32>
    %98 = vector.extract_strided_slice %82 {offsets = [240, 45], sizes = [16, 81], strides = [1, 1]} : vector<400x145xf32> to vector<16x81xf32>
    %99 = vector.extract_strided_slice %82 {offsets = [256, 46], sizes = [16, 81], strides = [1, 1]} : vector<400x145xf32> to vector<16x81xf32>
    %100 = vector.extract_strided_slice %82 {offsets = [272, 47], sizes = [16, 81], strides = [1, 1]} : vector<400x145xf32> to vector<16x81xf32>
    %101 = vector.extract_strided_slice %82 {offsets = [288, 48], sizes = [16, 81], strides = [1, 1]} : vector<400x145xf32> to vector<16x81xf32>
    %102 = vector.extract_strided_slice %82 {offsets = [304, 49], sizes = [16, 81], strides = [1, 1]} : vector<400x145xf32> to vector<16x81xf32>
    %103 = vector.extract_strided_slice %82 {offsets = [320, 60], sizes = [16, 81], strides = [1, 1]} : vector<400x145xf32> to vector<16x81xf32>
    %104 = vector.extract_strided_slice %82 {offsets = [336, 61], sizes = [16, 81], strides = [1, 1]} : vector<400x145xf32> to vector<16x81xf32>
    %105 = vector.extract_strided_slice %82 {offsets = [352, 62], sizes = [16, 81], strides = [1, 1]} : vector<400x145xf32> to vector<16x81xf32>
    %106 = vector.extract_strided_slice %82 {offsets = [368, 63], sizes = [16, 81], strides = [1, 1]} : vector<400x145xf32> to vector<16x81xf32>
    %107 = vector.extract_strided_slice %82 {offsets = [384, 64], sizes = [16, 81], strides = [1, 1]} : vector<400x145xf32> to vector<16x81xf32>
    %108 = arith.addf %83, %84 : vector<16x81xf32>
    %109 = arith.addf %85, %86 : vector<16x81xf32>
    %110 = arith.addf %87, %88 : vector<16x81xf32>
    %111 = arith.addf %89, %90 : vector<16x81xf32>
    %112 = arith.addf %91, %92 : vector<16x81xf32>
    %113 = arith.addf %93, %94 : vector<16x81xf32>
    %114 = arith.addf %95, %96 : vector<16x81xf32>
    %115 = arith.addf %97, %98 : vector<16x81xf32>
    %116 = arith.addf %99, %100 : vector<16x81xf32>
    %117 = arith.addf %101, %102 : vector<16x81xf32>
    %118 = arith.addf %103, %104 : vector<16x81xf32>
    %119 = arith.addf %105, %106 : vector<16x81xf32>
    %120 = arith.addf %108, %109 : vector<16x81xf32>
    %121 = arith.addf %110, %111 : vector<16x81xf32>
    %122 = arith.addf %112, %113 : vector<16x81xf32>
    %123 = arith.addf %114, %115 : vector<16x81xf32>
    %124 = arith.addf %116, %117 : vector<16x81xf32>
    %125 = arith.addf %118, %119 : vector<16x81xf32>
    %126 = arith.addf %120, %121 : vector<16x81xf32>
    %127 = arith.addf %122, %123 : vector<16x81xf32>
    %128 = arith.addf %124, %125 : vector<16x81xf32>
    %129 = arith.addf %126, %127 : vector<16x81xf32>
    %130 = arith.addf %128, %107 : vector<16x81xf32>
    %131 = arith.addf %129, %130 : vector<16x81xf32>
    %132 = vector.broadcast %4 : vector<16x1xf32> to vector<16x81xf32>
    %133 = arith.addf %131, %132 : vector<16x81xf32>
    %134 = vector.extract_strided_slice %133 {offsets = [0, 0], sizes = [16, 65], strides = [1, 1]} : vector<16x81xf32> to vector<16x65xf32>
    %135 = vector.extract_strided_slice %133 {offsets = [0, 1], sizes = [16, 65], strides = [1, 1]} : vector<16x81xf32> to vector<16x65xf32>
    %136 = arith.maximumf %134, %135 : vector<16x65xf32>
    %137 = vector.extract_strided_slice %133 {offsets = [0, 15], sizes = [16, 65], strides = [1, 1]} : vector<16x81xf32> to vector<16x65xf32>
    %138 = vector.extract_strided_slice %133 {offsets = [0, 16], sizes = [16, 65], strides = [1, 1]} : vector<16x81xf32> to vector<16x65xf32>
    %139 = arith.maximumf %137, %138 : vector<16x65xf32>
    %140 = arith.maximumf %136, %139 : vector<16x65xf32>
    %cst_38 = arith.constant 0.000000e+00 : f32
    %141 = vector.broadcast %cst_38 : f32 to vector<16x65xf32>
    %142 = arith.maximumf %140, %141 : vector<16x65xf32>
    %cst_39 = arith.constant dense<0.000000e+00> : vector<16x512xf32>
    %143 = tpu.matmul %142, %5, %cst_39 {dimension_numbers = #tpu.dot_dimension_numbers<[1], [0], [0], [1], [0, 0, 1, 1], [], []>} : vector<16x65xf32>, vector<65x512xf32>, vector<16x512xf32> -> vector<16x512xf32>
    %144 = arith.mulf %143, %6 : vector<16x512xf32>
    %cst_40 = arith.constant dense<0.000000e+00> : vector<16x32xf32>
    %145 = tpu.matmul %144, %7, %cst_40 {dimension_numbers = #tpu.dot_dimension_numbers<[1], [0], [0], [1], [0, 0, 1, 1], [], []>} : vector<16x512xf32>, vector<512x32xf32>, vector<16x32xf32> -> vector<16x32xf32>
    %cst_41 = arith.constant dense<0.000000e+00> : vector<32xf32>
    %146 = vector.multi_reduction <add>, %145, %cst_41 [0] : vector<16x32xf32> to vector<32xf32>
    %147 = vector.shape_cast %146 : vector<32xf32> to vector<1x32xf32>
    %148 = arith.addf %147, %8 : vector<1x32xf32>
    %cst_42 = arith.constant 0.000000e+00 : f32
    %149 = vector.broadcast %cst_42 : f32 to vector<1x32xf32>
    %150 = arith.maximumf %148, %149 : vector<1x32xf32>
    %cst_43 = arith.constant dense<0.000000e+00> : vector<1x8xf32>
    %151 = tpu.matmul %150, %9, %cst_43 {dimension_numbers = #tpu.dot_dimension_numbers<[1], [0], [0], [1], [0, 0, 1, 1], [], []>} : vector<1x32xf32>, vector<32x8xf32>, vector<1x8xf32> -> vector<1x8xf32>
    %152 = arith.addf %151, %10 : vector<1x8xf32>
    %c0_44 = arith.constant 0 : index
    %c0_45 = arith.constant 0 : index
    %c0_46 = arith.constant 0 : index
    %153 = vector.load %arg19[%c0_44, %c0_45, %c0_46] : memref<1x1x8xf32, #tpu.memory_space<vmem>>, vector<1x1x8xf32>
    %154 = vector.shape_cast %153 : vector<1x1x8xf32> to vector<1x8xf32>
    %155 = vector.shape_cast %152 : vector<1x8xf32> to vector<1x1x8xf32>
    tpu.vector_store %arg19[%c0_44, %c0_45, %c0_46], %155 {strides = array<i32>} : memref<1x1x8xf32, #tpu.memory_space<vmem>>, vector<1x1x8xf32>,
    %156 = vector.extract_strided_slice %152 {offsets = [0, 0], sizes = [1, 1], strides = [1, 1]} : vector<1x8xf32> to vector<1x1xf32>
    %157 = vector.broadcast %156 : vector<1x1xf32> to vector<1x225xf32>
    %158 = arith.mulf %11, %157 : vector<1x225xf32>
    %159 = vector.extract_strided_slice %152 {offsets = [0, 1], sizes = [1, 1], strides = [1, 1]} : vector<1x8xf32> to vector<1x1xf32>
    %160 = vector.broadcast %159 : vector<1x1xf32> to vector<1x225xf32>
    %161 = arith.mulf %12, %160 : vector<1x225xf32>
    %162 = arith.addf %158, %161 : vector<1x225xf32>
    %163 = vector.extract_strided_slice %152 {offsets = [0, 2], sizes = [1, 1], strides = [1, 1]} : vector<1x8xf32> to vector<1x1xf32>
    %164 = vector.broadcast %163 : vector<1x1xf32> to vector<1x225xf32>
    %165 = arith.addf %162, %164 : vector<1x225xf32>
    %166 = vector.extract_strided_slice %152 {offsets = [0, 3], sizes = [1, 1], strides = [1, 1]} : vector<1x8xf32> to vector<1x1xf32>
    %167 = vector.broadcast %166 : vector<1x1xf32> to vector<1x225xf32>
    %168 = arith.mulf %11, %167 : vector<1x225xf32>
    %169 = vector.extract_strided_slice %152 {offsets = [0, 4], sizes = [1, 1], strides = [1, 1]} : vector<1x8xf32> to vector<1x1xf32>
    %170 = vector.broadcast %169 : vector<1x1xf32> to vector<1x225xf32>
    %171 = arith.mulf %12, %170 : vector<1x225xf32>
    %172 = arith.addf %168, %171 : vector<1x225xf32>
    %173 = vector.extract_strided_slice %152 {offsets = [0, 5], sizes = [1, 1], strides = [1, 1]} : vector<1x8xf32> to vector<1x1xf32>
    %174 = vector.broadcast %173 : vector<1x1xf32> to vector<1x225xf32>
    %175 = arith.addf %172, %174 : vector<1x225xf32>
    %cst_47 = arith.constant 1.000000e+00 : f32
    %176 = vector.broadcast %cst_47 : f32 to vector<1x225xf32>
    %177 = arith.addf %165, %176 : vector<1x225xf32>
    %cst_48 = arith.constant 1.500000e+01 : f32
    %178 = vector.broadcast %cst_48 : f32 to vector<1x225xf32>
    %179 = arith.mulf %177, %178 : vector<1x225xf32>
    %cst_49 = arith.constant 1.000000e+00 : f32
    %180 = vector.broadcast %cst_49 : f32 to vector<1x225xf32>
    %181 = arith.subf %179, %180 : vector<1x225xf32>
    %cst_50 = arith.constant 5.000000e-01 : f32
    %182 = vector.broadcast %cst_50 : f32 to vector<1x225xf32>
    %183 = arith.mulf %181, %182 : vector<1x225xf32>
    %cst_51 = arith.constant 1.000000e+00 : f32
    %184 = vector.broadcast %cst_51 : f32 to vector<1x225xf32>
    %185 = arith.addf %175, %184 : vector<1x225xf32>
    %cst_52 = arith.constant 1.500000e+01 : f32
    %186 = vector.broadcast %cst_52 : f32 to vector<1x225xf32>
    %187 = arith.mulf %185, %186 : vector<1x225xf32>
    %cst_53 = arith.constant 1.000000e+00 : f32
    %188 = vector.broadcast %cst_53 : f32 to vector<1x225xf32>
    %189 = arith.subf %187, %188 : vector<1x225xf32>
    %cst_54 = arith.constant 5.000000e-01 : f32
    %190 = vector.broadcast %cst_54 : f32 to vector<1x225xf32>
    %191 = arith.mulf %189, %190 : vector<1x225xf32>
    %192 = math.floor %183 : vector<1x225xf32>
    %193 = math.floor %191 : vector<1x225xf32>
    %194 = arith.subf %183, %192 : vector<1x225xf32>
    %cst_55 = arith.constant 1.000000e+00 : f32
    %195 = vector.broadcast %cst_55 : f32 to vector<1x225xf32>
    %196 = arith.subf %195, %194 : vector<1x225xf32>
    %197 = arith.subf %191, %193 : vector<1x225xf32>
    %cst_56 = arith.constant 1.000000e+00 : f32
    %198 = vector.broadcast %cst_56 : f32 to vector<1x225xf32>
    %199 = arith.subf %198, %197 : vector<1x225xf32>
    %200 = vector.broadcast %13 : vector<225x1xf32> to vector<225x225xf32>
    %201 = vector.broadcast %192 : vector<1x225xf32> to vector<225x225xf32>
    %202 = arith.cmpf oeq, %200, %201 : vector<225x225xf32>
    %cst_57 = arith.constant 0.000000e+00 : f32
    %203 = vector.shape_cast %196 : vector<1x225xf32> to vector<1x225xf32>
    %204 = vector.broadcast %203 : vector<1x225xf32> to vector<225x225xf32>
    %205 = vector.broadcast %cst_57 : f32 to vector<225x225xf32>
    %206 = arith.select %202, %204, %205 : vector<225x225xi1>, vector<225x225xf32>
    %cst_58 = arith.constant 1.000000e+00 : f32
    %207 = vector.broadcast %cst_58 : f32 to vector<1x225xf32>
    %208 = arith.addf %192, %207 : vector<1x225xf32>
    %209 = vector.broadcast %13 : vector<225x1xf32> to vector<225x225xf32>
    %210 = vector.broadcast %208 : vector<1x225xf32> to vector<225x225xf32>
    %211 = arith.cmpf oeq, %209, %210 : vector<225x225xf32>
    %cst_59 = arith.constant 0.000000e+00 : f32
    %212 = vector.shape_cast %194 : vector<1x225xf32> to vector<1x225xf32>
    %213 = vector.broadcast %212 : vector<1x225xf32> to vector<225x225xf32>
    %214 = vector.broadcast %cst_59 : f32 to vector<225x225xf32>
    %215 = arith.select %211, %213, %214 : vector<225x225xi1>, vector<225x225xf32>
    %216 = arith.addf %206, %215 : vector<225x225xf32>
    %217 = vector.broadcast %14 : vector<225x1xf32> to vector<225x225xf32>
    %218 = vector.broadcast %193 : vector<1x225xf32> to vector<225x225xf32>
    %219 = arith.cmpf oeq, %217, %218 : vector<225x225xf32>
    %cst_60 = arith.constant 0.000000e+00 : f32
    %220 = vector.shape_cast %199 : vector<1x225xf32> to vector<1x225xf32>
    %221 = vector.broadcast %220 : vector<1x225xf32> to vector<225x225xf32>
    %222 = vector.broadcast %cst_60 : f32 to vector<225x225xf32>
    %223 = arith.select %219, %221, %222 : vector<225x225xi1>, vector<225x225xf32>
    %cst_61 = arith.constant 1.000000e+00 : f32
    %224 = vector.broadcast %cst_61 : f32 to vector<1x225xf32>
    %225 = arith.addf %193, %224 : vector<1x225xf32>
    %226 = vector.broadcast %14 : vector<225x1xf32> to vector<225x225xf32>
    %227 = vector.broadcast %225 : vector<1x225xf32> to vector<225x225xf32>
    %228 = arith.cmpf oeq, %226, %227 : vector<225x225xf32>
    %cst_62 = arith.constant 0.000000e+00 : f32
    %229 = vector.shape_cast %197 : vector<1x225xf32> to vector<1x225xf32>
    %230 = vector.broadcast %229 : vector<1x225xf32> to vector<225x225xf32>
    %231 = vector.broadcast %cst_62 : f32 to vector<225x225xf32>
    %232 = arith.select %228, %230, %231 : vector<225x225xi1>, vector<225x225xf32>
    %233 = arith.addf %223, %232 : vector<225x225xf32>
    %234 = arith.mulf %216, %233 : vector<225x225xf32>
    %cst_63 = arith.constant dense<0.000000e+00> : vector<256x225xf32>
    %235 = tpu.matmul %16, %234, %cst_63 {dimension_numbers = #tpu.dot_dimension_numbers<[1], [0], [0], [1], [0, 0, 1, 1], [], []>} : vector<256x225xf32>, vector<225x225xf32>, vector<256x225xf32> -> vector<256x225xf32>
    %c0_64 = arith.constant 0 : index
    %c0_65 = arith.constant 0 : index
    %c0_66 = arith.constant 0 : index
    %236 = vector.load %arg18[%c0_64, %c0_65, %c0_66] : memref<1x256x225xf32, #tpu.memory_space<vmem>>, vector<1x256x225xf32>
    %237 = vector.shape_cast %236 : vector<1x256x225xf32> to vector<256x225xf32>
    %238 = vector.shape_cast %235 : vector<256x225xf32> to vector<1x256x225xf32>
    tpu.vector_store %arg18[%c0_64, %c0_65, %c0_66], %238 {strides = array<i32>} : memref<1x256x225xf32, #tpu.memory_space<vmem>>, vector<1x256x225xf32>,
    return
  }
  func.func @transform_0(%arg0: i32) -> (i32, i32, i32) {
    %c0_i32 = arith.constant 0 : i32
    %c0_i32_0 = arith.constant 0 : i32
    %c0_i32_1 = arith.constant 0 : i32
    return %arg0, %c0_i32, %c0_i32_0 : i32, i32, i32
  }
  func.func @transform_1(%arg0: i32) -> (i32, i32, i32) {
    %c0_i32 = arith.constant 0 : i32
    %c0_i32_0 = arith.constant 0 : i32
    %c0_i32_1 = arith.constant 0 : i32
    return %arg0, %c0_i32, %c0_i32_0 : i32, i32, i32
  }
  func.func @transform_2(%arg0: i32) -> (i32, i32) {
    %c0_i32 = arith.constant 0 : i32
    %c0_i32_0 = arith.constant 0 : i32
    %c0_i32_1 = arith.constant 0 : i32
    return %c0_i32, %c0_i32_0 : i32, i32
  }
  func.func @transform_3(%arg0: i32) -> (i32, i32) {
    %c0_i32 = arith.constant 0 : i32
    %c0_i32_0 = arith.constant 0 : i32
    %c0_i32_1 = arith.constant 0 : i32
    return %c0_i32, %c0_i32_0 : i32, i32
  }
  func.func @transform_4(%arg0: i32) -> (i32, i32) {
    %c0_i32 = arith.constant 0 : i32
    %c0_i32_0 = arith.constant 0 : i32
    %c0_i32_1 = arith.constant 0 : i32
    return %c0_i32, %c0_i32_0 : i32, i32
  }
  func.func @transform_5(%arg0: i32) -> (i32, i32) {
    %c0_i32 = arith.constant 0 : i32
    %c0_i32_0 = arith.constant 0 : i32
    %c0_i32_1 = arith.constant 0 : i32
    return %c0_i32, %c0_i32_0 : i32, i32
  }
  func.func @transform_6(%arg0: i32) -> (i32, i32) {
    %c0_i32 = arith.constant 0 : i32
    %c0_i32_0 = arith.constant 0 : i32
    %c0_i32_1 = arith.constant 0 : i32
    return %c0_i32, %c0_i32_0 : i32, i32
  }
  func.func @transform_7(%arg0: i32) -> (i32, i32) {
    %c0_i32 = arith.constant 0 : i32
    %c0_i32_0 = arith.constant 0 : i32
    %c0_i32_1 = arith.constant 0 : i32
    return %c0_i32, %c0_i32_0 : i32, i32
  }
  func.func @transform_8(%arg0: i32) -> (i32, i32) {
    %c0_i32 = arith.constant 0 : i32
    %c0_i32_0 = arith.constant 0 : i32
    %c0_i32_1 = arith.constant 0 : i32
    return %c0_i32, %c0_i32_0 : i32, i32
  }
  func.func @transform_9(%arg0: i32) -> (i32, i32) {
    %c0_i32 = arith.constant 0 : i32
    %c0_i32_0 = arith.constant 0 : i32
    %c0_i32_1 = arith.constant 0 : i32
    return %c0_i32, %c0_i32_0 : i32, i32
  }
  func.func @transform_10(%arg0: i32) -> (i32, i32) {
    %c0_i32 = arith.constant 0 : i32
    %c0_i32_0 = arith.constant 0 : i32
    %c0_i32_1 = arith.constant 0 : i32
    return %c0_i32, %c0_i32_0 : i32, i32
  }
  func.func @transform_11(%arg0: i32) -> (i32, i32) {
    %c0_i32 = arith.constant 0 : i32
    %c0_i32_0 = arith.constant 0 : i32
    %c0_i32_1 = arith.constant 0 : i32
    return %c0_i32, %c0_i32_0 : i32, i32
  }
  func.func @transform_12(%arg0: i32) -> (i32, i32) {
    %c0_i32 = arith.constant 0 : i32
    %c0_i32_0 = arith.constant 0 : i32
    %c0_i32_1 = arith.constant 0 : i32
    return %c0_i32, %c0_i32_0 : i32, i32
  }
  func.func @transform_13(%arg0: i32) -> (i32, i32) {
    %c0_i32 = arith.constant 0 : i32
    %c0_i32_0 = arith.constant 0 : i32
    %c0_i32_1 = arith.constant 0 : i32
    return %c0_i32, %c0_i32_0 : i32, i32
  }
  func.func @transform_14(%arg0: i32) -> (i32, i32) {
    %c0_i32 = arith.constant 0 : i32
    %c0_i32_0 = arith.constant 0 : i32
    %c0_i32_1 = arith.constant 0 : i32
    return %c0_i32, %c0_i32_0 : i32, i32
  }
  func.func @transform_15(%arg0: i32) -> (i32, i32) {
    %c0_i32 = arith.constant 0 : i32
    %c0_i32_0 = arith.constant 0 : i32
    %c0_i32_1 = arith.constant 0 : i32
    return %c0_i32, %c0_i32_0 : i32, i32
  }
  func.func @transform_16(%arg0: i32) -> (i32, i32) {
    %c0_i32 = arith.constant 0 : i32
    %c0_i32_0 = arith.constant 0 : i32
    %c0_i32_1 = arith.constant 0 : i32
    return %c0_i32, %c0_i32_0 : i32, i32
  }
  func.func @transform_17(%arg0: i32) -> (i32, i32, i32) {
    %c0_i32 = arith.constant 0 : i32
    %c0_i32_0 = arith.constant 0 : i32
    %c0_i32_1 = arith.constant 0 : i32
    return %arg0, %c0_i32, %c0_i32_0 : i32, i32, i32
  }
  func.func @transform_18(%arg0: i32) -> (i32, i32, i32) {
    %c0_i32 = arith.constant 0 : i32
    %c0_i32_0 = arith.constant 0 : i32
    %c0_i32_1 = arith.constant 0 : i32
    return %arg0, %c0_i32, %c0_i32_0 : i32, i32, i32
  }
}

</mosaic_0001>

<bundles_post_ra>
// kernel: squeeze.1
= control target key start
LH: loop header
LB: loop body
LE: loop exit
PB: predicated region body
PF: predicated region fallthrough
CT: control target
= control target key end

     0   :  { %s90_s0 = inlined_call_operand.vmem [shape: f32[2,6], index: 0, kind: input, shape index: {}]   ;;  %s91_s1 = inlined_call_operand.hbm [shape: f32[2,2,3], index: 1, kind: output, shape index: {}]  }
   0x1   :  { %v5_v0 = vld [vmem:[%s90_s0] sm:$0x3] }
   0x2   :  { %2 = vsyncpa [#allocation1], 0  ;;  %6 = vst [vmem:[#allocation3] sm:$0x3] %v5_v0  ;;  %vm8_vm0 = vcmask 23552   ;;  %s63_s0 = smov 125  }
   0x3   :  { %s64_s8 = smov [#allocation0]  }
   0x4   :  { %s31_s9 = sshll.u32 %s64_s8, 4  ;;  %s32_s9 = int_to_ptr.vmem [resolvable:$true] %s31_s9 }
   0x5   :  { %s39_s10 = scalar_lea.vmem %s32_s9, 64  ;;  %p44_p1 = scmp.lt.s32.totalorder %s32_s9, %s32_s9 }
   0x6   :  { %p40_p0 = scmp.ne.s32.totalorder %s32_s9, %s39_s10  ;;  %p45_p2 = scmp.lt.s32.totalorder %s39_s10, %s39_s10 }
   0x8   :  { %p46_p3 = por %p45_p2, %p44_p1 }
   0x9   :  { %v10_v1 = vld [vmem:[#allocation3] sm:$0x3]  }
   0xa   :  { %v7_v2 = vld [vmem:[#allocation3] sm:$0x3]   ;;  %11 = vrot.lane.b32.xlu0 %v10_v1, %s63_s0  ;;  %p47_p4 = pnand %p46_p3, %p40_p0 }
   0xb   :  { %9 = vst.msk [vmem:[#allocation2] ss:$8 sm:$0x3] %vm8_vm0, %v7_v2  }
  0x7c   :  { %v12_v3 = vpop.permute.xlu0 %11  }
  0x7d   :  { %15 = vst.msk [vmem:[#allocation2 + $0x1] ss:$8 sm:$0x3] %vm8_vm0, %v12_v3  }
  0x84   :  { %v19_v4 = vld [vmem:[#allocation2] sm:$0x3]  ;;  %v23_v5 = vld [vmem:[#allocation2 + $0x8] sm:$0x3] }
  0x85   :  { %21 = vst [vmem:[#allocation0] sm:$0x3] %v19_v4  ;;  %26 = vst [vmem:[#allocation0 + $0x2] sm:$0x3] %v23_v5 }
  0x86   :  { %50 = shalt.err (!%p47_p4)
}
  0x87   :  { %s51_s13 = scalar_lea.hbm %s91_s1, 64 }
  0x88   :  { %p52_p5 = scmp.ne.s32.totalorder %s91_s1, %s51_s13  ;;  %p55_p6 = scmp.lt.u32.totalorder %s51_s13, %s91_s1 }
  0x8a   :  { %p57_p7 = pnand %p55_p6, %p52_p5 }
  0x8c   :  { %60 = shalt.err (!%p57_p7)
}
  0x8d   :  { %34 = dma.vmem_to_hbm [thread:$0]  %s32_s9, 64, %s91_s1, [#allocation1]  }
  0x8e   :  { %61 = dma.done.wait [#allocation1], 64  }
  0x8f   :  { %62 = vsyncadd [#allocation1], 4294967232 }
  0x90   :  { %36 = vsyncpa [#allocation1], 1 }

// kernel: _stn_forward_impl.1
= control target key start
LH: loop header
LB: loop body
LE: loop exit
PB: predicated region body
PF: predicated region fallthrough
CT: control target
= control target key end

     0   :  { %s5406_s27 = smov 0   ;;  %s8122_s0 = inlined_call_operand.vmem [shape: f32[2,256,225], index: 0, kind: input, shape index: {}]   ;;  %s8123_s1 = inlined_call_operand.vmem [shape: f32[2,256,225], index: 1, kind: input, shape index: {}]   ;;  %s8124_s2 = inlined_call_operand.vmem [shape: f32[200,256], index: 2, kind: input, shape index: {}]   ;;  %s8125_s3 = inlined_call_operand.vmem [shape: f32[200,256], index: 3, kind: input, shape index: {}]   ;;  %s8126_s4 = inlined_call_operand.vmem [shape: f32[8,1], index: 4, kind: input, shape index: {}]   ;;  %s8127_s5 = inlined_call_operand.vmem [shape: f32[400,8], index: 5, kind: input, shape index: {}]   ;;  %s8128_s6 = inlined_call_operand.vmem [shape: f32[16,1], index: 6, kind: input, shape index: {}]   ;;  %s8129_s7 = inlined_call_operand.vmem [shape: f32[65,512], index: 7, kind: input, shape index: {}]   ;;  %s8130_s8 = inlined_call_operand.vmem [shape: f32[16,512], index: 8, kind: input, shape index: {}]   ;;  %s8131_s9 = inlined_call_operand.vmem [shape: f32[512,32], index: 9, kind: input, shape index: {}]   ;;  %s8132_s10 = inlined_call_operand.vmem [shape: f32[1,32], index: 10, kind: input, shape index: {}]   ;;  %s8133_s11 = inlined_call_operand.vmem [shape: f32[32,8], index: 11, kind: input, shape index: {}]   ;;  %s8134_s12 = inlined_call_operand.vmem [shape: f32[1,8], index: 12, kind: input, shape index: {}]   ;;  %s8135_s13 = inlined_call_operand.vmem [shape: f32[1,225], index: 13, kind: input, shape index: {}]   ;;  %s8136_s14 = inlined_call_operand.vmem [shape: f32[1,225], index: 14, kind: input, shape index: {}]   ;;  %s8137_s15 = inlined_call_operand.vmem [shape: f32[225,1], index: 15, kind: input, shape index: {}]   ;;  %s8138_s16 = inlined_call_operand.vmem [shape: f32[225,1], index: 16, kind: input, shape index: {}]   ;;  %s8139_s17 = inlined_call_operand.vmem [shape: f32[2,256,225], index: 17, kind: output, shape index: {0}]   ;;  %s8140_s18 = inlined_call_operand.vmem [shape: f32[2,1,8], index: 18, kind: output, shape index: {1}]  }
   0x1   :  { %8160 = sst [smem:[#allocation26_spill]] %s8122_s0 }
   0x2   :  { %8161 = sst [smem:[#allocation27_spill]] %s8123_s1 }
   0x3   :  { %8162 = sst [smem:[#allocation28_spill]] %s8124_s2 }
   0x4   :  { %8163 = sst [smem:[#allocation29_spill]] %s8125_s3 }
   0x5 LB: > { %s4644_s28 = sadd.s32 4294967295, %s5291_s27   ;;  %p4648_p0 = scmp.ge.s32.totalorder %s5291_s27, 1  ;;  %s5291_s27 = sphi %s5406_s27, %s29_s27  }
   0x6   : > { %p525_p1 = scmp.lt.s32.totalorder %s5291_s27, 3 }
   0x8   : > { %p526_p2 = pnand %p4648_p0, %p525_p1 }
   0xa   : > { %529 = sbr.rel (%p526_p2) target bundleno = 3613 (0xe1d), region = 88 }
  0x11   : > { %p587_p3 = scmp.lt.s32.totalorder %s4644_s28, 1  ;;  %s8164_s3 = sld [smem:[#allocation29_spill]]  ;;  %vm1519_vm0 = vcmask 957440   ;;  %vm1496_vm1 = vcmask 1039360   ;;  %vm1630_vm2 = vcmask 1031168   ;;  %vm1642_vm3 = vcmask 949248  }
  0x12   : > { %s8165_s20 = sld [smem:[#allocation27_spill]]  ;;  %s8166_s23 = sld [smem:[#allocation26_spill]]  ;;  %vm1710_vm4 = vcmask 932864   ;;  %vm1733_vm5 = vcmask 900096   ;;  %vm1698_vm6 = vcmask 1014784   ;;  %vm1756_vm7 = vcmask 670720  }
  0x13   : > { %s8226_s28 = smov (!%p587_p3, %s4644_s28), 1  ;;  %s8167_s26 = sld [smem:[#allocation28_spill]]  ;;  %vm1786_vm8 = vcmask 924672   ;;  %vm1794_vm9 = vcmask 64512   ;;  %vm2627_vm10 = vcmask 1040384   ;;  %vm2620_vm11 = vcmask 531456  }
  0x14   : > { %s5420_s0 = sshll.u32 %s8226_s28, 9  ;;  %s5294_s25 = smov 127   ;;  %vm5305_vm12 = vmmov 0   ;;  %vm2952_vm13 = vcmask 261120   ;;  %vm3037_vm14 = vcmask 57344  }
  0x15   : > { %s8154_s29 = smov 126   ;;  %s8152_s30 = smov 116  }
  0x16   : > { %s8146_s19 = smov 114   ;;  %s8150_s1 = smov 110  }
  0x17   : > { %v656_v0 = vld [vmem:[%s8164_s3 + $0x8] sm:$0xff]  ;;  %s8142_s2 = smov 82   ;;  %s8172_s22 = smov 124  }
  0x18   : > { %1124 = vmatprep.mubr.f32.mxu0 %v656_v0  ;;  %s5426_s21 = scalar_lea.vmem %s8165_s20, %s5420_s0  ;;  %s5494_s24 = scalar_lea.vmem %s8166_s23, %s5420_s0 }
  0x19   : > { %v997_v1 = vld [vmem:[%s5426_s21 + $0x8] sm:$0xff]  ;;  %v999_v2 = vld [vmem:[%s5426_s21 + $0x18] sm:$0xff]  ;;  %v996_v3 = vld [vmem:[%s5426_s21] sm:$0xff]  ;;  %s5293_s23 = smov 117   ;;  %s8144_s20 = smov 124  }
  0x1a   : > { %v4847_v4 = vpack.c.bf16 %v999_v2, %v997_v1  ;;  %v998_v5 = vld [vmem:[%s5426_s21 + $0x10] sm:$0xff]  ;;  %v1001_v6 = vld [vmem:[%s5426_s21 + $0x28] sm:$0xff]  ;;  %v1003_v7 = vld [vmem:[%s5426_s21 + $0x38] sm:$0xff] }
  0x1b   : > { %v4849_v8 = vpack.c.bf16 %v998_v5, %v996_v3  ;;  %v4851_v9 = vpack.c.bf16 %v1003_v7, %v1001_v6  ;;  %v1000_v10 = vld [vmem:[%s5426_s21 + $0x20] sm:$0xff]  ;;  %v1002_v11 = vld [vmem:[%s5426_s21 + $0x30] sm:$0xff]  ;;  %v1005_v12 = vld [vmem:[%s5426_s21 + $0x48] sm:$0xff] }
  0x1c   : > { %4848 = vmatprep.subr.bf16.mxu0 %v4847_v4  ;;  %v1007_v13 = vld [vmem:[%s5426_s21 + $0x58] sm:$0xff]  ;;  %v4853_v14 = vpack.c.bf16 %v1002_v11, %v1000_v10  ;;  %v1004_v16 = vld [vmem:[%s5426_s21 + $0x40] sm:$0xff]  ;;  %v1006_v17 = vld [vmem:[%s5426_s21 + $0x50] sm:$0xff] }
  0x1d   : > { %4850 = vmatpush1.bf16.msra.mxu0 %v4849_v8  ;;  %v4855_v15 = vpack.c.bf16 %v1007_v13, %v1005_v12  ;;  %v1009_v18 = vld [vmem:[%s5426_s21 + $0x68] sm:$0xff]  ;;  %v1011_v19 = vld [vmem:[%s5426_s21 + $0x78] sm:$0xff]  ;;  %v4857_v20 = vpack.c.bf16 %v1006_v17, %v1004_v16  ;;  %v1008_v22 = vld [vmem:[%s5426_s21 + $0x60] sm:$0xff] }
  0x1e   : > { %4852 = vmatprep.subr.bf16.mxu0 %v4851_v9  ;;  %v4859_v21 = vpack.c.bf16 %v1011_v19, %v1009_v18  ;;  %v1010_v23 = vld [vmem:[%s5426_s21 + $0x70] sm:$0xff]  ;;  %v1013_v24 = vld [vmem:[%s5426_s21 + $0x88] sm:$0xff]  ;;  %v1015_v25 = vld [vmem:[%s5426_s21 + $0x98] sm:$0xff] }
  0x1f   : > { %v4861_v26 = vpack.c.bf16 %v1010_v23, %v1008_v22  ;;  %v4863_v27 = vpack.c.bf16 %v1015_v25, %v1013_v24  ;;  %v1012_v28 = vld [vmem:[%s5426_s21 + $0x80] sm:$0xff]  ;;  %v1014_v29 = vld [vmem:[%s5426_s21 + $0x90] sm:$0xff]  ;;  %v1017_v30 = vld [vmem:[%s5426_s21 + $0xa8] sm:$0xff] }
  0x20   : > { %v1019_v31 = vld [vmem:[%s5426_s21 + $0xb8] sm:$0xff]  ;;  %v4865_v32 = vpack.c.bf16 %v1014_v29, %v1012_v28  ;;  %v1016_v34 = vld [vmem:[%s5426_s21 + $0xa0] sm:$0xff]  ;;  %v1018_v35 = vld [vmem:[%s5426_s21 + $0xb0] sm:$0xff] }
  0x21   : > { %4854 = vmatpush1.bf16.msra.mxu0 %v4853_v14  ;;  %v4867_v33 = vpack.c.bf16 %v1019_v31, %v1017_v30  ;;  %v1021_v36 = vld [vmem:[%s5426_s21 + $0xc8] sm:$0xff]  ;;  %v1023_v37 = vld [vmem:[%s5426_s21 + $0xd8] sm:$0xff]  ;;  %v4869_v38 = vpack.c.bf16 %v1018_v35, %v1016_v34  ;;  %v1020_v40 = vld [vmem:[%s5426_s21 + $0xc0] sm:$0xff] }
  0x22   : > { %4856 = vmatprep.subr.bf16.mxu0 %v4855_v15  ;;  %v4871_v39 = vpack.c.bf16 %v1023_v37, %v1021_v36  ;;  %v1022_v41 = vld [vmem:[%s5426_s21 + $0xd0] sm:$0xff]  ;;  %v1025_v42 = vld [vmem:[%s5426_s21 + $0xe8] sm:$0xff]  ;;  %v1027_v43 = vld [vmem:[%s5426_s21 + $0xf8] sm:$0xff] }
  0x23   : > { %v4873_v44 = vpack.c.bf16 %v1022_v41, %v1020_v40  ;;  %v4875_v45 = vpack.c.bf16 %v1027_v43, %v1025_v42  ;;  %v1024_v46 = vld [vmem:[%s5426_s21 + $0xe0] sm:$0xff]  ;;  %v1026_v47 = vld [vmem:[%s5426_s21 + $0xf0] sm:$0xff]  ;;  %v1029_v48 = vld [vmem:[%s5426_s21 + $0x108] sm:$0xff] }
  0x24   : > { %v1031_v49 = vld [vmem:[%s5426_s21 + $0x118] sm:$0xff]  ;;  %v4877_v50 = vpack.c.bf16 %v1026_v47, %v1024_v46  ;;  %v1028_v52 = vld [vmem:[%s5426_s21 + $0x100] sm:$0xff]  ;;  %v1030_v53 = vld [vmem:[%s5426_s21 + $0x110] sm:$0xff] }
  0x25   : > { %4858 = vmatpush1.bf16.msra.mxu0 %v4857_v20  ;;  %v4879_v51 = vpack.c.bf16 %v1031_v49, %v1029_v48  ;;  %v1033_v54 = vld [vmem:[%s5426_s21 + $0x128] sm:$0xff]  ;;  %v1035_v55 = vld [vmem:[%s5426_s21 + $0x138] sm:$0xff]  ;;  %v4881_v56 = vpack.c.bf16 %v1030_v53, %v1028_v52  ;;  %v1032_v58 = vld [vmem:[%s5426_s21 + $0x120] sm:$0xff] }
  0x26   : > { %4860 = vmatprep.subr.bf16.mxu0 %v4859_v21  ;;  %v4883_v57 = vpack.c.bf16 %v1035_v55, %v1033_v54  ;;  %v1034_v59 = vld [vmem:[%s5426_s21 + $0x130] sm:$0xff]  ;;  %v1037_v60 = vld [vmem:[%s5426_s21 + $0x148] sm:$0xff]  ;;  %v1039_v61 = vld [vmem:[%s5426_s21 + $0x158] sm:$0xff] }
  0x27   : > { %v4885_v62 = vpack.c.bf16 %v1034_v59, %v1032_v58  ;;  %v4887_v63 = vpack.c.bf16 %v1039_v61, %v1037_v60  ;;  %v1036_v0 = vld [vmem:[%s5426_s21 + $0x140] sm:$0xff]  ;;  %v1038_v1 = vld [vmem:[%s5426_s21 + $0x150] sm:$0xff]  ;;  %v1041_v2 = vld [vmem:[%s5426_s21 + $0x168] sm:$0xff] }
  0x28   : > { %v1043_v3 = vld [vmem:[%s5426_s21 + $0x178] sm:$0xff]  ;;  %v4889_v4 = vpack.c.bf16 %v1038_v1, %v1036_v0  ;;  %v1040_v6 = vld [vmem:[%s5426_s21 + $0x160] sm:$0xff]  ;;  %v1042_v7 = vld [vmem:[%s5426_s21 + $0x170] sm:$0xff] }
  0x29   : > { %4862 = vmatpush1.bf16.msra.mxu0 %v4861_v26  ;;  %v4891_v5 = vpack.c.bf16 %v1043_v3, %v1041_v2  ;;  %v1045_v8 = vld [vmem:[%s5426_s21 + $0x188] sm:$0xff]  ;;  %v1047_v9 = vld [vmem:[%s5426_s21 + $0x198] sm:$0xff]  ;;  %v4893_v10 = vpack.c.bf16 %v1042_v7, %v1040_v6  ;;  %v1044_v12 = vld [vmem:[%s5426_s21 + $0x180] sm:$0xff] }
  0x2a   : > { %4864 = vmatprep.subr.bf16.mxu0 %v4863_v27  ;;  %v4895_v11 = vpack.c.bf16 %v1047_v9, %v1045_v8  ;;  %v1046_v13 = vld [vmem:[%s5426_s21 + $0x190] sm:$0xff]  ;;  %v1049_v14 = vld [vmem:[%s5426_s21 + $0x1a8] sm:$0xff]  ;;  %v1051_v15 = vld [vmem:[%s5426_s21 + $0x1b8] sm:$0xff] }
  0x2b   : > { %v4897_v16 = vpack.c.bf16 %v1046_v13, %v1044_v12  ;;  %v4899_v17 = vpack.c.bf16 %v1051_v15, %v1049_v14  ;;  %v1048_v18 = vld [vmem:[%s5426_s21 + $0x1a0] sm:$0xff]  ;;  %v1050_v19 = vld [vmem:[%s5426_s21 + $0x1b0] sm:$0xff]  ;;  %v1053_v20 = vld [vmem:[%s5426_s21 + $0x1c8] sm:$0xff] }
  0x2c   : > { %v1055_v21 = vld [vmem:[%s5426_s21 + $0x1d8] sm:$0xff]  ;;  %v4901_v22 = vpack.c.bf16 %v1050_v19, %v1048_v18  ;;  %v1052_v24 = vld [vmem:[%s5426_s21 + $0x1c0] sm:$0xff]  ;;  %v1054_v25 = vld [vmem:[%s5426_s21 + $0x1d0] sm:$0xff] }
  0x2d   : > { %4866 = vmatpush1.bf16.msra.mxu0 %v4865_v32  ;;  %v4903_v23 = vpack.c.bf16 %v1055_v21, %v1053_v20  ;;  %v1057_v26 = vld [vmem:[%s5426_s21 + $0x1e8] sm:$0xff]  ;;  %v1059_v27 = vld [vmem:[%s5426_s21 + $0x1f8] sm:$0xff]  ;;  %v4905_v28 = vpack.c.bf16 %v1054_v25, %v1052_v24  ;;  %v1056_v30 = vld [vmem:[%s5426_s21 + $0x1e0] sm:$0xff] }
  0x2e   : > { %4868 = vmatprep.subr.bf16.mxu0 %v4867_v33  ;;  %v4907_v29 = vpack.c.bf16 %v1059_v27, %v1057_v26  ;;  %v1058_v31 = vld [vmem:[%s5426_s21 + $0x1f0] sm:$0xff]  ;;  %v933_v32 = vld [vmem:[%s5494_s24 + $0x8] sm:$0xff]  ;;  %v935_v33 = vld [vmem:[%s5494_s24 + $0x18] sm:$0xff]  ;;  %s8148_s21 = smov 113  }
  0x2f   : > { %v4909_v34 = vpack.c.bf16 %v1058_v31, %v1056_v30  ;;  %v4911_v35 = vpack.c.bf16 %v935_v33, %v933_v32  ;;  %v932_v36 = vld [vmem:[%s5494_s24] sm:$0xff]  ;;  %v934_v37 = vld [vmem:[%s5494_s24 + $0x10] sm:$0xff]  ;;  %v658_v42 = vld [vmem:[%s8164_s3 + $0x18] sm:$0xff] }
  0x30   : > { %v655_v40 = vld [vmem:[%s8164_s3] sm:$0xff]  ;;  %v4913_v41 = vpack.c.bf16 %v934_v37, %v932_v36  ;;  %v941_v46 = vld [vmem:[%s5494_s24 + $0x48] sm:$0xff]  ;;  %v943_v47 = vld [vmem:[%s5494_s24 + $0x58] sm:$0xff] }
  0x31   : > { %4870 = vmatpush1.bf16.msra.mxu0 %v4869_v38  ;;  %v937_v38 = vld [vmem:[%s5494_s24 + $0x28] sm:$0xff]  ;;  %v657_v48 = vld [vmem:[%s8164_s3 + $0x10] sm:$0xff]  ;;  %v940_v52 = vld [vmem:[%s5494_s24 + $0x40] sm:$0xff] }
  0x32   : > { %4872 = vmatprep.subr.bf16.mxu0 %v4871_v39  ;;  %v939_v39 = vld [vmem:[%s5494_s24 + $0x38] sm:$0xff]  ;;  %v942_v53 = vld [vmem:[%s5494_s24 + $0x50] sm:$0xff]  ;;  %v945_v54 = vld [vmem:[%s5494_s24 + $0x68] sm:$0xff] }
  0x33   : > { %v4915_v43 = vpack.c.bf16 %v939_v39, %v937_v38  ;;  %v947_v55 = vld [vmem:[%s5494_s24 + $0x78] sm:$0xff]  ;;  %v944_v60 = vld [vmem:[%s5494_s24 + $0x60] sm:$0xff]  ;;  %v946_v61 = vld [vmem:[%s5494_s24 + $0x70] sm:$0xff] }
  0x34   : > { %v662_v58 = vld [vmem:[%s8164_s3 + $0x38] sm:$0xff]  ;;  %v4923_v59 = vpack.c.bf16 %v947_v55, %v945_v54  ;;  %v661_v0 = vld [vmem:[%s8164_s3 + $0x30] sm:$0xff]  ;;  %v4925_v1 = vpack.c.bf16 %v946_v61, %v944_v60  ;;  %v664_v2 = vld [vmem:[%s8164_s3 + $0x48] sm:$0xff] }
  0x35   : > { %4874 = vmatpush1.bf16.msra.mxu0 %v4873_v44  ;;  %v936_v44 = vld [vmem:[%s5494_s24 + $0x20] sm:$0xff]  ;;  %v953_v6 = vld [vmem:[%s5494_s24 + $0xa8] sm:$0xff]  ;;  %v955_v7 = vld [vmem:[%s5494_s24 + $0xb8] sm:$0xff] }
  0x36   : > { %4876 = vmatprep.subr.bf16.mxu0 %v4875_v45  ;;  %v938_v45 = vld [vmem:[%s5494_s24 + $0x30] sm:$0xff]  ;;  %v663_v8 = vld [vmem:[%s8164_s3 + $0x40] sm:$0xff]  ;;  %v957_v14 = vld [vmem:[%s5494_s24 + $0xc8] sm:$0xff] }
  0x37   : > { %v4917_v49 = vpack.c.bf16 %v938_v45, %v936_v44  ;;  %v952_v12 = vld [vmem:[%s5494_s24 + $0xa0] sm:$0xff]  ;;  %v954_v13 = vld [vmem:[%s5494_s24 + $0xb0] sm:$0xff]  ;;  %v959_v15 = vld [vmem:[%s5494_s24 + $0xd8] sm:$0xff] }
  0x38   : > { %v668_v18 = vld [vmem:[%s8164_s3 + $0x68] sm:$0xff]  ;;  %v4935_v19 = vpack.c.bf16 %v959_v15, %v957_v14  ;;  %v956_v20 = vld [vmem:[%s5494_s24 + $0xc0] sm:$0xff]  ;;  %v958_v21 = vld [vmem:[%s5494_s24 + $0xd0] sm:$0xff] }
  0x39   : > { %4878 = vmatpush1.bf16.msra.mxu0 %v4877_v50  ;;  %v660_v50 = vld [vmem:[%s8164_s3 + $0x28] sm:$0xff]  ;;  %v667_v24 = vld [vmem:[%s8164_s3 + $0x60] sm:$0xff]  ;;  %v4937_v25 = vpack.c.bf16 %v958_v21, %v956_v20  ;;  %v670_v26 = vld [vmem:[%s8164_s3 + $0x78] sm:$0xff] }
  0x3a   : > { %4880 = vmatprep.subr.bf16.mxu0 %v4879_v51  ;;  %v4919_v51 = vpack.c.bf16 %v943_v47, %v941_v46  ;;  %v965_v30 = vld [vmem:[%s5494_s24 + $0x108] sm:$0xff]  ;;  %v967_v31 = vld [vmem:[%s5494_s24 + $0x118] sm:$0xff]  ;;  %v669_v32 = vld [vmem:[%s8164_s3 + $0x70] sm:$0xff] }
  0x3b   : > { %v964_v36 = vld [vmem:[%s5494_s24 + $0x100] sm:$0xff]  ;;  %v966_v37 = vld [vmem:[%s5494_s24 + $0x110] sm:$0xff]  ;;  %v969_v38 = vld [vmem:[%s5494_s24 + $0x128] sm:$0xff] }
  0x3c   : > { %v971_v39 = vld [vmem:[%s5494_s24 + $0x138] sm:$0xff]  ;;  %v968_v44 = vld [vmem:[%s5494_s24 + $0x120] sm:$0xff]  ;;  %v970_v45 = vld [vmem:[%s5494_s24 + $0x130] sm:$0xff] }
  0x3d   : > { %4882 = vmatpush1.bf16.msra.mxu0 %v4881_v56  ;;  %v659_v56 = vld [vmem:[%s8164_s3 + $0x20] sm:$0xff]  ;;  %v973_v46 = vld [vmem:[%s5494_s24 + $0x148] sm:$0xff]  ;;  %v975_v47 = vld [vmem:[%s5494_s24 + $0x158] sm:$0xff] }
  0x3e   : > { %4884 = vmatprep.subr.bf16.mxu0 %v4883_v57  ;;  %v4921_v57 = vpack.c.bf16 %v942_v53, %v940_v52  ;;  %v972_v52 = vld [vmem:[%s5494_s24 + $0x140] sm:$0xff]  ;;  %v974_v53 = vld [vmem:[%s5494_s24 + $0x150] sm:$0xff]  ;;  %v977_v54 = vld [vmem:[%s5494_s24 + $0x168] sm:$0xff] }
  0x3f   : > { %v979_v55 = vld [vmem:[%s5494_s24 + $0x178] sm:$0xff]  ;;  %v976_v60 = vld [vmem:[%s5494_s24 + $0x160] sm:$0xff]  ;;  %v978_v61 = vld [vmem:[%s5494_s24 + $0x170] sm:$0xff] }
  0x40   : > { %v989_v14 = vld [vmem:[%s5494_s24 + $0x1c8] sm:$0xff]  ;;  %v991_v15 = vld [vmem:[%s5494_s24 + $0x1d8] sm:$0xff]  ;;  %v988_v20 = vld [vmem:[%s5494_s24 + $0x1c0] sm:$0xff] }
  0x41   : > { %4886 = vmatpush1.bf16.msra.mxu0 %v4885_v62  ;;  %v949_v62 = vld [vmem:[%s5494_s24 + $0x88] sm:$0xff]  ;;  %v990_v21 = vld [vmem:[%s5494_s24 + $0x1d0] sm:$0xff] }
  0x42   : > { %4888 = vmatprep.subr.bf16.mxu0 %v4887_v63  ;;  %v951_v63 = vld [vmem:[%s5494_s24 + $0x98] sm:$0xff] }
  0x43   : > { %v4927_v3 = vpack.c.bf16 %v951_v63, %v949_v62  ;;  %v981_v62 = vld [vmem:[%s5494_s24 + $0x188] sm:$0xff]  ;;  %v983_v63 = vld [vmem:[%s5494_s24 + $0x198] sm:$0xff] }
  0x45   : > { %4890 = vmatpush1.bf16.msra.mxu0 %v4889_v4  ;;  %v948_v4 = vld [vmem:[%s5494_s24 + $0x80] sm:$0xff] }
  0x46   : > { %4892 = vmatprep.subr.bf16.mxu0 %v4891_v5  ;;  %v950_v5 = vld [vmem:[%s5494_s24 + $0x90] sm:$0xff] }
  0x47   : > { %v4929_v9 = vpack.c.bf16 %v950_v5, %v948_v4  ;;  %v980_v4 = vld [vmem:[%s5494_s24 + $0x180] sm:$0xff]  ;;  %v982_v5 = vld [vmem:[%s5494_s24 + $0x190] sm:$0xff] }
  0x49   : > { %4894 = vmatpush1.bf16.msra.mxu0 %v4893_v10  ;;  %v666_v10 = vld [vmem:[%s8164_s3 + $0x58] sm:$0xff] }
  0x4a   : > { %4896 = vmatprep.subr.bf16.mxu0 %v4895_v11  ;;  %v4931_v11 = vpack.c.bf16 %v955_v7, %v953_v6  ;;  %v985_v6 = vld [vmem:[%s5494_s24 + $0x1a8] sm:$0xff]  ;;  %v987_v7 = vld [vmem:[%s5494_s24 + $0x1b8] sm:$0xff] }
  0x4d   : > { %4898 = vmatpush1.bf16.msra.mxu0 %v4897_v16  ;;  %v665_v16 = vld [vmem:[%s8164_s3 + $0x50] sm:$0xff] }
  0x4e   : > { %4900 = vmatprep.subr.bf16.mxu0 %v4899_v17  ;;  %v4933_v17 = vpack.c.bf16 %v954_v13, %v952_v12  ;;  %v984_v12 = vld [vmem:[%s5494_s24 + $0x1a0] sm:$0xff]  ;;  %v986_v13 = vld [vmem:[%s5494_s24 + $0x1b0] sm:$0xff] }
  0x51   : > { %4902 = vmatpush1.bf16.msra.mxu0 %v4901_v22  ;;  %v961_v22 = vld [vmem:[%s5494_s24 + $0xe8] sm:$0xff] }
  0x52   : > { %4904 = vmatprep.subr.bf16.mxu0 %v4903_v23  ;;  %v963_v23 = vld [vmem:[%s5494_s24 + $0xf8] sm:$0xff] }
  0x53   : > { %v4939_v27 = vpack.c.bf16 %v963_v23, %v961_v22  ;;  %v993_v22 = vld [vmem:[%s5494_s24 + $0x1e8] sm:$0xff]  ;;  %v995_v23 = vld [vmem:[%s5494_s24 + $0x1f8] sm:$0xff] }
  0x55   : > { %4906 = vmatpush1.bf16.msra.mxu0 %v4905_v28  ;;  %v960_v28 = vld [vmem:[%s5494_s24 + $0xe0] sm:$0xff] }
  0x56   : > { %4908 = vmatprep.subr.bf16.mxu0 %v4907_v29  ;;  %v962_v29 = vld [vmem:[%s5494_s24 + $0xf0] sm:$0xff] }
  0x57   : > { %v4941_v33 = vpack.c.bf16 %v962_v29, %v960_v28  ;;  %v992_v28 = vld [vmem:[%s5494_s24 + $0x1e0] sm:$0xff]  ;;  %v994_v29 = vld [vmem:[%s5494_s24 + $0x1f0] sm:$0xff] }
  0x59   : > { %4910 = vmatpush1.bf16.msra.mxu0 %v4909_v34  ;;  %v672_v34 = vld [vmem:[%s8164_s3 + $0x88] sm:$0xff] }
  0x5a   : > { %4912 = vmatprep.subr.bf16.mxu0 %v4911_v35  ;;  %v4943_v35 = vpack.c.bf16 %v967_v31, %v965_v30  ;;  %v685_v30 = vld [vmem:[%s8164_s3 + $0xf0] sm:$0xff]  ;;  %v4973_v31 = vpack.c.bf16 %v994_v29, %v992_v28  ;;  %v648_v28 = vld [vmem:[%s8167_s26 + $0x158] sm:$0xff] }
  0x5b   : > { %v647_v29 = vld [vmem:[%s8167_s26 + $0x150] sm:$0xff] }
  0x5c   : > { %1125 = vmatmul.mubr.f32.vlgmr.msra.gmra.mrb[0].mxu0 %v655_v40  ;;  %v671_v40 = vld [vmem:[%s8164_s3 + $0x80] sm:$0xff] }
  0x5d   : > { %4914 = vmatpush1.bf16.msra.mxu0 %v4913_v41  ;;  %1130 = vmatprep.mubr.f32.mxu0 %v658_v42  ;;  %v4945_v41 = vpack.c.bf16 %v966_v37, %v964_v36  ;;  %v674_v42 = vld [vmem:[%s8164_s3 + $0x98] sm:$0xff]  ;;  %v692_v36 = vld [vmem:[%s8164_s3 + $0x128] sm:$0xff]  ;;  %v691_v37 = vld [vmem:[%s8164_s3 + $0x120] sm:$0xff] }
  0x5e   : > { %4916 = vmatprep.subr.bf16.mxu0 %v4915_v43  ;;  %v4947_v43 = vpack.c.bf16 %v971_v39, %v969_v38  ;;  %v694_v38 = vld [vmem:[%s8164_s3 + $0x138] sm:$0xff]  ;;  %v693_v39 = vld [vmem:[%s8164_s3 + $0x130] sm:$0xff] }
  0x60   : > { %1131 = vmatmul.mubr.f32.gmra.mrb[2].mxu0 %v657_v48  ;;  %v673_v48 = vld [vmem:[%s8164_s3 + $0x90] sm:$0xff] }
  0x61   : > { %1136 = vmatprep.mubr.f32.mxu0 %v660_v50  ;;  %4918 = vmatpush1.bf16.msra.mxu0 %v4917_v49  ;;  %v4949_v49 = vpack.c.bf16 %v970_v45, %v968_v44  ;;  %v676_v50 = vld [vmem:[%s8164_s3 + $0xa8] sm:$0xff]  ;;  %v699_v45 = vld [vmem:[%s8164_s3 + $0x160] sm:$0xff] }
  0x62   : > { %4920 = vmatprep.subr.bf16.mxu0 %v4919_v51  ;;  %v4951_v51 = vpack.c.bf16 %v975_v47, %v973_v46  ;;  %v700_v44 = vld [vmem:[%s8164_s3 + $0x168] sm:$0xff]  ;;  %v702_v46 = vld [vmem:[%s8164_s3 + $0x178] sm:$0xff]  ;;  %v701_v47 = vld [vmem:[%s8164_s3 + $0x170] sm:$0xff] }
  0x64   : > { %1137 = vmatmul.mubr.f32.gmra.mrb[4].mxu0 %v659_v56  ;;  %v675_v56 = vld [vmem:[%s8164_s3 + $0xa0] sm:$0xff] }
  0x65   : > { %1142 = vmatprep.mubr.f32.mxu0 %v662_v58  ;;  %4922 = vmatpush1.bf16.msra.mxu0 %v4921_v57  ;;  %v4953_v57 = vpack.c.bf16 %v974_v53, %v972_v52  ;;  %v678_v58 = vld [vmem:[%s8164_s3 + $0xb8] sm:$0xff]  ;;  %v607_v53 = vld [vmem:[%s8167_s26 + $0x10] sm:$0xff] }
  0x66   : > { %4924 = vmatprep.subr.bf16.mxu0 %v4923_v59  ;;  %v4955_v59 = vpack.c.bf16 %v979_v55, %v977_v54  ;;  %v608_v52 = vld [vmem:[%s8167_s26 + $0x18] sm:$0xff]  ;;  %v610_v54 = vld [vmem:[%s8167_s26 + $0x28] sm:$0xff]  ;;  %v609_v55 = vld [vmem:[%s8167_s26 + $0x20] sm:$0xff] }
  0x68   : > { %1143 = vmatmul.mubr.f32.gmra.mrb[6].mxu0 %v661_v0  ;;  %v677_v0 = vld [vmem:[%s8164_s3 + $0xb0] sm:$0xff] }
  0x69   : > { %1148 = vmatprep.mubr.f32.mxu0 %v664_v2  ;;  %4926 = vmatpush1.bf16.msra.mxu0 %v4925_v1  ;;  %v4957_v1 = vpack.c.bf16 %v978_v61, %v976_v60  ;;  %v680_v2 = vld [vmem:[%s8164_s3 + $0xc8] sm:$0xff]  ;;  %v616_v60 = vld [vmem:[%s8167_s26 + $0x58] sm:$0xff]  ;;  %v615_v61 = vld [vmem:[%s8167_s26 + $0x50] sm:$0xff] }
  0x6a   : > { %4928 = vmatprep.subr.bf16.mxu0 %v4927_v3  ;;  %v4959_v3 = vpack.c.bf16 %v983_v63, %v981_v62  ;;  %v618_v62 = vld [vmem:[%s8167_s26 + $0x68] sm:$0xff]  ;;  %v617_v63 = vld [vmem:[%s8167_s26 + $0x60] sm:$0xff] }
  0x6c   : > { %1149 = vmatmul.mubr.f32.gmra.mrb[8].mxu0 %v663_v8  ;;  %v679_v8 = vld [vmem:[%s8164_s3 + $0xc0] sm:$0xff] }
  0x6d   : > { %1154 = vmatprep.mubr.f32.mxu0 %v666_v10  ;;  %4930 = vmatpush1.bf16.msra.mxu0 %v4929_v9  ;;  %v4961_v9 = vpack.c.bf16 %v982_v5, %v980_v4  ;;  %v682_v10 = vld [vmem:[%s8164_s3 + $0xd8] sm:$0xff]  ;;  %v623_v5 = vld [vmem:[%s8167_s26 + $0x90] sm:$0xff] }
  0x6e   : > { %4932 = vmatprep.subr.bf16.mxu0 %v4931_v11  ;;  %v4963_v11 = vpack.c.bf16 %v987_v7, %v985_v6  ;;  %v624_v4 = vld [vmem:[%s8167_s26 + $0x98] sm:$0xff]  ;;  %v626_v6 = vld [vmem:[%s8167_s26 + $0xa8] sm:$0xff]  ;;  %v625_v7 = vld [vmem:[%s8167_s26 + $0xa0] sm:$0xff] }
  0x70   : > { %1155 = vmatmul.mubr.f32.gmra.mrb[10].mxu0 %v665_v16  ;;  %v681_v16 = vld [vmem:[%s8164_s3 + $0xd0] sm:$0xff] }
  0x71   : > { %1160 = vmatprep.mubr.f32.mxu0 %v668_v18  ;;  %4934 = vmatpush1.bf16.msra.mxu0 %v4933_v17  ;;  %v4965_v17 = vpack.c.bf16 %v986_v13, %v984_v12  ;;  %v684_v18 = vld [vmem:[%s8164_s3 + $0xe8] sm:$0xff]  ;;  %v632_v12 = vld [vmem:[%s8167_s26 + $0xd8] sm:$0xff]  ;;  %v631_v13 = vld [vmem:[%s8167_s26 + $0xd0] sm:$0xff] }
  0x72   : > { %4936 = vmatprep.subr.bf16.mxu0 %v4935_v19  ;;  %v4967_v19 = vpack.c.bf16 %v991_v15, %v989_v14  ;;  %v634_v14 = vld [vmem:[%s8167_s26 + $0xe8] sm:$0xff]  ;;  %v633_v15 = vld [vmem:[%s8167_s26 + $0xe0] sm:$0xff] }
  0x74   : > { %1161 = vmatmul.mubr.f32.gmra.mrb[12].mxu0 %v667_v24  ;;  %v683_v24 = vld [vmem:[%s8164_s3 + $0xe0] sm:$0xff] }
  0x75   : > { %1166 = vmatprep.mubr.f32.mxu0 %v670_v26  ;;  %4938 = vmatpush1.bf16.msra.mxu0 %v4937_v25  ;;  %v4969_v25 = vpack.c.bf16 %v990_v21, %v988_v20  ;;  %v686_v26 = vld [vmem:[%s8164_s3 + $0xf8] sm:$0xff]  ;;  %v639_v21 = vld [vmem:[%s8167_s26 + $0x110] sm:$0xff] }
  0x76   : > { %4940 = vmatprep.subr.bf16.mxu0 %v4939_v27  ;;  %v4971_v27 = vpack.c.bf16 %v995_v23, %v993_v22  ;;  %v640_v20 = vld [vmem:[%s8167_s26 + $0x118] sm:$0xff]  ;;  %v642_v22 = vld [vmem:[%s8167_s26 + $0x128] sm:$0xff]  ;;  %v641_v23 = vld [vmem:[%s8167_s26 + $0x120] sm:$0xff] }
  0x78   : > { %1167 = vmatmul.mubr.f32.gmra.mrb[14].mxu0 %v669_v32  ;;  %v688_v32 = vld [vmem:[%s8164_s3 + $0x108] sm:$0xff] }
  0x79   : > { %1172 = vmatprep.mubr.f32.mxu0 %v672_v34  ;;  %4942 = vmatpush1.bf16.msra.mxu0 %v4941_v33  ;;  %v687_v33 = vld [vmem:[%s8164_s3 + $0x100] sm:$0xff]  ;;  %v690_v34 = vld [vmem:[%s8164_s3 + $0x118] sm:$0xff] }
  0x7a   : > { %4944 = vmatprep.subr.bf16.mxu0 %v4943_v35  ;;  %v689_v35 = vld [vmem:[%s8164_s3 + $0x110] sm:$0xff] }
  0x7c   : > { %1173 = vmatmul.mubr.f32.gmra.mrb[16].mxu0 %v671_v40  ;;  %v696_v40 = vld [vmem:[%s8164_s3 + $0x148] sm:$0xff] }
  0x7d   : > { %1178 = vmatprep.mubr.f32.mxu0 %v674_v42  ;;  %4946 = vmatpush1.bf16.msra.mxu0 %v4945_v41  ;;  %v695_v41 = vld [vmem:[%s8164_s3 + $0x140] sm:$0xff]  ;;  %v698_v42 = vld [vmem:[%s8164_s3 + $0x158] sm:$0xff] }
  0x7e   : > { %4948 = vmatprep.subr.bf16.mxu0 %v4947_v43  ;;  %v697_v43 = vld [vmem:[%s8164_s3 + $0x150] sm:$0xff] }
  0x80   : > { %1179 = vmatmul.mubr.f32.gmra.mrb[18].mxu0 %v673_v48  ;;  %v704_v48 = vld [vmem:[%s8164_s3 + $0x188] sm:$0xff] }
  0x81   : > { %1184 = vmatprep.mubr.f32.mxu0 %v676_v50  ;;  %4950 = vmatpush1.bf16.msra.mxu0 %v4949_v49  ;;  %v703_v49 = vld [vmem:[%s8164_s3 + $0x180] sm:$0xff]  ;;  %v606_v50 = vld [vmem:[%s8167_s26 + $0x8] sm:$0xff] }
  0x82   : > { %4952 = vmatprep.subr.bf16.mxu0 %v4951_v51  ;;  %v605_v51 = vld [vmem:[%s8167_s26] sm:$0xff] }
  0x84   : > { %1185 = vmatmul.mubr.f32.gmra.mrb[20].mxu0 %v675_v56  ;;  %v612_v56 = vld [vmem:[%s8167_s26 + $0x38] sm:$0xff] }
  0x85   : > { %1190 = vmatprep.mubr.f32.mxu0 %v678_v58  ;;  %4954 = vmatpush1.bf16.msra.mxu0 %v4953_v57  ;;  %v611_v57 = vld [vmem:[%s8167_s26 + $0x30] sm:$0xff]  ;;  %v614_v58 = vld [vmem:[%s8167_s26 + $0x48] sm:$0xff] }
  0x86   : > { %4956 = vmatprep.subr.bf16.mxu0 %v4955_v59  ;;  %v613_v59 = vld [vmem:[%s8167_s26 + $0x40] sm:$0xff] }
  0x88   : > { %1191 = vmatmul.mubr.f32.gmra.mrb[22].mxu0 %v677_v0  ;;  %v620_v0 = vld [vmem:[%s8167_s26 + $0x78] sm:$0xff] }
  0x89   : > { %1196 = vmatprep.mubr.f32.mxu0 %v680_v2  ;;  %4958 = vmatpush1.bf16.msra.mxu0 %v4957_v1  ;;  %v619_v1 = vld [vmem:[%s8167_s26 + $0x70] sm:$0xff]  ;;  %v622_v2 = vld [vmem:[%s8167_s26 + $0x88] sm:$0xff] }
  0x8a   : > { %4960 = vmatprep.subr.bf16.mxu0 %v4959_v3  ;;  %v621_v3 = vld [vmem:[%s8167_s26 + $0x80] sm:$0xff] }
  0x8c   : > { %1197 = vmatmul.mubr.f32.gmra.mrb[24].mxu0 %v679_v8  ;;  %v628_v8 = vld [vmem:[%s8167_s26 + $0xb8] sm:$0xff] }
  0x8d   : > { %1202 = vmatprep.mubr.f32.mxu0 %v682_v10  ;;  %4962 = vmatpush1.bf16.msra.mxu0 %v4961_v9  ;;  %v627_v9 = vld [vmem:[%s8167_s26 + $0xb0] sm:$0xff]  ;;  %v630_v10 = vld [vmem:[%s8167_s26 + $0xc8] sm:$0xff] }
  0x8e   : > { %4964 = vmatprep.subr.bf16.mxu0 %v4963_v11  ;;  %v629_v11 = vld [vmem:[%s8167_s26 + $0xc0] sm:$0xff] }
  0x90   : > { %1203 = vmatmul.mubr.f32.gmra.mrb[26].mxu0 %v681_v16  ;;  %v636_v16 = vld [vmem:[%s8167_s26 + $0xf8] sm:$0xff] }
  0x91   : > { %1208 = vmatprep.mubr.f32.mxu0 %v684_v18  ;;  %4966 = vmatpush1.bf16.msra.mxu0 %v4965_v17  ;;  %v635_v17 = vld [vmem:[%s8167_s26 + $0xf0] sm:$0xff]  ;;  %v638_v18 = vld [vmem:[%s8167_s26 + $0x108] sm:$0xff] }
  0x92   : > { %4968 = vmatprep.subr.bf16.mxu0 %v4967_v19  ;;  %v637_v19 = vld [vmem:[%s8167_s26 + $0x100] sm:$0xff] }
  0x94   : > { %1209 = vmatmul.mubr.f32.gmra.mrb[28].mxu0 %v683_v24  ;;  %v644_v24 = vld [vmem:[%s8167_s26 + $0x138] sm:$0xff] }
  0x95   : > { %1214 = vmatprep.mubr.f32.mxu0 %v686_v26  ;;  %4970 = vmatpush1.bf16.msra.mxu0 %v4969_v25  ;;  %v643_v25 = vld [vmem:[%s8167_s26 + $0x130] sm:$0xff]  ;;  %v646_v26 = vld [vmem:[%s8167_s26 + $0x148] sm:$0xff] }
  0x96   : > { %4972 = vmatprep.subr.bf16.mxu0 %v4971_v27  ;;  %v645_v27 = vld [vmem:[%s8167_s26 + $0x140] sm:$0xff] }
  0x98   : > { %1215 = vmatmul.mubr.f32.gmra.mrb[30].mxu0 %v685_v30  ;;  %v650_v30 = vld [vmem:[%s8167_s26 + $0x168] sm:$0xff] }
  0x99   : > { %1220 = vmatprep.mubr.f32.mxu0 %v688_v32  ;;  %4974 = vmatpush1.bf16.msra.mxu0 %v4973_v31  ;;  %v649_v31 = vld [vmem:[%s8167_s26 + $0x160] sm:$0xff]  ;;  %v652_v32 = vld [vmem:[%s8167_s26 + $0x178] sm:$0xff] }
  0x9c   : > { %1221 = vmatmul.mubr.f32.gmra.mrb[32].mxu0 %v687_v33  ;;  %v651_v33 = vld [vmem:[%s8167_s26 + $0x170] sm:$0xff] }
  0x9d   : > { %1226 = vmatprep.mubr.f32.mxu0 %v690_v34  ;;  %v654_v34 = vld [vmem:[%s8167_s26 + $0x188] sm:$0xff] }
  0xa0   : > { %1227 = vmatmul.mubr.f32.gmra.mrb[34].mxu0 %v689_v35  ;;  %v653_v35 = vld [vmem:[%s8167_s26 + $0x180] sm:$0xff] }
  0xa1   : > { %1232 = vmatprep.mubr.f32.mxu0 %v692_v36 }
  0xa4   : > { %1233 = vmatmul.mubr.f32.gmra.mrb[36].mxu0 %v691_v37 }
  0xa5   : > { %1238 = vmatprep.mubr.f32.mxu0 %v694_v38 }
  0xa8   : > { %1239 = vmatmul.mubr.f32.gmra.mrb[38].mxu0 %v693_v39 }
  0xa9   : > { %1244 = vmatprep.mubr.f32.mxu0 %v696_v40 }
  0xac   : > { %1245 = vmatmul.mubr.f32.gmra.mrb[40].mxu0 %v695_v41 }
  0xad   : > { %1250 = vmatprep.mubr.f32.mxu0 %v698_v42 }
  0xb0   : > { %1251 = vmatmul.mubr.f32.gmra.mrb[42].mxu0 %v697_v43 }
  0xb1   : > { %1256 = vmatprep.mubr.f32.mxu0 %v700_v44 }
  0xb4   : > { %1257 = vmatmul.mubr.f32.gmra.mrb[44].mxu0 %v699_v45 }
  0xb5   : > { %1262 = vmatprep.mubr.f32.mxu0 %v702_v46 }
  0xb8   : > { %1263 = vmatmul.mubr.f32.gmra.mrb[46].mxu0 %v701_v47 }
  0xb9   : > { %1268 = vmatprep.mubr.f32.mxu0 %v704_v48 }
  0xbc   : > { %1269 = vmatmul.mubr.f32.gmra.mrb[48].mxu0 %v703_v49 }
  0xbd   : > { %1339 = vmatprep.mubr.f32.mxu0 %v606_v50 }
  0xc0   : > { %1340 = vmatmul.mubr.f32.vlgmr.msra.gmra.mrb[0].mxu0 %v605_v51 }
  0xc1   : > { %1345 = vmatprep.mubr.f32.mxu0 %v608_v52 }
  0xc4   : > { %1346 = vmatmul.mubr.f32.gmra.mrb[2].mxu0 %v607_v53 }
  0xc5   : > { %1351 = vmatprep.mubr.f32.mxu0 %v610_v54 }
  0xc8   : > { %1352 = vmatmul.mubr.f32.gmra.mrb[4].mxu0 %v609_v55 }
  0xc9   : > { %1357 = vmatprep.mubr.f32.mxu0 %v612_v56 }
  0xcc   : > { %1358 = vmatmul.mubr.f32.gmra.mrb[6].mxu0 %v611_v57 }
  0xcd   : > { %1363 = vmatprep.mubr.f32.mxu0 %v614_v58 }
  0xd0   : > { %1364 = vmatmul.mubr.f32.gmra.mrb[8].mxu0 %v613_v59 }
  0xd1   : > { %1369 = vmatprep.mubr.f32.mxu0 %v616_v60 }
  0xd4   : > { %1370 = vmatmul.mubr.f32.gmra.mrb[10].mxu0 %v615_v61 }
  0xd5   : > { %1375 = vmatprep.mubr.f32.mxu0 %v618_v62 }
  0xd8   : > { %1376 = vmatmul.mubr.f32.gmra.mrb[12].mxu0 %v617_v63 }
  0xd9   : > { %1381 = vmatprep.mubr.f32.mxu0 %v620_v0 }
  0xdc   : > { %1382 = vmatmul.mubr.f32.gmra.mrb[14].mxu0 %v619_v1 }
  0xdd   : > { %1387 = vmatprep.mubr.f32.mxu0 %v622_v2 }
  0xe0   : > { %1388 = vmatmul.mubr.f32.gmra.mrb[16].mxu0 %v621_v3 }
  0xe1   : > { %1393 = vmatprep.mubr.f32.mxu0 %v624_v4 }
  0xe4   : > { %1394 = vmatmul.mubr.f32.gmra.mrb[18].mxu0 %v623_v5 }
  0xe5   : > { %1399 = vmatprep.mubr.f32.mxu0 %v626_v6 }
  0xe8   : > { %1400 = vmatmul.mubr.f32.gmra.mrb[20].mxu0 %v625_v7 }
  0xe9   : > { %1405 = vmatprep.mubr.f32.mxu0 %v628_v8 }
  0xec   : > { %1406 = vmatmul.mubr.f32.gmra.mrb[22].mxu0 %v627_v9 }
  0xed   : > { %1411 = vmatprep.mubr.f32.mxu0 %v630_v10 }
  0xf0   : > { %1412 = vmatmul.mubr.f32.gmra.mrb[24].mxu0 %v629_v11 }
  0xf1   : > { %1417 = vmatprep.mubr.f32.mxu0 %v632_v12 }
  0xf4   : > { %1418 = vmatmul.mubr.f32.gmra.mrb[26].mxu0 %v631_v13 }
  0xf5   : > { %1423 = vmatprep.mubr.f32.mxu0 %v634_v14 }
  0xf8   : > { %1424 = vmatmul.mubr.f32.gmra.mrb[28].mxu0 %v633_v15 }
  0xf9   : > { %1429 = vmatprep.mubr.f32.mxu0 %v636_v16 }
  0xfc   : > { %1430 = vmatmul.mubr.f32.gmra.mrb[30].mxu0 %v635_v17 }
  0xfd   : > { %1435 = vmatprep.mubr.f32.mxu0 %v638_v18 }
 0x100   : > { %1436 = vmatmul.mubr.f32.gmra.mrb[32].mxu0 %v637_v19 }
 0x101   : > { %1441 = vmatprep.mubr.f32.mxu0 %v640_v20 }
 0x104   : > { %1442 = vmatmul.mubr.f32.gmra.mrb[34].mxu0 %v639_v21 }
 0x105   : > { %1447 = vmatprep.mubr.f32.mxu0 %v642_v22 }
 0x108   : > { %1448 = vmatmul.mubr.f32.gmra.mrb[36].mxu0 %v641_v23 }
 0x109   : > { %1453 = vmatprep.mubr.f32.mxu0 %v644_v24 }
 0x10c   : > { %1454 = vmatmul.mubr.f32.gmra.mrb[38].mxu0 %v643_v25 }
 0x10d   : > { %1459 = vmatprep.mubr.f32.mxu0 %v646_v26 }
 0x110   : > { %1460 = vmatmul.mubr.f32.gmra.mrb[40].mxu0 %v645_v27 }
 0x111   : > { %1465 = vmatprep.mubr.f32.mxu0 %v648_v28 }
 0x114   : > { %1466 = vmatmul.mubr.f32.gmra.mrb[42].mxu0 %v647_v29 }
 0x115   : > { %1471 = vmatprep.mubr.f32.mxu0 %v650_v30 }
 0x118   : > { %1472 = vmatmul.mubr.f32.gmra.mrb[44].mxu0 %v649_v31 }
 0x119   : > { %1477 = vmatprep.mubr.f32.mxu0 %v652_v32 }
 0x11c   : > { %1478 = vmatmul.mubr.f32.gmra.mrb[46].mxu0 %v651_v33 }
 0x11d   : > { %1483 = vmatprep.mubr.f32.mxu0 %v654_v34 }
 0x120   : > { %1484 = vmatmul.mubr.f32.gmra.mrb[48].mxu0 %v653_v35 }
 0x193   : > { %v5859_v36 = vpop.f32.mrb[0].mxu0 }
 0x194   : > { %v5861_v37 = vpop.f32.mrb[1].mxu0 }
 0x197   : > { %v5863_v38 = vpop.f32.mrb[2].mxu0 }
 0x198   : > { %v5865_v39 = vpop.f32.mrb[3].mxu0 }
 0x19b   : > { %v5867_v40 = vpop.f32.mrb[4].mxu0 }
 0x19c   : > { %v5869_v41 = vpop.f32.mrb[5].mxu0 }
 0x19f   : > { %v5871_v42 = vpop.f32.mrb[6].mxu0 }
 0x1a0   : > { %v5873_v43 = vpop.f32.mrb[7].mxu0 }
 0x1a3   : > { %v5875_v44 = vpop.f32.mrb[8].mxu0 }
 0x1a4   : > { %v5877_v45 = vpop.f32.mrb[9].mxu0 }
 0x1a7   : > { %v5879_v46 = vpop.f32.mrb[10].mxu0 }
 0x1a8   : > { %v5881_v47 = vpop.f32.mrb[11].mxu0 }
 0x1ab   : > { %v5883_v48 = vpop.f32.mrb[12].mxu0 }
 0x1ac   : > { %v5885_v49 = vpop.f32.mrb[13].mxu0 }
 0x1af   : > { %v1383_v50 = vpop.f32.mrb[14].mxu0 }
 0x1b0   : > { %v1385_v51 = vpop.f32.mrb[15].mxu0 }
 0x1b3   : > { %v5887_v52 = vpop.f32.mrb[16].mxu0 }
 0x1b4   : > { %v5889_v53 = vpop.f32.mrb[17].mxu0 }
 0x1b7   : > { %v5891_v54 = vpop.f32.mrb[18].mxu0 }
 0x1b8   : > { %v5893_v55 = vpop.f32.mrb[19].mxu0 }
 0x1bb   : > { %v5895_v56 = vpop.f32.mrb[20].mxu0 }
 0x1bc   : > { %v5897_v57 = vpop.f32.mrb[21].mxu0 }
 0x1bf   : > { %v1407_v58 = vpop.f32.mrb[22].mxu0 }
 0x1c0   : > { %v1409_v59 = vpop.f32.mrb[23].mxu0 }
 0x1c3   : > { %v5899_v60 = vpop.f32.mrb[24].mxu0 }
 0x1c4   : > { %v5901_v61 = vpop.f32.mrb[25].mxu0 }
 0x1c7   : > { %v1419_v62 = vpop.f32.mrb[26].mxu0 }
 0x1c8   : > { %v1421_v63 = vpop.f32.mrb[27].mxu0 }
 0x1cb   : > { %v1425_v0 = vpop.f32.mrb[28].mxu0 }
 0x1cc   : > { %v1427_v1 = vpop.f32.mrb[29].mxu0 }
 0x1cf   : > { %v1431_v2 = vpop.f32.mrb[30].mxu0 }
 0x1d0   : > { %1571 = vrot.lane.b32.xlu0 %v1431_v2, %s5293_s23  ;;  %v1433_v3 = vpop.f32.mrb[31].mxu0 }
 0x1d3   : > { %v5904_v4 = vpop.f32.mrb[32].mxu0 }
 0x1d4   : > { %1573 = vrot.lane.b32.xlu0 %v1433_v3, %s5293_s23  ;;  %v5907_v5 = vpop.f32.mrb[33].mxu0 }
 0x1d7   : > { %v1443_v6 = vpop.f32.mrb[34].mxu0 }
 0x1d8   : > { %1527 = vrot.lane.b32.xlu0 %v1383_v50, %s5294_s25  ;;  %v1445_v7 = vpop.f32.mrb[35].mxu0 }
 0x1db   : > { %v5910_v8 = vpop.f32.mrb[36].mxu0 }
 0x1dc   : > { %1549 = vrot.lane.b32.xlu0 %v1407_v58, %s5294_s25  ;;  %v5913_v9 = vpop.f32.mrb[37].mxu0 }
 0x1df   : > { %v1455_v10 = vpop.f32.mrb[38].mxu0 }
 0x1e0   : > { %1560 = vrot.lane.b32.xlu0 %v1419_v62, %s5294_s25  ;;  %v1457_v11 = vpop.f32.mrb[39].mxu0 }
 0x1e3   : > { %v5916_v12 = vpop.f32.mrb[40].mxu0 }
 0x1e4   : > { %1593 = vrot.lane.b32.xlu0 %v1455_v10, %s5294_s25  ;;  %v5919_v13 = vpop.f32.mrb[41].mxu0 }
 0x1e7   : > { %v1467_v14 = vpop.f32.mrb[42].mxu0 }
 0x1e8   : > { %1604 = vrot.lane.b32.xlu0 %v1467_v14, %s5294_s25  ;;  %v1469_v15 = vpop.f32.mrb[43].mxu0 }
 0x1eb   : > { %v1473_v16 = vpop.f32.mrb[44].mxu0 }
 0x1ec   : > { %v1475_v17 = vpop.f32.mrb[45].mxu0 }
 0x1ef   : > { %v1479_v18 = vpop.f32.mrb[46].mxu0 }
 0x1f0   : > { %1615 = vrot.lane.b32.xlu1 %v1479_v18, %s5294_s25  ;;  %v1481_v19 = vpop.f32.mrb[47].mxu0 }
 0x1f3   : > { %v5923_v20 = vpop.f32.mrb[48].mxu0 }
 0x1f4   : > { %1617 = vrot.lane.b32.xlu1 %v1481_v19, %s5294_s25  ;;  %v5926_v21 = vpop.f32.mrb[49].mxu0 }
 0x1f8   : > { %1529 = vrot.lane.b32.xlu1 %v1385_v51, %s5294_s25 }
 0x1fc   : > { %1551 = vrot.lane.b32.xlu1 %v1409_v59, %s5294_s25 }
 0x200   : > { %1562 = vrot.lane.b32.xlu1 %v1421_v63, %s5294_s25 }
 0x204   : > { %1595 = vrot.lane.b32.xlu1 %v1457_v11, %s5294_s25 }
 0x208   : > { %1606 = vrot.lane.b32.xlu1 %v1469_v15, %s5294_s25 }
 0x242   : > { %v1572_v22 = vpop.permute.xlu0 %1571 }
 0x246   : > { %v1574_v23 = vpop.permute.xlu0 %1573 }
 0x247   : > { %v1575_v24 = vsel %vm1519_vm0, %v1572_v22, %v1574_v23  ;;  %v1579_v25 = vadd.f32 %v1574_v23, %v1427_v1 }
 0x248   : > { %v1578_v26 = vadd.f32 %v1575_v24, %v1425_v0 }
 0x249   : > { %1663 = vrot.lane.b32.xlu1 %v1579_v25, %s8154_s29 }
 0x24a   : > { %1661 = vrot.lane.b32.xlu0 %v1578_v26, %s8154_s29  ;;  %v1528_v33 = vpop.permute.xlu0 %1527 }
 0x24e   : > { %v1550_v35 = vpop.permute.xlu0 %1549 }
 0x262   : > { %v1616_v27 = vpop.permute.xlu1 %1615 }
 0x266   : > { %v1618_v28 = vpop.permute.xlu1 %1617 }
 0x267   : > { %v1619_v29 = vsel %vm1496_vm1, %v1616_v27, %v1618_v28  ;;  %v1623_v30 = vadd.f32 %v1618_v28, %v1475_v17 }
 0x268   : > { %v1622_v31 = vadd.f32 %v1619_v29, %v1473_v16 }
 0x269   : > { %1685 = vrot.lane.b32.xlu1 %v1623_v30, %s8154_s29 }
 0x26a   : > { %1683 = vrot.lane.b32.xlu0 %v1622_v31, %s8154_s29  ;;  %v1530_v32 = vpop.permute.xlu1 %1529 }
 0x26d   : > { %1506 = vrot.lane.b32.xlu1 %v5873_v43, %s5294_s25  ;;  %v1531_v43 = vsel %vm1496_vm1, %v1528_v33, %v1530_v32 }
 0x26e   : > { %1504 = vrot.lane.b32.xlu0 %v5871_v42, %s5294_s25  ;;  %v1552_v34 = vpop.permute.xlu1 %1551  ;;  %v1561_v42 = vpop.permute.xlu0 %1560  ;;  %v1534_v51 = vadd.f32 %v1531_v43, %v5883_v48 }
 0x271   : > { %1517 = vrot.lane.b32.xlu1 %v5881_v47, %s5293_s23  ;;  %v1535_v47 = vadd.f32 %v1530_v32, %v5885_v49 }
 0x272   : > { %1515 = vrot.lane.b32.xlu0 %v5879_v46, %s5293_s23  ;;  %v1563_v50 = vpop.permute.xlu1 %1562  ;;  %v1553_v46 = vsel %vm1496_vm1, %v1550_v35, %v1552_v34  ;;  %v1594_v58 = vpop.permute.xlu0 %1593 }
 0x273   : > { %v1556_v59 = vadd.f32 %v1553_v46, %v5895_v56  ;;  %v1564_v56 = vsel %vm1496_vm1, %v1561_v42, %v1563_v50  ;;  %v1568_v1 = vadd.f32 %v1563_v50, %v5901_v61 }
 0x274   : > { %v1567_v3 = vadd.f32 %v1564_v56, %v5899_v60 }
 0x275   : > { %1540 = vrot.lane.b32.xlu1 %v5893_v55, %s5294_s25 }
 0x276   : > { %1538 = vrot.lane.b32.xlu0 %v5891_v54, %s5294_s25  ;;  %v1596_v55 = vpop.permute.xlu1 %1595  ;;  %v1557_v54 = vadd.f32 %v1552_v34, %v5897_v57  ;;  %v1605_v0 = vpop.permute.xlu0 %1604  ;;  %v8156_v57 = vmov 0  }
 0x277   : > { %v1597_v62 = vsel %vm1496_vm1, %v1594_v58, %v1596_v55  ;;  %v1601_v48 = vadd.f32 %v1596_v55, %v5913_v9  ;;  %5211 = vset.pattern.permute.xlu0 %v8156_v57  ;;  %5212 = vset.pattern.permute.xlu1 %v8156_v57 }
 0x278   : > { %v1600_v49 = vadd.f32 %v1597_v62, %v5910_v8 }
 0x279   : > { %1584 = vrot.lane.b32.xlu1 %v1445_v7, %s5294_s25 }
 0x27a   : > { %1582 = vrot.lane.b32.xlu0 %v1443_v6, %s5294_s25  ;;  %v1607_v63 = vpop.permute.xlu1 %1606 }
 0x27b   : > { %v1608_v10 = vsel %vm1496_vm1, %v1605_v0, %v1607_v63  ;;  %v1612_v11 = vadd.f32 %v1607_v63, %v5919_v13 }
 0x27c   : > { %v1611_v61 = vadd.f32 %v1608_v10, %v5916_v12 }
 0x27d   : > { %1640 = vrot.lane.b32.xlu1 %v1535_v47, %s8152_s30 }
 0x27e   : > { %1638 = vrot.lane.b32.xlu0 %v1534_v51, %s8152_s30 }
 0x281   : > { %1652 = vrot.lane.b32.xlu1 %v1557_v54, %s8152_s30 }
 0x282   : > { %1650 = vrot.lane.b32.xlu0 %v1556_v59, %s8152_s30  ;;  %s8021_s30 = scalar_lea.vmem %s8139_s17, %s5420_s0 }
 0x285   : > { %1674 = vrot.lane.b32.xlu1 %v1601_v48, %s8154_s29 }
 0x286   : > { %1672 = vrot.lane.b32.xlu0 %v1600_v49, %s8154_s29 }
 0x2bb   : > { %v1664_v2 = vpop.permute.xlu1 %1663 }
 0x2bc   : > { %v1669_v6 = vadd.f32 %v1664_v2, %v1568_v1  ;;  %v1662_v7 = vpop.permute.xlu0 %1661 }
 0x2bd   : > { %v1665_v8 = vsel %vm1630_vm2, %v1662_v7, %v1664_v2 }
 0x2be   : > { %v1668_v9 = vadd.f32 %v1665_v8, %v1567_v3  ;;  %1708 = vrot.lane.b32.xlu1 %v1669_v6, %s8146_s19 }
 0x2c0   : > { %1706 = vrot.lane.b32.xlu0 %v1668_v9, %s8146_s19 }
 0x2db   : > { %v1686_v14 = vpop.permute.xlu1 %1685 }
 0x2dc   : > { %v1691_v15 = vadd.f32 %v1686_v14, %v1612_v11  ;;  %v1684_v16 = vpop.permute.xlu0 %1683 }
 0x2dd   : > { %v1687_v60 = vsel %vm1630_vm2, %v1684_v16, %v1686_v14 }
 0x2de   : > { %v1690_v17 = vadd.f32 %v1687_v60, %v1611_v61  ;;  %1720 = vrot.lane.b32.xlu1 %v1691_v15, %s8146_s19 }
 0x2df   : > { %v1507_v18 = vpop.permute.xlu1 %1506 }
 0x2e0   : > { %v1505_v19 = vpop.permute.xlu0 %1504  ;;  %1718 = vrot.lane.b32.xlu0 %v1690_v17, %s8146_s19  ;;  %v1512_v24 = vadd.f32 %v1507_v18, %v5869_v41  ;;  %s8168_s19 = smov 126  }
 0x2e1   : > { %v1508_v12 = vsel %vm1496_vm1, %v1505_v19, %v1507_v18 }
 0x2e2   : > { %1743 = vrot.lane.b32.xlu1 %v5926_v21, %s8150_s1  ;;  %v1511_v26 = vadd.f32 %v1508_v12, %v5867_v40 }
 0x2e3   : > { %v1518_v22 = vpop.permute.xlu1 %1517 }
 0x2e4   : > { %v1516_v13 = vpop.permute.xlu0 %1515  ;;  %1741 = vrot.lane.b32.xlu0 %v5923_v20, %s8150_s1 }
 0x2e5   : > { %v1520_v20 = vsel %vm1519_vm0, %v1516_v13, %v1518_v22 }
 0x2e6   : > { %1494 = vrot.lane.b32.xlu1 %v5865_v39, %s5294_s25  ;;  %v1524_v39 = vadd.f32 %v1518_v22, %v5877_v45  ;;  %v1523_v41 = vadd.f32 %v1520_v20, %v5875_v44  ;;  %v705_v44 = vld [vmem:[%s8126_s4] sm:$0xff] }
 0x2e7   : > { %v1541_v23 = vpop.permute.xlu1 %1540 }
 0x2e8   : > { %v1539_v25 = vpop.permute.xlu0 %1538  ;;  %1492 = vrot.lane.b32.xlu0 %v5863_v38, %s5294_s25  ;;  %v1546_v43 = vadd.f32 %v1541_v23, %v5889_v53 }
 0x2e9   : > { %v1542_v38 = vsel %vm1496_vm1, %v1539_v25, %v1541_v23 }
 0x2ea   : > { %1628 = vrot.lane.b32.xlu1 %v1512_v24, %s8154_s29  ;;  %v1545_v33 = vadd.f32 %v1542_v38, %v5887_v52  ;;  %v8158_v38 = vmov 0.0  }
 0x2eb   : > { %v1585_v21 = vpop.permute.xlu1 %1584  ;;  %2114 = vmatprep.mubr.f32.mxu1 %v8158_v38  ;;  %2009 = vmatprep.mubr.f32.mxu0 %v8158_v38 }
 0x2ec   : > { %v1583_v27 = vpop.permute.xlu0 %1582  ;;  %1626 = vrot.lane.b32.xlu0 %v1511_v26, %s8154_s29  ;;  %v1590_v58 = vadd.f32 %v1585_v21, %v5907_v5 }
 0x2ed   : > { %v1586_v59 = vsel %vm1496_vm1, %v1583_v27, %v1585_v21 }
 0x2ee   : > { %v1589_v49 = vadd.f32 %v1586_v59, %v5904_v4  ;;  %v709_v59 = vld [vmem:[%s8127_s5 + $0x18] sm:$0xff] }
 0x2ef   : > { %v1641_v28 = vpop.permute.xlu1 %1640 }
 0x2f0   : > { %v1647_v29 = vadd.f32 %v1641_v28, %v1524_v39  ;;  %v1639_v30 = vpop.permute.xlu0 %1638 }
 0x2f1   : > { %v1643_v31 = vsel %vm1642_vm3, %v1639_v30, %v1641_v28 }
 0x2f2   : > { %v1646_v40 = vadd.f32 %v1643_v31, %v1523_v41  ;;  %1696 = vrot.lane.b32.xlu1 %v1647_v29, %s8144_s20 }
 0x2f3   : > { %v1653_v32 = vpop.permute.xlu1 %1652 }
 0x2f4   : > { %v1651_v34 = vpop.permute.xlu0 %1650  ;;  %1694 = vrot.lane.b32.xlu0 %v1646_v40, %s8144_s20  ;;  %v1658_v47 = vadd.f32 %v1653_v32, %v1546_v43  ;;  %s8169_s20 = smov 116  }
 0x2f5   : > { %v1654_v45 = vsel %vm1642_vm3, %v1651_v34, %v1653_v32 }
 0x2f6   : > { %v1657_v35 = vadd.f32 %v1654_v45, %v1545_v33 }
 0x2f7   : > { %v1675_v50 = vpop.permute.xlu1 %1674 }
 0x2f8   : > { %1764 = vperm.xlu0 %5211, %v705_v44   ;;  %v1673_v42 = vpop.permute.xlu0 %1672  ;;  %v1680_v48 = vadd.f32 %v1675_v50, %v1590_v58  ;;  %v730_v58 = vld [vmem:[%s8127_s5 + $0xc0] sm:$0xff] }
 0x2f9   : > { %v1676_v53 = vsel %vm1630_vm2, %v1673_v42, %v1675_v50 }
 0x2fa   : > { %v1679_v1 = vadd.f32 %v1676_v53, %v1589_v49  ;;  %v732_v53 = vld [vmem:[%s8127_s5 + $0xd0] sm:$0xff]  ;;  %v711_v49 = vld [vmem:[%s8127_s5 + $0x28] sm:$0xff] }
 0x330   : > { %v1709_v51 = vpop.permute.xlu1 %1708 }
 0x331   : > { %v1715_v46 = vadd.f32 %v1709_v51, %v1658_v47  ;;  %v727_v47 = vld [vmem:[%s8127_s5 + $0xa8] sm:$0xff] }
 0x332   : > { %v1707_v55 = vpop.permute.xlu0 %1706 }
 0x333   : > { %v1711_v52 = vsel %vm1710_vm4, %v1707_v55, %v1709_v51  ;;  %1731 = vrot.lane.b32.xlu1 %v1715_v46, %s8150_s1  ;;  %v706_v51 = vld [vmem:[%s8127_s5] sm:$0xff]  ;;  %v728_v46 = vld [vmem:[%s8127_s5 + $0xb0] sm:$0xff]  ;;  %v707_v55 = vld [vmem:[%s8127_s5 + $0x8] sm:$0xff] }
 0x334   : > { %v1714_v54 = vadd.f32 %v1711_v52, %v1657_v35  ;;  %v729_v52 = vld [vmem:[%s8127_s5 + $0xb8] sm:$0xff] }
 0x337   : > { %1729 = vrot.lane.b32.xlu1 %v1714_v54, %s8150_s1  ;;  %v708_v54 = vld [vmem:[%s8127_s5 + $0x10] sm:$0xff]  ;;  %s8170_s1 = smov 110  }
 0x350   : > { %v1721_v62 = vpop.permute.xlu1 %1720 }
 0x351   : > { %v1726_v0 = vadd.f32 %v1721_v62, %v1680_v48  ;;  %v710_v48 = vld [vmem:[%s8127_s5 + $0x20] sm:$0xff] }
 0x352   : > { %v1719_v63 = vpop.permute.xlu0 %1718 }
 0x353   : > { %v1722_v56 = vsel %vm1710_vm4, %v1719_v63, %v1721_v62  ;;  %v731_v62 = vld [vmem:[%s8127_s5 + $0xc8] sm:$0xff]  ;;  %v733_v63 = vld [vmem:[%s8127_s5 + $0xd8] sm:$0xff] }
 0x354   : > { %v1744_v2 = vpop.permute.xlu1 %1743  ;;  %v1725_v6 = vadd.f32 %v1722_v56, %v1679_v1  ;;  %v734_v56 = vld [vmem:[%s8127_s5 + $0xe0] sm:$0xff]  ;;  %v713_v1 = vld [vmem:[%s8127_s5 + $0x38] sm:$0xff] }
 0x355   : > { %v1749_v3 = vadd.f32 %v1744_v2, %v1726_v0  ;;  %v712_v0 = vld [vmem:[%s8127_s5 + $0x30] sm:$0xff] }
 0x356   : > { %v1742_v7 = vpop.permute.xlu0 %1741 }
 0x357   : > { %v1745_v5 = vsel %vm1733_vm5, %v1742_v7, %v1744_v2  ;;  %1754 = vrot.lane.b32.xlu1 %v1749_v3, %s8142_s2  ;;  %v735_v2 = vld [vmem:[%s8127_s5 + $0xe8] sm:$0xff]  ;;  %v714_v3 = vld [vmem:[%s8127_s5 + $0x40] sm:$0xff] }
 0x358   : > { %v1748_v8 = vadd.f32 %v1745_v5, %v1725_v6  ;;  %v1495_v9 = vpop.permute.xlu1 %1494  ;;  %v736_v6 = vld [vmem:[%s8127_s5 + $0xf0] sm:$0xff]  ;;  %v715_v7 = vld [vmem:[%s8127_s5 + $0x48] sm:$0xff]  ;;  %v737_v5 = vld [vmem:[%s8127_s5 + $0xf8] sm:$0xff] }
 0x359   : > { %v1501_v15 = vadd.f32 %v1495_v9, %v5861_v37 }
 0x35a   : > { %1752 = vrot.lane.b32.xlu0 %v1748_v8, %s8142_s2  ;;  %v1493_v10 = vpop.permute.xlu0 %1492  ;;  %v716_v8 = vld [vmem:[%s8127_s5 + $0x50] sm:$0xff] }
 0x35b   : > { %v1497_v60 = vsel %vm1496_vm1, %v1493_v10, %v1495_v9  ;;  %v738_v9 = vld [vmem:[%s8127_s5 + $0x100] sm:$0xff]  ;;  %v739_v10 = vld [vmem:[%s8127_s5 + $0x108] sm:$0xff] }
 0x35c   : > { %v1629_v4 = vpop.permute.xlu1 %1628  ;;  %v1500_v22 = vadd.f32 %v1497_v60, %v5859_v36  ;;  %v742_v60 = vld [vmem:[%s8127_s5 + $0x120] sm:$0xff] }
 0x35d   : > { %v1635_v17 = vadd.f32 %v1629_v4, %v1501_v15  ;;  %v741_v15 = vld [vmem:[%s8127_s5 + $0x118] sm:$0xff] }
 0x35e   : > { %v1627_v14 = vpop.permute.xlu0 %1626 }
 0x35f   : > { %v1631_v18 = vsel %vm1630_vm2, %v1627_v14, %v1629_v4  ;;  %v717_v4 = vld [vmem:[%s8127_s5 + $0x58] sm:$0xff]  ;;  %v740_v14 = vld [vmem:[%s8127_s5 + $0x110] sm:$0xff] }
 0x360   : > { %v1634_v24 = vadd.f32 %v1631_v18, %v1500_v22  ;;  %v744_v18 = vld [vmem:[%s8127_s5 + $0x130] sm:$0xff]  ;;  %v746_v22 = vld [vmem:[%s8127_s5 + $0x140] sm:$0xff] }
 0x364   : > { %v1697_v11 = vpop.permute.xlu1 %1696 }
 0x365   : > { %v1703_v13 = vadd.f32 %v1697_v11, %v1635_v17  ;;  %v743_v17 = vld [vmem:[%s8127_s5 + $0x128] sm:$0xff] }
 0x366   : > { %v1695_v16 = vpop.permute.xlu0 %1694 }
 0x367   : > { %v1699_v23 = vsel %vm1698_vm6, %v1695_v16, %v1697_v11  ;;  %v718_v11 = vld [vmem:[%s8127_s5 + $0x60] sm:$0xff]  ;;  %v720_v16 = vld [vmem:[%s8127_s5 + $0x70] sm:$0xff] }
 0x368   : > { %v1702_v27 = vadd.f32 %v1699_v23, %v1634_v24  ;;  %v749_v23 = vld [vmem:[%s8127_s5 + $0x158] sm:$0xff] }
 0x369   : > { %v721_v24 = vld [vmem:[%s8127_s5 + $0x78] sm:$0xff] }
 0x377   : > { %v1765_v12 = vpop.permute.xlu0 %1764 }
 0x3a5   : > { %v1732_v61 = vpop.permute.xlu1 %1731 }
 0x3a6   : > { %v1738_v25 = vadd.f32 %v1732_v61, %v1703_v13  ;;  %v747_v13 = vld [vmem:[%s8127_s5 + $0x148] sm:$0xff] }
 0x3a9   : > { %v1730_v19 = vpop.permute.xlu1 %1729 }
 0x3aa   : > { %v1734_v26 = vsel %vm1733_vm5, %v1730_v19, %v1732_v61  ;;  %v719_v61 = vld [vmem:[%s8127_s5 + $0x68] sm:$0xff]  ;;  %v745_v19 = vld [vmem:[%s8127_s5 + $0x138] sm:$0xff] }
 0x3ab   : > { %v1737_v20 = vadd.f32 %v1734_v26, %v1702_v27  ;;  %v722_v26 = vld [vmem:[%s8127_s5 + $0x80] sm:$0xff]  ;;  %v723_v27 = vld [vmem:[%s8127_s5 + $0x88] sm:$0xff] }
 0x3c9   : > { %v1755_v21 = vpop.permute.xlu1 %1754 }
 0x3ca   : > { %v1761_v37 = vadd.f32 %v1755_v21, %v1738_v25  ;;  %v750_v25 = vld [vmem:[%s8127_s5 + $0x160] sm:$0xff] }
 0x3cc   : > { %v1753_v39 = vpop.permute.xlu0 %1752  ;;  %v1768_v28 = vadd.f32 %v1765_v12, %v1761_v37  ;;  %v752_v37 = vld [vmem:[%s8127_s5 + $0x170] sm:$0xff] }
 0x3cd   : > { %v1757_v41 = vsel %vm1756_vm7, %v1753_v39, %v1755_v21  ;;  %v751_v21 = vld [vmem:[%s8127_s5 + $0x168] sm:$0xff]  ;;  %v753_v39 = vld [vmem:[%s8127_s5 + $0x178] sm:$0xff] }
 0x3ce   : > { %v1760_v29 = vadd.f32 %v1757_v41, %v1737_v20  ;;  %1773 = vrot.lane.b32.xlu1 %v1768_v28, %s5294_s25  ;;  %v724_v20 = vld [vmem:[%s8127_s5 + $0x90] sm:$0xff]  ;;  %v726_v41 = vld [vmem:[%s8127_s5 + $0xa0] sm:$0xff] }
 0x3d0   : > { %v1767_v30 = vadd.f32 %v1765_v12, %v1760_v29  ;;  %v748_v12 = vld [vmem:[%s8127_s5 + $0x150] sm:$0xff]  ;;  %v754_v29 = vld [vmem:[%s8127_s5 + $0x180] sm:$0xff] }
 0x3d2   : > { %1771 = vrot.lane.b32.xlu0 %v1767_v30, %s5294_s25 }
 0x440   : > { %v1774_v36 = vpop.permute.xlu1 %1773 }
 0x441   : > { %v1779_v31 = vmax.f32 %v1768_v28, %v1774_v36  ;;  %v725_v28 = vld [vmem:[%s8127_s5 + $0x98] sm:$0xff] }
 0x443   : > { %1784 = vrot.lane.b32.xlu1 %v1779_v31, %s8148_s21 }
 0x444   : > { %v1772_v40 = vpop.permute.xlu0 %1771 }
 0x445   : > { %v1775_v32 = vsel %vm1496_vm1, %v1772_v40, %v1774_v36 }
 0x446   : > { %v1778_v33 = vmax.f32 %v1767_v30, %v1775_v32  ;;  %v755_v32 = vld [vmem:[%s8127_s5 + $0x188] sm:$0xff] }
 0x448   : > { %1782 = vrot.lane.b32.xlu0 %v1778_v33, %s8148_s21 }
 0x4b5   : > { %v1785_v34 = vpop.permute.xlu1 %1784 }
 0x4b6   : > { %v1791_v45 = vmax.f32 %v1779_v31, %v1785_v34 }
 0x4b8   : > { %v1793_v44 = vmax.f32 %v1791_v45, 0.0 }
 0x4ba   : > { %1945 = vmatprep.subr.mxu0 %v1793_v44  ;;  %5133 = vmatprep.subr.mxu1 %v1793_v44  ;;  %v1783_v35 = vpop.permute.xlu0 %1782 }
 0x4bb   : > { %v1787_v50 = vsel %vm1786_vm8, %v1783_v35, %v1785_v34 }
 0x4bc   : > { %v1790_v43 = vmax.f32 %v1778_v33, %v1787_v50 }
 0x4be   : > { %v1792_v42 = vmax.f32 %v1790_v43, 0.0 }
 0x4c0   : > { %1946 = vmatpush1.msra.mxu0 %v1792_v42  ;;  %5134 = vmatpush1.msra.mxu1 %v1792_v42 }
 0x4c1   : > { %4676 = vmatmul.mubr.msk.f32.vlgmr.msra.gmra.mrb[0].mxu1 %vm1794_vm9, %v727_v47  ;;  %4655 = vmatmul.mubr.msk.f32.vlgmr.msra.gmra.mrb[50].mxu0 %vm1794_vm9, %v706_v51 }
 0x4c2   : > { %2119 = vmatprep.mubr.f32.mxu1 %v8158_v38  ;;  %2014 = vmatprep.mubr.f32.mxu0 %v8158_v38 }
 0x4c5   : > { %4677 = vmatmul.mubr.msk.f32.gmra.mrb[2].mxu1 %vm1794_vm9, %v728_v46  ;;  %4656 = vmatmul.mubr.msk.f32.gmra.mrb[52].mxu0 %vm1794_vm9, %v707_v55 }
 0x4c6   : > { %2124 = vmatprep.mubr.f32.mxu1 %v8158_v38  ;;  %2019 = vmatprep.mubr.f32.mxu0 %v8158_v38 }
 0x4c9   : > { %4678 = vmatmul.mubr.msk.f32.gmra.mrb[4].mxu1 %vm1794_vm9, %v729_v52  ;;  %4657 = vmatmul.mubr.msk.f32.gmra.mrb[54].mxu0 %vm1794_vm9, %v708_v54 }
 0x4ca   : > { %2129 = vmatprep.mubr.f32.mxu1 %v8158_v38  ;;  %2024 = vmatprep.mubr.f32.mxu0 %v8158_v38 }
 0x4cd   : > { %4679 = vmatmul.mubr.msk.f32.gmra.mrb[6].mxu1 %vm1794_vm9, %v730_v58  ;;  %4658 = vmatmul.mubr.msk.f32.gmra.mrb[56].mxu0 %vm1794_vm9, %v709_v59 }
 0x4ce   : > { %2134 = vmatprep.mubr.f32.mxu1 %v8158_v38  ;;  %2029 = vmatprep.mubr.f32.mxu0 %v8158_v38 }
 0x4d1   : > { %4680 = vmatmul.mubr.msk.f32.gmra.mrb[8].mxu1 %vm1794_vm9, %v731_v62  ;;  %4659 = vmatmul.mubr.msk.f32.gmra.mrb[58].mxu0 %vm1794_vm9, %v710_v48 }
 0x4d2   : > { %2139 = vmatprep.mubr.f32.mxu1 %v8158_v38  ;;  %2034 = vmatprep.mubr.f32.mxu0 %v8158_v38 }
 0x4d5   : > { %4681 = vmatmul.mubr.msk.f32.gmra.mrb[10].mxu1 %vm1794_vm9, %v732_v53  ;;  %4660 = vmatmul.mubr.msk.f32.gmra.mrb[60].mxu0 %vm1794_vm9, %v711_v49 }
 0x4d6   : > { %2144 = vmatprep.mubr.f32.mxu1 %v8158_v38  ;;  %2039 = vmatprep.mubr.f32.mxu0 %v8158_v38 }
 0x4d9   : > { %4682 = vmatmul.mubr.msk.f32.gmra.mrb[12].mxu1 %vm1794_vm9, %v733_v63  ;;  %4661 = vmatmul.mubr.msk.f32.gmra.mrb[62].mxu0 %vm1794_vm9, %v712_v0 }
 0x4da   : > { %2149 = vmatprep.mubr.f32.mxu1 %v8158_v38  ;;  %2044 = vmatprep.mubr.f32.mxu0 %v8158_v38 }
 0x4dd   : > { %4683 = vmatmul.mubr.msk.f32.gmra.mrb[14].mxu1 %vm1794_vm9, %v734_v56  ;;  %4662 = vmatmul.mubr.msk.f32.gmra.mrb[64].mxu0 %vm1794_vm9, %v713_v1 }
 0x4de   : > { %2154 = vmatprep.mubr.f32.mxu1 %v8158_v38  ;;  %2049 = vmatprep.mubr.f32.mxu0 %v8158_v38 }
 0x4e1   : > { %4684 = vmatmul.mubr.msk.f32.gmra.mrb[16].mxu1 %vm1794_vm9, %v735_v2  ;;  %4663 = vmatmul.mubr.msk.f32.gmra.mrb[66].mxu0 %vm1794_vm9, %v714_v3 }
 0x4e2   : > { %2159 = vmatprep.mubr.f32.mxu1 %v8158_v38  ;;  %2054 = vmatprep.mubr.f32.mxu0 %v8158_v38 }
 0x4e5   : > { %4685 = vmatmul.mubr.msk.f32.gmra.mrb[18].mxu1 %vm1794_vm9, %v736_v6  ;;  %4664 = vmatmul.mubr.msk.f32.gmra.mrb[68].mxu0 %vm1794_vm9, %v715_v7 }
 0x4e6   : > { %2164 = vmatprep.mubr.f32.mxu1 %v8158_v38  ;;  %2059 = vmatprep.mubr.f32.mxu0 %v8158_v38 }
 0x4e9   : > { %4686 = vmatmul.mubr.msk.f32.gmra.mrb[20].mxu1 %vm1794_vm9, %v737_v5  ;;  %4665 = vmatmul.mubr.msk.f32.gmra.mrb[70].mxu0 %vm1794_vm9, %v716_v8 }
 0x4ea   : > { %2169 = vmatprep.mubr.f32.mxu1 %v8158_v38  ;;  %2064 = vmatprep.mubr.f32.mxu0 %v8158_v38 }
 0x4ed   : > { %4687 = vmatmul.mubr.msk.f32.gmra.mrb[22].mxu1 %vm1794_vm9, %v738_v9  ;;  %4666 = vmatmul.mubr.msk.f32.gmra.mrb[72].mxu0 %vm1794_vm9, %v717_v4 }
 0x4ee   : > { %2174 = vmatprep.mubr.f32.mxu1 %v8158_v38  ;;  %2069 = vmatprep.mubr.f32.mxu0 %v8158_v38 }
 0x4f1   : > { %4688 = vmatmul.mubr.msk.f32.gmra.mrb[24].mxu1 %vm1794_vm9, %v739_v10  ;;  %4667 = vmatmul.mubr.msk.f32.gmra.mrb[74].mxu0 %vm1794_vm9, %v718_v11 }
 0x4f2   : > { %2179 = vmatprep.mubr.f32.mxu1 %v8158_v38  ;;  %2074 = vmatprep.mubr.f32.mxu0 %v8158_v38 }
 0x4f5   : > { %4689 = vmatmul.mubr.msk.f32.gmra.mrb[26].mxu1 %vm1794_vm9, %v740_v14  ;;  %4668 = vmatmul.mubr.msk.f32.gmra.mrb[76].mxu0 %vm1794_vm9, %v719_v61 }
 0x4f6   : > { %2184 = vmatprep.mubr.f32.mxu1 %v8158_v38  ;;  %2079 = vmatprep.mubr.f32.mxu0 %v8158_v38 }
 0x4f9   : > { %4690 = vmatmul.mubr.msk.f32.gmra.mrb[28].mxu1 %vm1794_vm9, %v741_v15  ;;  %4669 = vmatmul.mubr.msk.f32.gmra.mrb[78].mxu0 %vm1794_vm9, %v720_v16 }
 0x4fa   : > { %2189 = vmatprep.mubr.f32.mxu1 %v8158_v38  ;;  %2084 = vmatprep.mubr.f32.mxu0 %v8158_v38 }
 0x4fd   : > { %4691 = vmatmul.mubr.msk.f32.gmra.mrb[30].mxu1 %vm1794_vm9, %v742_v60  ;;  %4670 = vmatmul.mubr.msk.f32.gmra.mrb[80].mxu0 %vm1794_vm9, %v721_v24 }
 0x4fe   : > { %2195 = vmatprep.mubr.f32.mxu1 %v8158_v38  ;;  %2089 = vmatprep.mubr.f32.mxu0 %v8158_v38 }
 0x501   : > { %4692 = vmatmul.mubr.msk.f32.gmra.mrb[32].mxu1 %vm1794_vm9, %v743_v17  ;;  %4671 = vmatmul.mubr.msk.f32.gmra.mrb[82].mxu0 %vm1794_vm9, %v722_v26 }
 0x502   : > { %2201 = vmatprep.mubr.f32.mxu1 %v8158_v38  ;;  %2094 = vmatprep.mubr.f32.mxu0 %v8158_v38 }
 0x505   : > { %4693 = vmatmul.mubr.msk.f32.gmra.mrb[34].mxu1 %vm1794_vm9, %v744_v18  ;;  %4672 = vmatmul.mubr.msk.f32.gmra.mrb[84].mxu0 %vm1794_vm9, %v723_v27 }
 0x506   : > { %2207 = vmatprep.mubr.f32.mxu1 %v8158_v38  ;;  %2099 = vmatprep.mubr.f32.mxu0 %v8158_v38 }
 0x509   : > { %4694 = vmatmul.mubr.msk.f32.gmra.mrb[36].mxu1 %vm1794_vm9, %v745_v19  ;;  %4673 = vmatmul.mubr.msk.f32.gmra.mrb[86].mxu0 %vm1794_vm9, %v724_v20 }
 0x50a   : > { %2213 = vmatprep.mubr.f32.mxu1 %v8158_v38  ;;  %2104 = vmatprep.mubr.f32.mxu0 %v8158_v38 }
 0x50d   : > { %4695 = vmatmul.mubr.msk.f32.gmra.mrb[38].mxu1 %vm1794_vm9, %v746_v22  ;;  %4674 = vmatmul.mubr.msk.f32.gmra.mrb[88].mxu0 %vm1794_vm9, %v725_v28 }
 0x50e   : > { %2219 = vmatprep.mubr.f32.mxu1 %v8158_v38  ;;  %2109 = vmatprep.mubr.f32.mxu0 %v8158_v38 }
 0x511   : > { %4696 = vmatmul.mubr.msk.f32.gmra.mrb[40].mxu1 %vm1794_vm9, %v747_v13  ;;  %4675 = vmatmul.mubr.msk.f32.gmra.mrb[90].mxu0 %vm1794_vm9, %v726_v41 }
 0x512   : > { %2225 = vmatprep.mubr.f32.mxu1 %v8158_v38 }
 0x515   : > { %4697 = vmatmul.mubr.msk.f32.gmra.mrb[42].mxu1 %vm1794_vm9, %v748_v12 }
 0x516   : > { %2231 = vmatprep.mubr.f32.mxu1 %v8158_v38 }
 0x519   : > { %4698 = vmatmul.mubr.msk.f32.gmra.mrb[44].mxu1 %vm1794_vm9, %v749_v23 }
 0x51a   : > { %2237 = vmatprep.mubr.f32.mxu1 %v8158_v38 }
 0x51d   : > { %4699 = vmatmul.mubr.msk.f32.gmra.mrb[46].mxu1 %vm1794_vm9, %v750_v25 }
 0x51e   : > { %2243 = vmatprep.mubr.f32.mxu1 %v8158_v38 }
 0x521   : > { %4700 = vmatmul.mubr.msk.f32.gmra.mrb[48].mxu1 %vm1794_vm9, %v751_v21 }
 0x522   : > { %2249 = vmatprep.mubr.f32.mxu1 %v8158_v38 }
 0x525   : > { %4701 = vmatmul.mubr.msk.f32.gmra.mrb[50].mxu1 %vm1794_vm9, %v752_v37 }
 0x526   : > { %2255 = vmatprep.mubr.f32.mxu1 %v8158_v38 }
 0x529   : > { %4702 = vmatmul.mubr.msk.f32.gmra.mrb[52].mxu1 %vm1794_vm9, %v753_v39 }
 0x52a   : > { %2261 = vmatprep.mubr.f32.mxu1 %v8158_v38 }
 0x52d   : > { %4703 = vmatmul.mubr.msk.f32.gmra.mrb[54].mxu1 %vm1794_vm9, %v754_v29 }
 0x52e   : > { %2267 = vmatprep.mubr.f32.mxu1 %v8158_v38 }
 0x531   : > { %4704 = vmatmul.mubr.msk.f32.gmra.mrb[56].mxu1 %vm1794_vm9, %v755_v32 }
 0x532   : > { %2704 = vmatprep.mubr.f32.mxu1 %v8158_v38 }
 0x594   : > { %v6273_v30 = vpop.f32.mrb[0].mxu1  ;;  %v6275_v36 = vpop.f32.mrb[50].mxu0 }
 0x595   : > { %v2118_v31 = vpop.f32.mrb[1].mxu1  ;;  %v2013_v40 = vpop.f32.mrb[51].mxu0 }
 0x598   : > { %v6282_v33 = vpop.f32.mrb[2].mxu1  ;;  %v6284_v34 = vpop.f32.mrb[52].mxu0 }
 0x599   : > { %v2123_v45 = vpop.f32.mrb[3].mxu1  ;;  %v2018_v44 = vpop.f32.mrb[53].mxu0 }
 0x59c   : > { %v6286_v35 = vpop.f32.mrb[4].mxu1  ;;  %v6288_v50 = vpop.f32.mrb[54].mxu0 }
 0x59d   : > { %v2128_v43 = vpop.f32.mrb[5].mxu1  ;;  %v2023_v42 = vpop.f32.mrb[55].mxu0 }
 0x5a0   : > { %v6290_v47 = vpop.f32.mrb[6].mxu1  ;;  %v6292_v51 = vpop.f32.mrb[56].mxu0 }
 0x5a1   : > { %v2133_v46 = vpop.f32.mrb[7].mxu1  ;;  %v2028_v55 = vpop.f32.mrb[57].mxu0 }
 0x5a4   : > { %v6294_v52 = vpop.f32.mrb[8].mxu1  ;;  %v6296_v54 = vpop.f32.mrb[58].mxu0 }
 0x5a5   : > { %v2138_v58 = vpop.f32.mrb[9].mxu1  ;;  %v2033_v59 = vpop.f32.mrb[59].mxu0 }
 0x5a8   : > { %v6298_v62 = vpop.f32.mrb[10].mxu1  ;;  %v6300_v48 = vpop.f32.mrb[60].mxu0 }
 0x5a9   : > { %v2143_v53 = vpop.f32.mrb[11].mxu1  ;;  %v2038_v49 = vpop.f32.mrb[61].mxu0 }
 0x5ac   : > { %v6302_v63 = vpop.f32.mrb[12].mxu1  ;;  %v6304_v0 = vpop.f32.mrb[62].mxu0 }
 0x5ad   : > { %v2148_v56 = vpop.f32.mrb[13].mxu1  ;;  %v2043_v1 = vpop.f32.mrb[63].mxu0 }
 0x5b0   : > { %v6306_v2 = vpop.f32.mrb[14].mxu1  ;;  %v6308_v3 = vpop.f32.mrb[64].mxu0 }
 0x5b1   : > { %v2153_v6 = vpop.f32.mrb[15].mxu1  ;;  %v2048_v7 = vpop.f32.mrb[65].mxu0 }
 0x5b4   : > { %v6310_v5 = vpop.f32.mrb[16].mxu1  ;;  %v6312_v8 = vpop.f32.mrb[66].mxu0 }
 0x5b5   : > { %v2158_v9 = vpop.f32.mrb[17].mxu1  ;;  %v2053_v4 = vpop.f32.mrb[67].mxu0 }
 0x5b8   : > { %v2161_v10 = vpop.f32.mrb[18].mxu1  ;;  %v6314_v11 = vpop.f32.mrb[68].mxu0 }
 0x5b9   : > { %v2163_v14 = vpop.f32.mrb[19].mxu1  ;;  %v2058_v61 = vpop.f32.mrb[69].mxu0 }
 0x5bc   : > { %v2166_v15 = vpop.f32.mrb[20].mxu1  ;;  %v6316_v16 = vpop.f32.mrb[70].mxu0 }
 0x5bd   : > { %v2168_v60 = vpop.f32.mrb[21].mxu1  ;;  %v2063_v17 = vpop.f32.mrb[71].mxu0 }
 0x5c0   : > { %v6318_v18 = vpop.f32.mrb[22].mxu1  ;;  %v6320_v19 = vpop.f32.mrb[72].mxu0 }
 0x5c1   : > { %v2173_v22 = vpop.f32.mrb[23].mxu1  ;;  %v2068_v13 = vpop.f32.mrb[73].mxu0 }
 0x5c4   : > { %v6322_v12 = vpop.f32.mrb[24].mxu1  ;;  %v6324_v23 = vpop.f32.mrb[74].mxu0 }
 0x5c5   : > { %v2178_v24 = vpop.f32.mrb[25].mxu1  ;;  %v2073_v25 = vpop.f32.mrb[75].mxu0 }
 0x5c8   : > { %v6326_v26 = vpop.f32.mrb[26].mxu1  ;;  %v6328_v21 = vpop.f32.mrb[76].mxu0 }
 0x5c9   : > { %v2183_v27 = vpop.f32.mrb[27].mxu1  ;;  %v2078_v37 = vpop.f32.mrb[77].mxu0 }
 0x5cc   : > { %v6330_v20 = vpop.f32.mrb[28].mxu1  ;;  %v2081_v39 = vpop.f32.mrb[78].mxu0 }
 0x5cd   : > { %v2188_v28 = vpop.f32.mrb[29].mxu1  ;;  %v2083_v41 = vpop.f32.mrb[79].mxu0 }
 0x5d0   : > { %v6332_v29 = vpop.f32.mrb[30].mxu1  ;;  %v2086_v14 = vpop.f32.mrb[80].mxu0 }
 0x5d1   : > { %v6334_v31 = vpop.f32.mrb[31].mxu1  ;;  %v2088_v61 = vpop.f32.mrb[81].mxu0 }
 0x5d4   : > { %v6336_v40 = vpop.f32.mrb[32].mxu1  ;;  %v6348_v17 = vpop.f32.mrb[82].mxu0 }
 0x5d5   : > { %v6338_v32 = vpop.f32.mrb[33].mxu1  ;;  %v2093_v13 = vpop.f32.mrb[83].mxu0 }
 0x5d8   : > { %v2203_v45 = vpop.f32.mrb[34].mxu1  ;;  %v6352_v24 = vpop.f32.mrb[84].mxu0 }
 0x5d9   : > { %v2205_v44 = vpop.f32.mrb[35].mxu1  ;;  %v2098_v25 = vpop.f32.mrb[85].mxu0 }
 0x5dc   : > { %v2209_v43 = vpop.f32.mrb[36].mxu1  ;;  %v2101_v37 = vpop.f32.mrb[86].mxu0 }
 0x5dd   : > { %v2211_v42 = vpop.f32.mrb[37].mxu1  ;;  %v2103_v41 = vpop.f32.mrb[87].mxu0 }
 0x5e0   : > { %v6340_v46 = vpop.f32.mrb[38].mxu1  ;;  %v6356_v61 = vpop.f32.mrb[88].mxu0 }
 0x5e1   : > { %v6342_v55 = vpop.f32.mrb[39].mxu1  ;;  %v2108_v57 = vpop.f32.mrb[89].mxu0 }
 0x5e4   : > { %v6344_v58 = vpop.f32.mrb[40].mxu1  ;;  %v2111_v38 = vpop.f32.mrb[90].mxu0 }
 0x5e5   : > { %v6346_v59 = vpop.f32.mrb[41].mxu1 }
 0x5e8   : > { %v2227_v53 = vpop.f32.mrb[42].mxu1 }
 0x5e9   : > { %v2229_v49 = vpop.f32.mrb[43].mxu1 }
 0x5ec   : > { %v2233_v56 = vpop.f32.mrb[44].mxu1 }
 0x5ed   : > { %v2235_v1 = vpop.f32.mrb[45].mxu1 }
 0x5f0   : > { %v2239_v6 = vpop.f32.mrb[46].mxu1 }
 0x5f1   : > { %v2241_v7 = vpop.f32.mrb[47].mxu1 }
 0x5f4   : > { %v2245_v9 = vpop.f32.mrb[48].mxu1 }
 0x5f5   : > { %v2247_v4 = vpop.f32.mrb[49].mxu1 }
 0x5f8   : > { %v2251_v60 = vpop.f32.mrb[50].mxu1 }
 0x5f9   : > { %2412 = vrot.lane.b32.xlu0 %v2251_v60, %s5294_s25  ;;  %v2253_v22 = vpop.f32.mrb[51].mxu1  ;;  %v2113_v60 = vpop.f32.mrb[91].mxu0 }
 0x5fa   : > { %2414 = vrot.lane.b32.xlu1 %v2253_v22, %s5294_s25 }
 0x5fc   : > { %v2257_v27 = vpop.f32.mrb[52].mxu1 }
 0x5fd   : > { %2346 = vrot.lane.b32.xlu0 %v2161_v10, %s5293_s23  ;;  %v2259_v28 = vpop.f32.mrb[53].mxu1 }
 0x5fe   : > { %2416 = vrot.lane.b32.xlu1 %v2257_v27, %s5294_s25 }
 0x600   : > { %v2263_v57 = vpop.f32.mrb[54].mxu1 }
 0x601   : > { %2418 = vrot.lane.b32.xlu0 %v2259_v28, %s5294_s25  ;;  %v2265_v10 = vpop.f32.mrb[55].mxu1 }
 0x602   : > { %2348 = vrot.lane.b32.xlu1 %v2166_v15, %s5293_s23 }
 0x605   : > { %2368 = vrot.lane.b32.xlu0 %v2203_v45, %s5294_s25 }
 0x606   : > { %2370 = vrot.lane.b32.xlu1 %v2205_v44, %s5294_s25 }
 0x609   : > { %2390 = vrot.lane.b32.xlu0 %v2227_v53, %s5294_s25 }
 0x60a   : > { %2392 = vrot.lane.b32.xlu1 %v2229_v49, %s5294_s25 }
 0x60d   : > { %2306 = vrot.lane.b32.xlu0 %v2081_v39, %s5294_s25 }
 0x60e   : > { %2326 = vrot.lane.b32.xlu1 %v6282_v33, %s5294_s25 }
 0x611   : > { %2336 = vrot.lane.b32.xlu0 %v6298_v62, %s5294_s25 }
 0x612   : > { %2374 = vrot.lane.b32.xlu1 %v2211_v42, %s5294_s25  ;;  %v6379_v42 = vpop.f32.mrb[56].mxu1 }
 0x615   : > { %2372 = vrot.lane.b32.xlu0 %v2209_v43, %s5294_s25 }
 0x66b   : > { %v2413_v15 = vpop.permute.xlu0 %2412 }
 0x66c   : > { %v2415_v45 = vpop.permute.xlu1 %2414 }
 0x66d   : > { %v2427_v44 = vadd.f32 %v2415_v45, %v2241_v7  ;;  %v2420_v49 = vsel %vm1496_vm1, %v2413_v15, %v2415_v45 }
 0x66e   : > { %v2426_v33 = vadd.f32 %v2420_v49, %v2239_v6  ;;  %v6387_v6 = vpop.f32.mrb[57].mxu1 }
 0x66f   : > { %v2347_v53 = vpop.permute.xlu0 %2346  ;;  %2494 = vrot.lane.b32.xlu0 %v2427_v44, %s8168_s19 }
 0x670   : > { %v2352_v39 = vadd.f32 %v2347_v53, %v6306_v2  ;;  %v2417_v62 = vpop.permute.xlu1 %2416 }
 0x672   : > { %2462 = vrot.lane.b32.xlu1 %v2352_v39, %s8168_s19 }
 0x673   : > { %2394 = vrot.lane.b32.xlu0 %v2233_v56, %s5294_s25  ;;  %v2419_v43 = vpop.permute.xlu0 %2418 }
 0x674   : > { %v2421_v2 = vsel %vm1496_vm1, %v2417_v62, %v2419_v43  ;;  %v2429_v7 = vadd.f32 %v2419_v43, %v2247_v4  ;;  %v2349_v22 = vpop.permute.xlu1 %2348 }
 0x675   : > { %v2428_v56 = vadd.f32 %v2421_v2, %v2245_v9 }
 0x676   : > { %2492 = vrot.lane.b32.xlu1 %v2426_v33, %s8168_s19 }
 0x677   : > { %2308 = vrot.lane.b32.xlu0 %v2086_v14, %s5294_s25  ;;  %v2369_v13 = vpop.permute.xlu0 %2368 }
 0x67a   : > { %2396 = vrot.lane.b32.xlu1 %v2235_v1, %s5294_s25  ;;  %v2371_v1 = vpop.permute.xlu1 %2370 }
 0x67b   : > { %2338 = vrot.lane.b32.xlu0 %v6302_v63, %s5294_s25  ;;  %v2353_v63 = vadd.f32 %v2349_v22, %v6310_v5  ;;  %v2391_v14 = vpop.permute.xlu0 %2390  ;;  %v2376_v4 = vsel %vm1496_vm1, %v2369_v13, %v2371_v1  ;;  %v2383_v5 = vadd.f32 %v2371_v1, %v6334_v31  ;;  %v756_v1 = vld [vmem:[%s8128_s6] sm:$0xff] }
 0x67e   : > { %2328 = vrot.lane.b32.xlu1 %v6286_v35, %s5294_s25  ;;  %v2382_v35 = vadd.f32 %v2376_v4, %v6332_v29  ;;  %v2393_v25 = vpop.permute.xlu1 %2392 }
 0x67f   : > { %2498 = vrot.lane.b32.xlu0 %v2429_v7, %s8168_s19  ;;  %v2307_v9 = vpop.permute.xlu0 %2306 }
 0x682   : > { %2496 = vrot.lane.b32.xlu1 %v2428_v56, %s8168_s19  ;;  %v2327_v27 = vpop.permute.xlu1 %2326 }
 0x683   : > { %2286 = vrot.lane.b32.xlu0 %v6304_v0, %s5294_s25  ;;  %v2312_v0 = vadd.f32 %v2307_v9, %v6324_v23  ;;  %v2332_v29 = vadd.f32 %v2327_v27, %v2111_v38 }
 0x686   : > { %2464 = vrot.lane.b32.xlu1 %v2353_v63, %s8168_s19 }
 0x687   : > { %2316 = vrot.lane.b32.xlu0 %v2101_v37, %s5294_s25 }
 0x68a   : > { %2296 = vrot.lane.b32.xlu1 %v6316_v16, %s5293_s23  ;;  %v2337_v16 = vpop.permute.xlu0 %2336 }
 0x68b   : > { %2474 = vrot.lane.b32.xlu0 %v2382_v35, %s8168_s19 }
 0x68e   : > { %2356 = vrot.lane.b32.xlu1 %v6326_v26, %s5294_s25  ;;  %v2373_v23 = vpop.permute.xlu0 %2372  ;;  %v2375_v26 = vpop.permute.xlu1 %2374 }
 0x68f   : > { %2442 = vrot.lane.b32.xlu0 %v2312_v0, %s8169_s20  ;;  %v2377_v31 = vsel %vm1496_vm1, %v2373_v23, %v2375_v26  ;;  %v2385_v53 = vadd.f32 %v2375_v26, %v6338_v32 }
 0x690   : > { %v2384_v38 = vadd.f32 %v2377_v31, %v6336_v40 }
 0x692   : > { %2476 = vrot.lane.b32.xlu1 %v2383_v5, %s8168_s19 }
 0x693   : > { %2564 = vrot.lane.b32.xlu0 %v2265_v10, %s8170_s1 }
 0x696   : > { %2452 = vrot.lane.b32.xlu1 %v2332_v29, %s8169_s20 }
 0x697   : > { %2298 = vrot.lane.b32.xlu0 %v6320_v19, %s5293_s23  ;;  %v2405_v19 = vadd.f32 %v2393_v25, %v6342_v55  ;;  %s8171_s23 = smov 114  }
 0x69a   : > { %2562 = vrot.lane.b32.xlu1 %v2263_v57, %s8170_s1 }
 0x69b   : > { %2358 = vrot.lane.b32.xlu0 %v6330_v20, %s5294_s25  ;;  %v2342_v20 = vadd.f32 %v2337_v16, %v6290_v47 }
 0x69e   : > { %2288 = vrot.lane.b32.xlu1 %v6308_v3, %s5294_s25  ;;  %v2398_v3 = vsel %vm1496_vm1, %v2391_v14, %v2393_v25 }
 0x6a2   : > { %2318 = vrot.lane.b32.xlu1 %v6356_v61, %s5294_s25  ;;  %v2404_v61 = vadd.f32 %v2398_v3, %v6340_v46  ;;  %v757_v3 = vld [vmem:[%s8128_s6 + $0x8] sm:$0xff] }
 0x6a6   : > { %2478 = vrot.lane.b32.xlu1 %v2384_v38, %s8168_s19 }
 0x6e1   : > { %v2495_v37 = vpop.permute.xlu0 %2494 }
 0x6e2   : > { %v2507_v28 = vadd.f32 %v2495_v37, %v2405_v19 }
 0x6e4   : > { %v2463_v41 = vpop.permute.xlu1 %2462  ;;  %2536 = vrot.lane.b32.xlu1 %v2507_v28, %s8171_s23 }
 0x6e5   : > { %v2468_v60 = vadd.f32 %v2463_v41, %v2342_v20  ;;  %v2395_v57 = vpop.permute.xlu0 %2394 }
 0x6e7   : > { %2522 = vrot.lane.b32.xlu0 %v2468_v60, %s8171_s23 }
 0x6e8   : > { %v2493_v40 = vpop.permute.xlu1 %2492 }
 0x6e9   : > { %v2500_v10 = vsel %vm1630_vm2, %v2493_v40, %v2495_v37  ;;  %v2309_v15 = vpop.permute.xlu0 %2308 }
 0x6ea   : > { %v2506_v55 = vadd.f32 %v2500_v10, %v2404_v61  ;;  %v2313_v45 = vadd.f32 %v2309_v15, %v6328_v21 }
 0x6ec   : > { %v2397_v44 = vpop.permute.xlu1 %2396  ;;  %2534 = vrot.lane.b32.xlu0 %v2506_v55, %s8171_s23  ;;  %2444 = vrot.lane.b32.xlu1 %v2313_v45, %s8169_s20 }
 0x6ed   : > { %v2339_v47 = vpop.permute.xlu0 %2338  ;;  %v2407_v33 = vadd.f32 %v2397_v44, %v6346_v59  ;;  %v2399_v7 = vsel %vm1496_vm1, %v2395_v57, %v2397_v44 }
 0x6ee   : > { %v2343_v2 = vadd.f32 %v2339_v47, %v6294_v52 }
 0x6f0   : > { %v2329_v39 = vpop.permute.xlu1 %2328  ;;  %2480 = vrot.lane.b32.xlu0 %v2385_v53, %s8168_s19 }
 0x6f1   : > { %v2333_v46 = vadd.f32 %v2329_v39, %v6273_v30  ;;  %v2499_v49 = vpop.permute.xlu0 %2498  ;;  %v2406_v30 = vadd.f32 %v2399_v7, %v6344_v58 }
 0x6f2   : > { %v2509_v43 = vadd.f32 %v2499_v49, %v2407_v33 }
 0x6f4   : > { %v2497_v62 = vpop.permute.xlu1 %2496  ;;  %2454 = vrot.lane.b32.xlu0 %v2333_v46, %s8169_s20  ;;  %s8173_s20 = smov 82  }
 0x6f5   : > { %v2287_v21 = vpop.permute.xlu0 %2286  ;;  %v2501_v13 = vsel %vm1630_vm2, %v2497_v62, %v2499_v49 }
 0x6f6   : > { %v2508_v59 = vadd.f32 %v2501_v13, %v2406_v30  ;;  %v2292_v63 = vadd.f32 %v2287_v21, %v6296_v54 }
 0x6f8   : > { %v2465_v22 = vpop.permute.xlu1 %2464  ;;  %2540 = vrot.lane.b32.xlu0 %v2509_v43, %s8171_s23 }
 0x6f9   : > { %v2469_v32 = vadd.f32 %v2465_v22, %v2343_v2  ;;  %v2317_v56 = vpop.permute.xlu0 %2316 }
 0x6fa   : > { %v2322_v16 = vadd.f32 %v2317_v56, %v6348_v17 }
 0x6fb   : > { %2524 = vrot.lane.b32.xlu1 %v2469_v32, %s8171_s23 }
 0x6fc   : > { %2566 = vrot.lane.b32.xlu0 %v6379_v42, %s8170_s1  ;;  %v2297_v58 = vpop.permute.xlu1 %2296 }
 0x6fd   : > { %v2475_v52 = vpop.permute.xlu0 %2474  ;;  %v2302_v42 = vadd.f32 %v2297_v58, %v6312_v8  ;;  %v763_v58 = vld [vmem:[%s8129_s7 + $0x28] sm:$0xff] }
 0x6ff   : > { %2538 = vrot.lane.b32.xlu1 %v2508_v59, %s8171_s23 }
 0x700   : > { %2276 = vrot.lane.b32.xlu0 %v6288_v50, %s5294_s25  ;;  %v2357_v50 = vpop.permute.xlu1 %2356 }
 0x701   : > { %v2443_v14 = vpop.permute.xlu0 %2442  ;;  %v2362_v38 = vadd.f32 %v2357_v50, %v6318_v18 }
 0x702   : > { %v2448_v4 = vadd.f32 %v2443_v14, %v2302_v42  ;;  %v762_v42 = vld [vmem:[%s8129_s7 + $0x20] sm:$0xff] }
 0x703   : > { %2568 = vrot.lane.b32.xlu1 %v6387_v6, %s8170_s1 }
 0x704   : > { %2588 = vperm.xlu0 %5211, %v756_v1   ;;  %v2477_v35 = vpop.permute.xlu1 %2476  ;;  %v759_v1 = vld [vmem:[%s8129_s7 + $0x8] sm:$0xff] }
 0x705   : > { %v2565_v0 = vpop.permute.xlu0 %2564  ;;  %v2482_v31 = vsel %vm1630_vm2, %v2475_v52, %v2477_v35  ;;  %v4975_v14 = vpack.c.bf16 %v763_v58, %v759_v1  ;;  %v836_v1 = vld [vmem:[%s8131_s9 + $0x110] sm:$0xff]  ;;  %v837_v58 = vld [vmem:[%s8131_s9 + $0x118] sm:$0xff] }
 0x706   : > { %v2486_v19 = vadd.f32 %v2482_v31, %v2362_v38  ;;  %v770_v38 = vld [vmem:[%s8129_s7 + $0x60] sm:$0xff] }
 0x707   : > { %2432 = vrot.lane.b32.xlu1 %v2292_v63, %s8168_s19  ;;  %v758_v63 = vld [vmem:[%s8129_s7] sm:$0xff]  ;;  %4976 = vmatprep.subr.bf16.mxu1 %v4975_v14  ;;  %v5045_v14 = vpack.c.bf16 %v837_v58, %v836_v1  ;;  %v805_v1 = vld [vmem:[%s8131_s9 + $0x18] sm:$0xff] }
 0x708   : > { %v2453_v9 = vpop.permute.xlu1 %2452  ;;  %v822_v58 = vld [vmem:[%s8131_s9 + $0xa0] sm:$0xff] }
 0x709   : > { %v2299_v27 = vpop.permute.xlu0 %2298  ;;  %v2458_v54 = vadd.f32 %v2453_v9, %v2322_v16 }
 0x70a   : > { %v2303_v40 = vadd.f32 %v2299_v27, %v6314_v11 }
 0x70b   : > { %2512 = vrot.lane.b32.xlu1 %v2448_v4, %s8172_s22  ;;  %v4977_v4 = vpack.c.bf16 %v762_v42, %v758_v63  ;;  %v854_v63 = vld [vmem:[%s8131_s9 + $0x1a0] sm:$0xff] }
 0x70c   : > { %v2563_v25 = vpop.permute.xlu1 %2562 }
 0x70d   : > { %v2359_v29 = vpop.permute.xlu0 %2358  ;;  %v2570_v17 = vsel %vm1733_vm5, %v2563_v25, %v2565_v0  ;;  %4978 = vmatpush1.bf16.msra.mxu1 %v4977_v4  ;;  %v838_v4 = vld [vmem:[%s8131_s9 + $0x120] sm:$0xff] }
 0x710   : > { %v2289_v5 = vpop.permute.xlu1 %2288 }
 0x711   : > { %v2293_v18 = vadd.f32 %v2289_v5, %v6300_v48  ;;  %v2363_v48 = vadd.f32 %v2359_v29, %v6322_v12 }
 0x714   : > { %v2319_v6 = vpop.permute.xlu1 %2318 }
 0x718   : > { %v2479_v26 = vpop.permute.xlu1 %2478 }
 0x756   : > { %v2537_v37 = vpop.permute.xlu1 %2536 }
 0x759   : > { %v2523_v23 = vpop.permute.xlu0 %2522 }
 0x75a   : > { %v2528_v8 = vadd.f32 %v2523_v23, %v2458_v54 }
 0x75c   : > { %2550 = vrot.lane.b32.xlu0 %v2528_v8, %s8170_s1  ;;  %v771_v8 = vld [vmem:[%s8129_s7 + $0x68] sm:$0xff] }
 0x75e   : > { %v2535_v28 = vpop.permute.xlu0 %2534  ;;  %v2445_v61 = vpop.permute.xlu1 %2444 }
 0x75f   : > { %v2542_v20 = vsel %vm1710_vm4, %v2535_v28, %v2537_v37  ;;  %v2449_v15 = vadd.f32 %v2445_v61, %v2303_v40  ;;  %v775_v37 = vld [vmem:[%s8129_s7 + $0x88] sm:$0xff]  ;;  %v782_v61 = vld [vmem:[%s8129_s7 + $0xc0] sm:$0xff] }
 0x760   : > { %v2546_v41 = vadd.f32 %v2542_v20, %v2486_v19  ;;  %2278 = vrot.lane.b32.xlu0 %v6292_v51, %s5294_s25  ;;  %v2323_v51 = vadd.f32 %v2319_v6, %v6352_v24  ;;  %v779_v28 = vld [vmem:[%s8129_s7 + $0xa8] sm:$0xff]  ;;  %v774_v20 = vld [vmem:[%s8129_s7 + $0x80] sm:$0xff] }
 0x761   : > { %v786_v40 = vld [vmem:[%s8129_s7 + $0xe0] sm:$0xff] }
 0x762   : > { %v2574_v60 = vadd.f32 %v2570_v17, %v2546_v41  ;;  %v2481_v57 = vpop.permute.xlu0 %2480  ;;  %v4983_v41 = vpack.c.bf16 %v779_v28, %v775_v37  ;;  %v778_v17 = vld [vmem:[%s8129_s7 + $0xa0] sm:$0xff]  ;;  %v764_v37 = vld [vmem:[%s8129_s7 + $0x30] sm:$0xff] }
 0x763   : > { %v2483_v53 = vsel %vm1630_vm2, %v2479_v26, %v2481_v57  ;;  %v767_v26 = vld [vmem:[%s8129_s7 + $0x48] sm:$0xff]  ;;  %v4985_v57 = vpack.c.bf16 %v778_v17, %v774_v20  ;;  %v769_v20 = vld [vmem:[%s8129_s7 + $0x58] sm:$0xff] }
 0x764   : > { %2593 = vperm.xlu0 %5211, %v757_v3   ;;  %2578 = vrot.lane.b32.xlu1 %v2574_v60, %s8173_s20  ;;  %v2487_v46 = vadd.f32 %v2483_v53, %v2363_v48  ;;  %v4979_v31 = vpack.c.bf16 %v771_v8, %v767_v26  ;;  %v783_v3 = vld [vmem:[%s8129_s7 + $0xc8] sm:$0xff]  ;;  %v903_v48 = vld [vmem:[%s8138_s16] sm:$0xff] }
 0x765   : > { %v787_v60 = vld [vmem:[%s8129_s7 + $0xe8] sm:$0xff] }
 0x766   : > { %v2455_v10 = vpop.permute.xlu0 %2454  ;;  %4980 = vmatprep.subr.bf16.mxu1 %v4979_v31  ;;  %v843_v26 = vld [vmem:[%s8131_s9 + $0x148] sm:$0xff]  ;;  %v861_v31 = vld [vmem:[%s8131_s9 + $0x1d8] sm:$0xff] }
 0x767   : > { %v2459_v55 = vadd.f32 %v2455_v10, %v2323_v51  ;;  %v4989_v10 = vpack.c.bf16 %v786_v40, %v782_v61  ;;  %v791_v51 = vld [vmem:[%s8129_s7 + $0x108] sm:$0x1]  ;;  %v772_v61 = vld [vmem:[%s8129_s7 + $0x70] sm:$0xff]  ;;  %v777_v40 = vld [vmem:[%s8129_s7 + $0x98] sm:$0xff] }
 0x768   : > { %2434 = vrot.lane.b32.xlu1 %v2293_v18, %s8168_s19  ;;  %v4987_v18 = vpack.c.bf16 %v787_v60, %v783_v3  ;;  %s604_s19 = scalar_lea.vmem %s8140_s18, %s8226_s28 }
 0x76a   : > { %v2541_v47 = vpop.permute.xlu0 %2540 }
 0x76c   : > { %2514 = vrot.lane.b32.xlu1 %v2449_v15, %s8172_s22  ;;  %v790_v15 = vld [vmem:[%s8129_s7 + $0x100] sm:$0x1] }
 0x76d   : > { %v2525_v45 = vpop.permute.xlu1 %2524 }
 0x76e   : > { %v2529_v44 = vadd.f32 %v2525_v45, %v2459_v55  ;;  %v2567_v49 = vpop.permute.xlu0 %2566  ;;  %v761_v55 = vld [vmem:[%s8129_s7 + $0x18] sm:$0xff] }
 0x76f   : > { %v765_v45 = vld [vmem:[%s8129_s7 + $0x38] sm:$0xff] }
 0x770   : > { %2552 = vrot.lane.b32.xlu0 %v2529_v44, %s8170_s1  ;;  %v4991_v44 = vpack.c.bf16 %v765_v45, %v761_v55  ;;  %v776_v45 = vld [vmem:[%s8129_s7 + $0x90] sm:$0xff] }
 0x771   : > { %v2539_v39 = vpop.permute.xlu1 %2538 }
 0x772   : > { %v2543_v11 = vsel %vm1710_vm4, %v2539_v39, %v2541_v47  ;;  %v2277_v43 = vpop.permute.xlu0 %2276  ;;  %v877_v39 = vld [vmem:[%s8137_s15 + $0x18] sm:$0xff] }
 0x773   : > { %v2547_v33 = vadd.f32 %v2543_v11, %v2487_v46  ;;  %v2282_v22 = vadd.f32 %v2277_v43, %v6275_v36  ;;  %v906_v11 = vld [vmem:[%s8138_s16 + $0x18] sm:$0xff]  ;;  %v879_v46 = vld [vmem:[%s8137_s15 + $0x28] sm:$0xff] }
 0x774   : > { %v883_v43 = vld [vmem:[%s8137_s15 + $0x48] sm:$0xff] }
 0x775   : > { %v2569_v24 = vpop.permute.xlu1 %2568 }
 0x776   : > { %v2571_v62 = vsel %vm1733_vm5, %v2567_v49, %v2569_v24  ;;  %v908_v49 = vld [vmem:[%s8138_s16 + $0x28] sm:$0xff] }
 0x777   : > { %v2575_v21 = vadd.f32 %v2571_v62, %v2547_v33  ;;  %v881_v62 = vld [vmem:[%s8137_s15 + $0x38] sm:$0xff] }
 0x779   : > { %2580 = vrot.lane.b32.xlu1 %v2575_v21, %s8173_s20  ;;  %v2433_v2 = vpop.permute.xlu1 %2432  ;;  %s8174_s20 = smov 113   ;;  %v910_v21 = vld [vmem:[%s8138_s16 + $0x38] sm:$0xff] }
 0x77a   : > { %v2438_v13 = vadd.f32 %v2433_v2, %v2282_v22  ;;  %v912_v2 = vld [vmem:[%s8138_s16 + $0x48] sm:$0xff] }
 0x77b   : > { %v851_v22 = vld [vmem:[%s8131_s9 + $0x188] sm:$0xff] }
 0x77d   : > { %v2513_v32 = vpop.permute.xlu1 %2512 }
 0x77e   : > { %v2518_v56 = vadd.f32 %v2513_v32, %v2438_v13  ;;  %v834_v32 = vld [vmem:[%s8131_s9 + $0x100] sm:$0xff] }
 0x783   : > { %v2589_v7 = vpop.permute.xlu0 %2588 }
 0x7ce   : > { %v2551_v12 = vpop.permute.xlu0 %2550 }
 0x7cf   : > { %v2556_v30 = vadd.f32 %v2551_v12, %v2518_v56  ;;  %v835_v12 = vld [vmem:[%s8131_s9 + $0x108] sm:$0xff]  ;;  %v852_v56 = vld [vmem:[%s8131_s9 + $0x190] sm:$0xff] }
 0x7d2   : > { %v2279_v50 = vpop.permute.xlu0 %2278 }
 0x7d3   : > { %v2283_v25 = vadd.f32 %v2279_v50, %v6284_v34  ;;  %v766_v34 = vld [vmem:[%s8129_s7 + $0x40] sm:$0xff]  ;;  %v839_v50 = vld [vmem:[%s8131_s9 + $0x128] sm:$0xff] }
 0x7d4   : > { %v4981_v19 = vpack.c.bf16 %v770_v38, %v766_v34  ;;  %v860_v34 = vld [vmem:[%s8131_s9 + $0x1d0] sm:$0xff] }
 0x7d5   : > { %v5059_v38 = vpack.c.bf16 %v861_v31, %v860_v34 }
 0x7d6   : > { %v2579_v59 = vpop.permute.xlu1 %2578  ;;  %4982 = vmatpush1.bf16.msra.mxu1 %v4981_v19  ;;  %v760_v19 = vld [vmem:[%s8129_s7 + $0x10] sm:$0xff] }
 0x7d7   : > { %v2584_v52 = vadd.f32 %v2579_v59, %v2556_v30  ;;  %4984 = vmatprep.subr.bf16.mxu1 %v4983_v41  ;;  %v853_v30 = vld [vmem:[%s8131_s9 + $0x198] sm:$0xff]  ;;  %v5041_v59 = vpack.c.bf16 %v835_v12, %v834_v32  ;;  %v4993_v3 = vpack.c.bf16 %v764_v37, %v760_v19  ;;  %v803_v12 = vld [vmem:[%s8131_s9 + $0x8] sm:$0xff]  ;;  %v830_v37 = vld [vmem:[%s8131_s9 + $0xe0] sm:$0xff] }
 0x7d8   : > { %v773_v41 = vld [vmem:[%s8129_s7 + $0x78] sm:$0xff] }
 0x7d9   : > { %v2596_v36 = vadd.f32 %v2589_v7, %v2584_v52  ;;  %v850_v7 = vld [vmem:[%s8131_s9 + $0x180] sm:$0xff]  ;;  %v5043_v52 = vpack.c.bf16 %v853_v30, %v852_v56  ;;  %v820_v56 = vld [vmem:[%s8131_s9 + $0x90] sm:$0xff]  ;;  %v813_v19 = vld [vmem:[%s8131_s9 + $0x58] sm:$0xff] }
 0x7da   : > { %v2435_v35 = vpop.permute.xlu1 %2434  ;;  %4986 = vmatpush1.bf16.msra.mxu1 %v4985_v57  ;;  %v5039_v13 = vpack.c.bf16 %v851_v22, %v850_v7  ;;  %v4995_v57 = vpack.c.bf16 %v773_v41, %v769_v20 }
 0x7db   : > { %2600 = vrot.lane.b32.xlu0 %v2596_v36, %s5294_s25  ;;  %v2439_v5 = vadd.f32 %v2435_v35, %v2283_v25  ;;  %4988 = vmatprep.subr.bf16.mxu1 %v4987_v18  ;;  %v856_v35 = vld [vmem:[%s8131_s9 + $0x1b0] sm:$0xff]  ;;  %v5049_v25 = vpack.c.bf16 %v839_v50, %v838_v4  ;;  %v807_v4 = vld [vmem:[%s8131_s9 + $0x28] sm:$0xff] }
 0x7dc   : > { %5040 = vmatprep.subr.bf16.mxu0 %v5039_v13  ;;  %v768_v18 = vld [vmem:[%s8129_s7 + $0x50] sm:$0xff]  ;;  %v802_v13 = vld [vmem:[%s8131_s9] sm:$0xff] }
 0x7dd   : > { %5042 = vmatpush3.bf16.msra.mxu0 %v5041_v59  ;;  %v5009_v30 = vpack.c.bf16 %v803_v12, %v802_v13  ;;  %v824_v50 = vld [vmem:[%s8131_s9 + $0xb0] sm:$0xff] }
 0x7de   : > { %v2515_v0 = vpop.permute.xlu1 %2514  ;;  %4990 = vmatpush1.bf16.msra.mxu1 %v4989_v10  ;;  %5044 = vmatprep.subr.bf16.mxu0 %v5043_v52  ;;  %v781_v10 = vld [vmem:[%s8129_s7 + $0xb8] sm:$0xff]  ;;  %v804_v52 = vld [vmem:[%s8131_s9 + $0x10] sm:$0xff] }
 0x7df   : > { %v2519_v6 = vadd.f32 %v2515_v0, %v2439_v5  ;;  %4705 = vmatprep.subr.msk.mxu1 %vm2627_vm10, %v791_v51  ;;  %v840_v5 = vld [vmem:[%s8131_s9 + $0x130] sm:$0xff]  ;;  %v4997_v51 = vpack.c.bf16 %v772_v61, %v768_v18  ;;  %v4999_v55 = vpack.c.bf16 %v781_v10, %v777_v40  ;;  %v833_v18 = vld [vmem:[%s8131_s9 + $0xf8] sm:$0xff] }
 0x7e0   : > { %v816_v40 = vld [vmem:[%s8131_s9 + $0x70] sm:$0xff]  ;;  %v817_v10 = vld [vmem:[%s8131_s9 + $0x78] sm:$0xff] }
 0x7e1   : > { %5046 = vmatpush3.bf16.msra.mxu0 %v5045_v14 }
 0x7e2   : > { %4706 = vmatpush1.msk.msra.mxu1 %vm2627_vm10, %v790_v15  ;;  %v8175_v15 = vmov 0.0  }
 0x7e3   : > { %v2594_v9 = vpop.permute.xlu0 %2593  ;;  %4992 = vmatprep.subr.bf16.mxu1 %v4991_v44  ;;  %v780_v44 = vld [vmem:[%s8129_s7 + $0xb0] sm:$0xff] }
 0x7e7   : > { %v2553_v27 = vpop.permute.xlu0 %2552 }
 0x7e8   : > { %v2557_v29 = vadd.f32 %v2553_v27, %v2519_v6  ;;  %v841_v27 = vld [vmem:[%s8131_s9 + $0x138] sm:$0xff]  ;;  %v858_v6 = vld [vmem:[%s8131_s9 + $0x1c0] sm:$0xff] }
 0x7eb   : > { %v2581_v16 = vpop.permute.xlu1 %2580 }
 0x7ec   : > { %v2585_v54 = vadd.f32 %v2581_v16, %v2557_v29  ;;  %v859_v29 = vld [vmem:[%s8131_s9 + $0x1c8] sm:$0xff]  ;;  %v5053_v16 = vpack.c.bf16 %v841_v27, %v840_v5  ;;  %v809_v5 = vld [vmem:[%s8131_s9 + $0x38] sm:$0xff]  ;;  %v826_v27 = vld [vmem:[%s8131_s9 + $0xc0] sm:$0xff] }
 0x7ee   : > { %v2597_v23 = vadd.f32 %v2594_v9, %v2585_v54  ;;  %v857_v9 = vld [vmem:[%s8131_s9 + $0x1b8] sm:$0xff]  ;;  %v5055_v54 = vpack.c.bf16 %v859_v29, %v858_v6  ;;  %v827_v6 = vld [vmem:[%s8131_s9 + $0xc8] sm:$0xff] }
 0x7ef   : > { %v5051_v0 = vpack.c.bf16 %v857_v9, %v856_v35  ;;  %v825_v35 = vld [vmem:[%s8131_s9 + $0xb8] sm:$0xff] }
 0x7f0   : > { %2602 = vrot.lane.b32.xlu1 %v2597_v23, %s5294_s25 }
 0x84d   : > { %v2601_v47 = vpop.permute.xlu0 %2600 }
 0x84e   : > { %v6544_v53 = vmax.f32 %v2596_v36, %v2601_v47  ;;  %v855_v36 = vld [vmem:[%s8131_s9 + $0x1a8] sm:$0xff]  ;;  %v785_v47 = vld [vmem:[%s8129_s7 + $0xd8] sm:$0xff] }
 0x84f   : > { %v5047_v42 = vpack.c.bf16 %v855_v36, %v854_v63  ;;  %v823_v63 = vld [vmem:[%s8131_s9 + $0xa8] sm:$0xff]  ;;  %v5013_v36 = vpack.c.bf16 %v805_v1, %v804_v52 }
 0x850   : > { %2610 = vrot.lane.b32.xlu0 %v6544_v53, %s8174_s20  ;;  %v5015_v14 = vpack.c.bf16 %v823_v63, %v822_v58  ;;  %v797_v63 = vld [vmem:[%s8130_s8 + $0x18] sm:$0xff] }
 0x851   : > { %5048 = vmatprep.subr.bf16.mxu0 %v5047_v42  ;;  %v806_v42 = vld [vmem:[%s8131_s9 + $0x20] sm:$0xff] }
 0x852   : > { %5050 = vmatpush3.bf16.msra.mxu0 %v5049_v25  ;;  %v5017_v9 = vpack.c.bf16 %v807_v4, %v806_v42  ;;  %v5019_v25 = vpack.c.bf16 %v825_v35, %v824_v50  ;;  %v801_v35 = vld [vmem:[%s8130_s8 + $0x38] sm:$0xff] }
 0x853   : > { %5052 = vmatprep.subr.bf16.mxu0 %v5051_v0  ;;  %v808_v0 = vld [vmem:[%s8131_s9 + $0x30] sm:$0xff] }
 0x854   : > { %3592 = vperm.xlu0 %5211, %v903_v48   ;;  %v5001_v48 = vpack.c.bf16 %v780_v44, %v776_v45  ;;  %v5021_v29 = vpack.c.bf16 %v809_v5, %v808_v0  ;;  %v845_v45 = vld [vmem:[%s8131_s9 + $0x158] sm:$0xff] }
 0x856   : > { %5054 = vmatpush3.bf16.msra.mxu0 %v5053_v16  ;;  %v5023_v16 = vpack.c.bf16 %v827_v6, %v826_v27  ;;  %v867_v6 = vld [vmem:[%s8133_s11] sm:$0xff] }
 0x857   : > { %5056 = vmatprep.subr.bf16.mxu0 %v5055_v54  ;;  %v810_v54 = vld [vmem:[%s8131_s9 + $0x40] sm:$0xff] }
 0x858   : > { %3127 = vperm.xlu0 %5211, %v877_v39  }
 0x85c   : > { %3607 = vperm.xlu0 %5211, %v906_v11   ;;  %v784_v11 = vld [vmem:[%s8129_s7 + $0xd0] sm:$0xff] }
 0x860   : > { %3137 = vperm.xlu0 %5211, %v879_v46   ;;  %v788_v46 = vld [vmem:[%s8129_s7 + $0xf0] sm:$0xff] }
 0x862   : > { %v2603_v33 = vpop.permute.xlu1 %2602 }
 0x863   : > { %v6563_v24 = vmax.f32 %v2597_v23, %v2603_v33  ;;  %v842_v23 = vld [vmem:[%s8131_s9 + $0x140] sm:$0xff]  ;;  %v793_v33 = vld [vmem:[%s8129_s7 + $0x118] sm:$0x1] }
 0x864   : > { %3617 = vperm.xlu0 %5211, %v908_v49   ;;  %v5057_v8 = vpack.c.bf16 %v843_v26, %v842_v23  ;;  %v5005_v49 = vpack.c.bf16 %v788_v46, %v784_v11  ;;  %v811_v23 = vld [vmem:[%s8131_s9 + $0x48] sm:$0xff]  ;;  %v828_v26 = vld [vmem:[%s8131_s9 + $0xd0] sm:$0xff] }
 0x865   : > { %2612 = vrot.lane.b32.xlu1 %v6563_v24, %s8174_s20  ;;  %v5025_v34 = vpack.c.bf16 %v811_v23, %v810_v54  ;;  %v847_v11 = vld [vmem:[%s8131_s9 + $0x168] sm:$0xff]  ;;  %v864_v46 = vld [vmem:[%s8131_s9 + $0x1f0] sm:$0xff]  ;;  %v5304_v54 = vmov 0.0|0.0  }
 0x866   : > { %5058 = vmatpush3.bf16.msra.mxu0 %v5057_v8  ;;  %v829_v8 = vld [vmem:[%s8131_s9 + $0xd8] sm:$0xff]  ;;  %v869_v23 = vld [vmem:[%s8133_s11 + $0x10] sm:$0xff] }
 0x867   : > { %5060 = vmatprep.subr.bf16.mxu0 %v5059_v38  ;;  %v5027_v31 = vpack.c.bf16 %v829_v8, %v828_v26  ;;  %v812_v38 = vld [vmem:[%s8131_s9 + $0x50] sm:$0xff]  ;;  %v870_v26 = vld [vmem:[%s8133_s11 + $0x18] sm:$0xff] }
 0x868   : > { %3147 = vperm.xlu0 %5211, %v881_v62   ;;  %v818_v62 = vld [vmem:[%s8131_s9 + $0x80] sm:$0xff]  ;;  %v5029_v20 = vpack.c.bf16 %v813_v19, %v812_v38  ;;  %v5075_v8 = vpack.c.bf16 %v870_v26, %v869_v23  ;;  %v904_v38 = vld [vmem:[%s8138_s16 + $0x8] sm:$0xff]  ;;  %v876_v19 = vld [vmem:[%s8137_s15 + $0x10] sm:$0xff] }
 0x869   : > { %v919_v23 = vld [vmem:[%s8138_s16 + $0x80] sm:$0xff]  ;;  %v920_v26 = vld [vmem:[%s8138_s16 + $0x88] sm:$0xff] }
 0x86c   : > { %3627 = vperm.xlu0 %5211, %v910_v21   ;;  %v819_v21 = vld [vmem:[%s8131_s9 + $0x88] sm:$0xff] }
 0x870   : > { %3157 = vperm.xlu0 %5211, %v883_v43   ;;  %v792_v43 = vld [vmem:[%s8129_s7 + $0x110] sm:$0x1] }
 0x874   : > { %3637 = vperm.xlu0 %5211, %v912_v2   ;;  %v5007_v2 = vpack.c.bf16 %v819_v21, %v818_v62  ;;  %v848_v21 = vld [vmem:[%s8131_s9 + $0x170] sm:$0xff] }
 0x8c2   : > { %v2611_v28 = vpop.permute.xlu0 %2610 }
 0x8c3   : > { %v2616_v17 = vmax.f32 %v6544_v53, %v2611_v28  ;;  %v789_v53 = vld [vmem:[%s8129_s7 + $0xf8] sm:$0xff]  ;;  %v831_v28 = vld [vmem:[%s8131_s9 + $0xe8] sm:$0xff] }
 0x8c4   : > { %v5003_v39 = vpack.c.bf16 %v789_v53, %v785_v47  ;;  %v5031_v41 = vpack.c.bf16 %v831_v28, %v830_v37  ;;  %v862_v47 = vld [vmem:[%s8131_s9 + $0x1e0] sm:$0xff]  ;;  %v863_v53 = vld [vmem:[%s8131_s9 + $0x1e8] sm:$0xff] }
 0x8c5   : > { %v2618_v60 = vmax.f32 %v2616_v17, 0.0  ;;  %v814_v17 = vld [vmem:[%s8131_s9 + $0x60] sm:$0xff] }
 0x8c6   : > { %v878_v37 = vld [vmem:[%s8137_s15 + $0x20] sm:$0xff] }
 0x8c7   : > { %4707 = vmatmul.mubr.msk.f32.vlgmr.msra.gmra.mrb[58].mxu1 %vm2620_vm11, %v2618_v60  ;;  %v907_v28 = vld [vmem:[%s8138_s16 + $0x20] sm:$0xff] }
 0x8c8   : > { %4994 = vmatpush1.bf16.msra.mxu1 %v4993_v3  ;;  %2710 = vmatprep.mubr.f32.mxu1 %v8175_v15  ;;  %v815_v3 = vld [vmem:[%s8131_s9 + $0x68] sm:$0xff] }
 0x8c9   : > { %4996 = vmatprep.subr.bf16.mxu1 %v4995_v57  ;;  %v832_v57 = vld [vmem:[%s8131_s9 + $0xf0] sm:$0xff] }
 0x8ca   : > { %v5035_v61 = vpack.c.bf16 %v833_v18, %v832_v57 }
 0x8cc   : > { %4998 = vmatpush1.bf16.msra.mxu1 %v4997_v51  ;;  %v5037_v51 = vpack.c.bf16 %v817_v10, %v816_v40 }
 0x8cd   : > { %5000 = vmatprep.subr.bf16.mxu1 %v4999_v55  ;;  %v844_v55 = vld [vmem:[%s8131_s9 + $0x150] sm:$0xff] }
 0x8ce   : > { %v5061_v44 = vpack.c.bf16 %v845_v45, %v844_v55 }
 0x8d0   : > { %5002 = vmatpush1.bf16.msra.mxu1 %v5001_v48  ;;  %5062 = vmatpush3.bf16.msra.mxu0 %v5061_v44  ;;  %v846_v48 = vld [vmem:[%s8131_s9 + $0x160] sm:$0xff] }
 0x8d1   : > { %5004 = vmatprep.subr.bf16.mxu1 %v5003_v39  ;;  %v5063_v39 = vpack.c.bf16 %v863_v53, %v862_v47 }
 0x8d3   : > { %5064 = vmatprep.subr.bf16.mxu0 %v5063_v39 }
 0x8d4   : > { %5006 = vmatpush1.bf16.msra.mxu1 %v5005_v49  ;;  %v865_v49 = vld [vmem:[%s8131_s9 + $0x1f8] sm:$0xff] }
 0x8d5   : > { %4709 = vmatprep.subr.msk.mxu1 %vm2627_vm10, %v793_v33  ;;  %v5065_v33 = vpack.c.bf16 %v847_v11, %v846_v48  ;;  %v5067_v62 = vpack.c.bf16 %v865_v49, %v864_v46 }
 0x8d7   : > { %v2613_v7 = vpop.permute.xlu1 %2612  ;;  %5066 = vmatpush3.bf16.msra.mxu0 %v5065_v33 }
 0x8d8   : > { %v2617_v22 = vmax.f32 %v6563_v24, %v2613_v7  ;;  %4710 = vmatpush1.msk.msra.mxu1 %vm2627_vm10, %v792_v43  ;;  %v821_v24 = vld [vmem:[%s8131_s9 + $0x98] sm:$0xff]  ;;  %5068 = vmatprep.subr.bf16.mxu0 %v5067_v62  ;;  %v795_v7 = vld [vmem:[%s8130_s8 + $0x8] sm:$0xff] }
 0x8d9   : > { %5008 = vmatprep.subr.bf16.mxu1 %v5007_v2  ;;  %v5011_v59 = vpack.c.bf16 %v821_v24, %v820_v56  ;;  %v849_v43 = vld [vmem:[%s8131_s9 + $0x178] sm:$0xff]  ;;  %v799_v24 = vld [vmem:[%s8130_s8 + $0x28] sm:$0xff] }
 0x8da   : > { %v2619_v32 = vmax.f32 %v2617_v22, 0.0  ;;  %v5069_v2 = vpack.c.bf16 %v849_v43, %v848_v21  ;;  %v794_v22 = vld [vmem:[%s8130_s8] sm:$0xff] }
 0x8dc   : > { %4708 = vmatmul.mubr.msk.f32.gmra.mrb[60].mxu1 %vm2620_vm11, %v2619_v32  ;;  %5070 = vmatpush3.bf16.msra.mxu0 %v5069_v2 }
 0x8dd   : > { %2781 = vmatprep.mubr.f32.mxu1 %v8175_v15  ;;  %5071 = vmatprep.subr.bf16.mxu0 %v5304_v54 }
 0x8e0   : > { %4711 = vmatmul.mubr.msk.f32.vlgmr.msra.gmra.mrb[62].mxu1 %vm2620_vm11, %v2618_v60  ;;  %v5033_v60 = vpack.c.bf16 %v815_v3, %v814_v17  ;;  %v882_v17 = vld [vmem:[%s8137_s15 + $0x40] sm:$0xff] }
 0x8e1   : > { %2787 = vmatprep.mubr.f32.mxu1 %v8175_v15  ;;  %5010 = vmatpush3.bf16.msra.mxu1 %v5009_v30  ;;  %v798_v30 = vld [vmem:[%s8130_s8 + $0x20] sm:$0xff] }
 0x8e2   : > { %5012 = vmatprep.subr.bf16.mxu1 %v5011_v59  ;;  %v911_v3 = vld [vmem:[%s8138_s16 + $0x40] sm:$0xff] }
 0x8e4   : > { %4712 = vmatmul.mubr.msk.f32.gmra.mrb[64].mxu1 %vm2620_vm11, %v2619_v32 }
 0x8e5   : > { %5014 = vmatpush3.bf16.msra.mxu1 %v5013_v36  ;;  %v796_v36 = vld [vmem:[%s8130_s8 + $0x10] sm:$0xff] }
 0x8e6   : > { %5016 = vmatprep.subr.bf16.mxu1 %v5015_v14 }
 0x8e9   : > { %5018 = vmatpush3.bf16.msra.mxu1 %v5017_v9  ;;  %v800_v9 = vld [vmem:[%s8130_s8 + $0x30] sm:$0xff] }
 0x8ea   : > { %5020 = vmatprep.subr.bf16.mxu1 %v5019_v25 }
 0x8ed   : > { %5022 = vmatpush3.bf16.msra.mxu1 %v5021_v29  ;;  %v868_v29 = vld [vmem:[%s8133_s11 + $0x8] sm:$0xff] }
 0x8ee   : > { %5024 = vmatprep.subr.bf16.mxu1 %v5023_v16  ;;  %v5072_v16 = vpack.c.bf16 %v868_v29, %v867_v6  ;;  %v917_v6 = vld [vmem:[%s8138_s16 + $0x70] sm:$0xff]  ;;  %v918_v29 = vld [vmem:[%s8138_s16 + $0x78] sm:$0xff] }
 0x8f1   : > { %5026 = vmatpush3.bf16.msra.mxu1 %v5025_v34  ;;  %v874_v34 = vld [vmem:[%s8137_s15] sm:$0xff] }
 0x8f2   : > { %5028 = vmatprep.subr.bf16.mxu1 %v5027_v31  ;;  %3112 = vperm.xlu1 %5212, %v874_v34   ;;  %v875_v31 = vld [vmem:[%s8137_s15 + $0x8] sm:$0xff]  ;;  %v893_v34 = vld [vmem:[%s8137_s15 + $0x98] sm:$0xff] }
 0x8f5   : > { %5030 = vmatpush3.bf16.msra.mxu1 %v5029_v20  ;;  %v880_v20 = vld [vmem:[%s8137_s15 + $0x30] sm:$0xff] }
 0x8f6   : > { %5032 = vmatprep.subr.bf16.mxu1 %v5031_v41  ;;  %3117 = vperm.xlu1 %5212, %v875_v31   ;;  %v909_v41 = vld [vmem:[%s8138_s16 + $0x30] sm:$0xff] }
 0x8f7   : > { %v921_v31 = vld [vmem:[%s8138_s16 + $0x90] sm:$0xff] }
 0x8f9   : > { %5034 = vmatpush3.bf16.msra.mxu1 %v5033_v60 }
 0x8fa   : > { %5036 = vmatprep.subr.bf16.mxu1 %v5035_v61  ;;  %3597 = vperm.xlu1 %5212, %v904_v38   ;;  %v922_v38 = vld [vmem:[%s8138_s16 + $0x98] sm:$0xff] }
 0x8fd   : > { %5038 = vmatpush3.bf16.msra.mxu1 %v5037_v51 }
 0x8fe   : > { %3122 = vperm.xlu1 %5212, %v876_v19   ;;  %v894_v19 = vld [vmem:[%s8137_s15 + $0xa0] sm:$0xff] }
 0x99a   : > { %v2706_v32 = vpop.f32.mrb[58].mxu1 }
 0x99b   : > { %v2708_v13 = vpop.f32.mrb[59].mxu1  ;;  %v2794_v56 = vmul.f32 %v2706_v32, %v794_v22 }
 0x99c   : > { %v2795_v12 = vmul.f32 %v2708_v13, %v795_v7  ;;  %v866_v7 = vld [vmem:[%s8132_s10] sm:$0x1] }
 0x99e   : > { %2866 = vmatprep.mubr.f32.mxu1 %v2795_v12  ;;  %v5306_v12 = vmov 1  }
 0x99f   : > { %2867 = vmatmul.mubr.f32.vlgmr.msra.gmra.mrb[66].mxu1 %v2794_v56  ;;  %v871_v56 = vld [vmem:[%s8134_s12] sm:$0x1] }
 0x9af   : > { %v2712_v59 = vpop.f32.mrb[60].mxu1 }
 0x9b0   : > { %v2714_v52 = vpop.f32.mrb[61].mxu1  ;;  %v2798_v58 = vmul.f32 %v2712_v59, %v798_v30 }
 0x9b1   : > { %v2799_v1 = vmul.f32 %v2714_v52, %v799_v24  ;;  %v5307_v52 = vmov 4  }
 0x9b3   : > { %v2783_v14 = vpop.f32.mrb[62].mxu1  ;;  %2871 = vmatprep.mubr.f32.mxu1 %v2799_v1  ;;  %v5308_v1 = vmov 3  }
 0x9b4   : > { %v2785_v42 = vpop.f32.mrb[63].mxu1  ;;  %2872 = vmatmul.mubr.f32.gmra.mrb[68].mxu1 %v2798_v58  ;;  %v2796_v50 = vmul.f32 %v2783_v14, %v796_v36  ;;  %v885_v58 = vld [vmem:[%s8137_s15 + $0x58] sm:$0xff]  ;;  %v8176_v36 = vmov 0   ;;  %v884_v14 = vld [vmem:[%s8137_s15 + $0x50] sm:$0xff] }
 0x9b5   : > { %v2797_v4 = vmul.f32 %v2785_v42, %v797_v63  ;;  %v5309_v63 = vmov 2   ;;  %v5310_v42 = vmov 5  }
 0x9b7   : > { %v2789_v25 = vpop.f32.mrb[64].mxu1  ;;  %2941 = vmatprep.mubr.f32.mxu0 %v2797_v4  ;;  %v913_v4 = vld [vmem:[%s8138_s16 + $0x50] sm:$0xff] }
 0x9b8   : > { %v2791_v0 = vpop.f32.mrb[65].mxu1  ;;  %2942 = vmatmul.mubr.f32.vlgmr.msra.gmra.mrb[92].mxu0 %v2796_v50  ;;  %v2800_v27 = vmul.f32 %v2789_v25, %v800_v9  ;;  %v914_v50 = vld [vmem:[%s8138_s16 + $0x58] sm:$0xff]  ;;  %v887_v9 = vld [vmem:[%s8137_s15 + $0x68] sm:$0xff]  ;;  %v915_v25 = vld [vmem:[%s8138_s16 + $0x60] sm:$0xff] }
 0x9b9   : > { %v2801_v5 = vmul.f32 %v2791_v0, %v801_v35  ;;  %5073 = vmatpush3.bf16.msra.mxu0 %v5072_v16  ;;  %v886_v35 = vld [vmem:[%s8137_s15 + $0x60] sm:$0xff]  ;;  %v916_v0 = vld [vmem:[%s8138_s16 + $0x68] sm:$0xff] }
 0x9ba   : > { %5074 = vmatprep.subr.bf16.mxu0 %v5304_v54  ;;  %v890_v16 = vld [vmem:[%s8137_s15 + $0x80] sm:$0xff]  ;;  %v891_v54 = vld [vmem:[%s8137_s15 + $0x88] sm:$0xff] }
 0x9bb   : > { %2946 = vmatprep.mubr.f32.mxu0 %v2801_v5  ;;  %v888_v5 = vld [vmem:[%s8137_s15 + $0x70] sm:$0xff] }
 0x9bc   : > { %2947 = vmatmul.mubr.f32.gmra.mrb[94].mxu0 %v2800_v27  ;;  %v889_v27 = vld [vmem:[%s8137_s15 + $0x78] sm:$0xff] }
 0x9bd   : > { %5076 = vmatpush3.bf16.msra.mxu0 %v5075_v8  ;;  %4844 = vmatprep.mubr.msk.f32.mxu0 %vm5305_vm12, %v8175_v15  ;;  %v905_v15 = vld [vmem:[%s8138_s16 + $0x10] sm:$0xff] }
 0x9be   : > { %3602 = vperm.xlu1 %5212, %v905_v15   ;;  %v892_v8 = vld [vmem:[%s8137_s15 + $0x90] sm:$0xff]  ;;  %v895_v15 = vld [vmem:[%s8137_s15 + $0xa8] sm:$0xff] }
 0x9c2   : > { %3132 = vperm.xlu1 %5212, %v878_v37   ;;  %v923_v37 = vld [vmem:[%s8138_s16 + $0xa0] sm:$0xff] }
 0x9c6   : > { %3612 = vperm.xlu1 %5212, %v907_v28   ;;  %v924_v28 = vld [vmem:[%s8138_s16 + $0xa8] sm:$0xff] }
 0x9ca   : > { %3142 = vperm.xlu1 %5212, %v880_v20   ;;  %v896_v20 = vld [vmem:[%s8137_s15 + $0xb0] sm:$0xff] }
 0x9ce   : > { %3622 = vperm.xlu1 %5212, %v909_v41   ;;  %v897_v41 = vld [vmem:[%s8137_s15 + $0xb8] sm:$0xff] }
 0x9d2   : > { %3152 = vperm.xlu1 %5212, %v882_v17   ;;  %v6991_v17 = vpop.permute.xlu1 %3112 }
 0x9d6   : > { %3632 = vperm.xlu1 %5212, %v911_v3   ;;  %v925_v3 = vld [vmem:[%s8138_s16 + $0xb0] sm:$0xff] }
 0x9da   : > { %5213 = vset.pattern.permute.xlu1 %v5306_v12 }
 0xa72   : > { %v4787_v60 = vpop.f32.mrb[66].mxu1 }
 0xa73   : > { %v4788_v57 = vpop.f32.mrb[67].mxu1 }
 0xa74   : > { %v4789_v18 = vadd.f32 %v4788_v57, %v4787_v60  ;;  %v926_v60 = vld [vmem:[%s8138_s16 + $0xb8] sm:$0xff]  ;;  %v898_v57 = vld [vmem:[%s8137_s15 + $0xc0] sm:$0xff] }
 0xa87   : > { %v4790_v61 = vpop.f32.mrb[68].mxu1 }
 0xa88   : > { %v4791_v40 = vpop.f32.mrb[69].mxu1 }
 0xa89   : > { %v4792_v10 = vadd.f32 %v4791_v40, %v4790_v61  ;;  %v899_v61 = vld [vmem:[%s8137_s15 + $0xc8] sm:$0xff]  ;;  %v927_v40 = vld [vmem:[%s8138_s16 + $0xc0] sm:$0xff] }
 0xa8b   : > { %v4825_v51 = vpop.f32.mrb[92].mxu0 }
 0xa8c   : > { %v4826_v55 = vpop.f32.mrb[93].mxu0 }
 0xa8d   : > { %v4827_v45 = vadd.f32 %v4826_v55, %v4825_v51  ;;  %v7013_v51 = vpop.permute.xlu0 %3592 }
 0xa8f   : > { %v2944_v44 = vadd.f32 %v4827_v45, %v4789_v18  ;;  %v4828_v47 = vpop.f32.mrb[94].mxu0  ;;  %v7002_v18 = vpop.permute.xlu1 %3117  ;;  %v900_v45 = vld [vmem:[%s8137_s15 + $0xd0] sm:$0xff] }
 0xa90   : > { %v4829_v53 = vpop.f32.mrb[95].mxu0 }
 0xa91   : > { %v4830_v48 = vadd.f32 %v4829_v53, %v4828_v47  ;;  %v2953_v11 = vsel %vm2952_vm13, %v2944_v44, 0.0  ;;  %v901_v44 = vld [vmem:[%s8137_s15 + $0xd8] sm:$0xff]  ;;  %v929_v47 = vld [vmem:[%s8138_s16 + $0xd0] sm:$0xff]  ;;  %v7026_v53 = vpop.permute.xlu0 %3127 }
 0xa93   : > { %v2949_v39 = vadd.f32 %v4830_v48, %v4792_v10  ;;  %v928_v10 = vld [vmem:[%s8138_s16 + $0xc8] sm:$0xff]  ;;  %v7015_v55 = vpop.permute.xlu1 %3597 }
 0xa95   : > { %v2954_v46 = vsel %vm2952_vm13, %v2949_v39, 0.0  ;;  %v930_v39 = vld [vmem:[%s8138_s16 + $0xd8] sm:$0xff] }
 0xa96   : > { %v2955_v49 = vadd.f32 %v2954_v46, %v2953_v11  ;;  %v902_v11 = vld [vmem:[%s8137_s15 + $0xe0] sm:$0x1] }
 0xa97   : > { %v7028_v48 = vpop.permute.xlu1 %3122  ;;  %v931_v46 = vld [vmem:[%s8138_s16 + $0xe0] sm:$0x1] }
 0xa98   : > { %v2956_v33 = vrot.slane %v2955_v49, 4 }
 0xa9a   : > { %v2957_v62 = vadd.f32 %v2956_v33, %v2955_v49  ;;  %v7039_v49 = vpop.permute.xlu0 %3607 }
 0xa9b   : > { %v7041_v33 = vpop.permute.xlu1 %3602 }
 0xa9c   : > { %v2958_v21 = vrot.slane %v2957_v62, 2 }
 0xa9e   : > { %v2959_v43 = vadd.f32 %v2958_v21, %v2957_v62  ;;  %v7043_v62 = vpop.permute.xlu0 %3137 }
 0xa9f   : > { %v7045_v21 = vpop.permute.xlu1 %3132 }
 0xaa0   : > { %v2960_v2 = vrot.slane %v2959_v43, 1 }
 0xaa2   : > { %v2961_v22 = vadd.f32 %v2960_v2, %v2959_v43  ;;  %v7047_v43 = vpop.permute.xlu0 %3617 }
 0xaa3   : > { %v7049_v2 = vpop.permute.xlu1 %3612 }
 0xaa4   : > { %v2962_v32 = vadd.f32 %v2961_v22, %v866_v7 }
 0xaa6   : > { %v2963_v13 = vmax.f32 %v2962_v32, 0.0  ;;  %v7051_v7 = vpop.permute.xlu0 %3147 }
 0xaa7   : > { %v7053_v22 = vpop.permute.xlu1 %3142 }
 0xaa8   : > { %4845 = vmatmul.mubr.msk.f32.vlgmr.msra.gmra.mrb[96].mxu0 %vm2952_vm13, %v2963_v13 }
 0xaaa   : > { %v7055_v32 = vpop.permute.xlu0 %3627 }
 0xaab   : > { %v7057_v13 = vpop.permute.xlu1 %3622 }
 0xaae   : > { %v7059_v12 = vpop.permute.xlu0 %3157 }
 0xb7b   : > { %v3033_v24 = vpop.f32.mrb[96].mxu0 }
 0xb7c   : > { %v3034_v30 = vadd.f32 %v3033_v24, %v871_v56  ;;  %v4846_v59 = vpop.f32.mrb[97].mxu0  ;;  %v7061_v56 = vpop.permute.xlu1 %3152  ;;  %v3043_v24 = vlaneseq }
 0xb7d   : > { %v7063_v59 = vpop.permute.xlu0 %3637 }
 0xb7e   : > { %3038 = vst.msk [vmem:[%s604_s19] sm:$0x1] %vm3037_vm14, %v3034_v30  ;;  %3050 = vperm.xlu1 %5213, %v3034_v30   ;;  %3041 = vperm.xlu0 %5211, %v3034_v30  }
 0xb82   : > { %5215 = vset.pattern.permute.xlu1 %v5307_v52  ;;  %5214 = vset.pattern.permute.xlu0 %v5308_v1  ;;  %v7065_v52 = vpop.permute.xlu1 %3632 }
 0xb83   : > { %3078 = vperm.xlu1 %5215, %v3034_v30   ;;  %3069 = vperm.xlu0 %5214, %v3034_v30  }
 0xb87   : > { %5216 = vset.pattern.permute.xlu1 %v5309_v63  ;;  %5218 = vset.pattern.permute.xlu0 %v8176_v36 }
 0xb88   : > { %3060 = vperm.xlu1 %5216, %v3034_v30   ;;  %3167 = vperm.xlu0 %5218, %v885_v58  }
 0xb8c   : > { %5217 = vset.pattern.permute.xlu1 %v8176_v36  ;;  %5219 = vset.pattern.permute.xlu0 %v5310_v42  ;;  %v873_v42 = vld [vmem:[%s8136_s14] sm:$0x3] }
 0xb8d   : > { %3162 = vperm.xlu1 %5217, %v884_v14   ;;  %3088 = vperm.xlu0 %5219, %v3034_v30   ;;  %v3044_v30 = vshrl.u32 %v3043_v24, 7 }
 0xb8f   : > { %v7067_v1 = vsub.s32 0, %v3044_v30 }
 0xb91   : > { %3642 = vperm.xlu1 %5217, %v913_v4   ;;  %5220 = vset.pattern.permute.xlu0 %v8176_v36  ;;  %v872_v4 = vld [vmem:[%s8135_s13] sm:$0x3] }
 0xb92   : > { %3647 = vperm.xlu0 %5220, %v914_v50  }
 0xb95   : > { %3172 = vperm.xlu1 %5217, %v886_v35  }
 0xb96   : > { %3177 = vperm.xlu0 %5220, %v887_v9  }
 0xb99   : > { %3652 = vperm.xlu1 %5217, %v915_v25  }
 0xb9a   : > { %3657 = vperm.xlu0 %5220, %v916_v0  }
 0xb9d   : > { %3182 = vperm.xlu1 %5217, %v888_v5  }
 0xb9e   : > { %3187 = vperm.xlu0 %5220, %v889_v27  }
 0xba1   : > { %3662 = vperm.xlu1 %5217, %v917_v6  }
 0xba2   : > { %3667 = vperm.xlu0 %5220, %v918_v29  }
 0xba5   : > { %3192 = vperm.xlu1 %5217, %v890_v16  }
 0xba6   : > { %3197 = vperm.xlu0 %5220, %v891_v54  }
 0xba9   : > { %3672 = vperm.xlu1 %5217, %v919_v23  }
 0xbaa   : > { %3677 = vperm.xlu0 %5220, %v920_v26  }
 0xbad   : > { %3202 = vperm.xlu1 %5217, %v892_v8  }
 0xbae   : > { %3207 = vperm.xlu0 %5220, %v893_v34  }
 0xbb1   : > { %3682 = vperm.xlu1 %5217, %v921_v31  }
 0xbb2   : > { %3687 = vperm.xlu0 %5220, %v922_v38  }
 0xbb5   : > { %3212 = vperm.xlu1 %5217, %v894_v19  }
 0xbb6   : > { %3217 = vperm.xlu0 %5220, %v895_v15  }
 0xbb9   : > { %3692 = vperm.xlu1 %5217, %v923_v37  }
 0xbba   : > { %3697 = vperm.xlu0 %5220, %v924_v28  }
 0xbbd   : > { %3222 = vperm.xlu1 %5217, %v896_v20  }
 0xbbe   : > { %3227 = vperm.xlu0 %5220, %v897_v41  }
 0xbc1   : > { %3702 = vperm.xlu1 %5217, %v925_v3   ;;  %v3262_v3 = vsub.s32 1, %v3044_v30 }
 0xbc2   : > { %3707 = vperm.xlu0 %5220, %v926_v60  }
 0xbc5   : > { %3232 = vperm.xlu1 %5217, %v898_v57  }
 0xbc6   : > { %3237 = vperm.xlu0 %5220, %v899_v61  }
 0xbc9   : > { %3712 = vperm.xlu1 %5217, %v927_v40  }
 0xbca   : > { %3717 = vperm.xlu0 %5220, %v928_v10  }
 0xbcd   : > { %3242 = vperm.xlu1 %5217, %v900_v45  }
 0xbce   : > { %3247 = vperm.xlu0 %5220, %v901_v44  }
 0xbd1   : > { %3722 = vperm.xlu1 %5217, %v929_v47  }
 0xbd2   : > { %3727 = vperm.xlu0 %5220, %v930_v39  }
 0xbd5   : > { %3252 = vperm.xlu1 %5217, %v902_v11  }
 0xbd6   : > { %3732 = vperm.xlu0 %5220, %v931_v46  }
 0xbfd   : > { %v3051_v58 = vpop.permute.xlu1 %3050  ;;  %v3042_v63 = vpop.permute.xlu0 %3041 }
 0xbfe   : > { %v3055_v36 = vrot.slane %v3051_v58, %v7067_v1  ;;  %v3046_v14 = vrot.slane %v3042_v63, %v7067_v1 }
 0xc00   : > { %v3057_v9 = vmul.f32 %v3055_v36, %v873_v42  ;;  %v3048_v25 = vmul.f32 %v3046_v14, %v872_v4 }
 0xc02   : > { %v3079_v50 = vpop.permute.xlu1 %3078  ;;  %v3070_v35 = vpop.permute.xlu0 %3069  ;;  %v3058_v29 = vadd.f32 %v3057_v9, %v3048_v25 }
 0xc03   : > { %v3083_v0 = vrot.slane %v3079_v50, %v7067_v1  ;;  %v3074_v5 = vrot.slane %v3070_v35, %v7067_v1 }
 0xc05   : > { %v3085_v54 = vmul.f32 %v3083_v0, %v873_v42  ;;  %v3076_v23 = vmul.f32 %v3074_v5, %v872_v4 }
 0xc07   : > { %v3061_v27 = vpop.permute.xlu1 %3060  ;;  %v3168_v6 = vpop.permute.xlu0 %3167  ;;  %v3086_v31 = vadd.f32 %v3085_v54, %v3076_v23 }
 0xc08   : > { %v3065_v16 = vrot.slane %v3061_v27, %v7067_v1 }
 0xc0a   : > { %v3067_v26 = vadd.f32 %v3065_v16, %v3058_v29 }
 0xc0c   : > { %v3096_v8 = vadd.f32 1.0, %v3067_v26  ;;  %v3089_v34 = vpop.permute.xlu0 %3088  ;;  %v3163_v28 = vpop.permute.xlu1 %3162 }
 0xc0d   : > { %v3093_v38 = vrot.slane %v3089_v34, %v7067_v1 }
 0xc0e   : > { %v3097_v19 = vmul.f32 15.0, %v3096_v8 }
 0xc0f   : > { %v3095_v15 = vadd.f32 %v3093_v38, %v3086_v31 }
 0xc10   : > { %v4714_v37 = vadd.f32 -1.0, %v3097_v19  ;;  %v3643_v47 = vpop.permute.xlu1 %3642 }
 0xc11   : > { %v3100_v20 = vadd.f32 1.0, %v3095_v15  ;;  %v3648_v14 = vpop.permute.xlu0 %3647 }
 0xc12   : > { %v3099_v41 = vmul.f32 0.5, %v4714_v37 }
 0xc13   : > { %v3101_v60 = vmul.f32 15.0, %v3100_v20 }
 0xc14   : > { %v3104_v57 = vfloor.f32 %v3099_v41  ;;  %v3173_v9 = vpop.permute.xlu1 %3172 }
 0xc15   : > { %v4715_v61 = vadd.f32 -1.0, %v3101_v60  ;;  %v3178_v31 = vpop.permute.xlu0 %3177 }
 0xc16   : > { %v3106_v40 = vsub.f32 %v3099_v41, %v3104_v57  ;;  %v3393_v10 = vadd.f32 1.0, %v3104_v57  ;;  %v7082_v45 = vrot.slane %v3104_v57, %v7067_v1  ;;  %v7084_v44 = vrot.slane %v3104_v57, %v3262_v3 }
 0xc17   : > { %v3103_v58 = vmul.f32 0.5, %v4715_v61 }
 0xc18   : > { %v3107_v39 = vsub.f32 1.0, %v3106_v40  ;;  %v7087_v11 = vrot.slane %v3393_v10, %v7067_v1  ;;  %v7089_v46 = vrot.slane %v3393_v10, %v3262_v3  ;;  %v7092_v24 = vrot.slane %v3106_v40, %v7067_v1  ;;  %v3653_v60 = vpop.permute.xlu1 %3652 }
 0xc19   : > { %v7094_v30 = vrot.slane %v3106_v40, %v3262_v3  ;;  %vm3288_vm1 = vcmp.eq.f32.partialorder %v3168_v6, %v7082_v45  ;;  %vm3289_vm3 = vcmp.eq.f32.partialorder %v3168_v6, %v7084_v44  ;;  %vm3286_vm4 = vcmp.eq.f32.partialorder %v3163_v28, %v7082_v45 }
 0xc1a   : > { %v7097_v63 = vrot.slane %v3107_v39, %v7067_v1  ;;  %v7099_v36 = vrot.slane %v3107_v39, %v3262_v3  ;;  %vm3427_vm15 = vcmp.eq.f32.partialorder %v3168_v6, %v7087_v11  ;;  %vm3428_vm0 = vcmp.eq.f32.partialorder %v3168_v6, %v7089_v46  ;;  %v3658_v39 = vpop.permute.xlu0 %3657 }
 0xc1b   : > { %vm3425_vm2 = vcmp.eq.f32.partialorder %v3163_v28, %v7087_v11  ;;  %v3496_v4 = vsel %vm3427_vm15, %v7092_v24, 0.0  ;;  %v3497_v35 = vsel %vm3428_vm0, %v7094_v30, 0.0  ;;  %vm3426_vm5 = vcmp.eq.f32.partialorder %v3163_v28, %v7089_v46 }
 0xc1c   : > { %v3357_v42 = vsel %vm3288_vm1, %v7097_v63, 0.0  ;;  %v3358_v50 = vsel %vm3289_vm3, %v7099_v36, 0.0  ;;  %vm3287_vm6 = vcmp.eq.f32.partialorder %v3163_v28, %v7084_v44  ;;  %v3355_v25 = vsel %vm3286_vm4, %v7097_v63, 0.0 }
 0xc1d   : > { %v3494_v0 = vsel %vm3425_vm2, %v7092_v24, 0.0  ;;  %v3105_v5 = vfloor.f32 %v3103_v58  ;;  %v7115_v27 = vadd.f32 %v3496_v4, %v3357_v42  ;;  %v3356_v6 = vsel %vm3287_vm6, %v7099_v36, 0.0 }
 0xc1e   : > { %v7118_v29 = vadd.f32 %v3497_v35, %v3358_v50  ;;  %v3495_v16 = vsel %vm3426_vm5, %v7094_v30, 0.0  ;;  %v7121_v26 = vadd.f32 %v3494_v0, %v3355_v25  ;;  %vm3290_vm7 = vcmp.eq.f32.partialorder %v3173_v9, %v7082_v45  ;;  %v3183_v0 = vpop.permute.xlu1 %3182 }
 0xc1f   : > { %8177 = vst [vmem:[#allocation2_spill] sm:$0xff] %v7115_v27  ;;  %v3108_v54 = vsub.f32 %v3103_v58, %v3105_v5  ;;  %v3873_v23 = vadd.f32 1.0, %v3105_v5  ;;  %v7124_v8 = vrot.slane %v3105_v5, %v7067_v1  ;;  %v7126_v34 = vrot.slane %v3105_v5, %v3262_v3 }
 0xc20   : > { %8178 = vst [vmem:[#allocation3_spill] sm:$0xff] %v7121_v26  ;;  %v7137_v28 = vadd.f32 %v3495_v16, %v3356_v6  ;;  %vm3291_vm8 = vcmp.eq.f32.partialorder %v3173_v9, %v7084_v44  ;;  %v3359_v41 = vsel %vm3290_vm7, %v7097_v63, 0.0  ;;  %vm3429_vm15 = vcmp.eq.f32.partialorder %v3173_v9, %v7087_v11 }
 0xc21   : > { %v3109_v38 = vsub.f32 1.0, %v3108_v54  ;;  %v7130_v19 = vrot.slane %v3873_v23, %v7067_v1  ;;  %v7132_v15 = vrot.slane %v3873_v23, %v3262_v3  ;;  %v7135_v37 = vrot.slane %v3108_v54, %v7067_v1 }
 0xc22   : > { %v7139_v20 = vrot.slane %v3108_v54, %v3262_v3  ;;  %vm3766_vm12 = vcmp.eq.f32.partialorder %v3643_v47, %v7124_v8  ;;  %vm3767_vm13 = vcmp.eq.f32.partialorder %v3643_v47, %v7126_v34  ;;  %vm3768_vm0 = vcmp.eq.f32.partialorder %v3648_v14, %v7124_v8 }
 0xc23   : > { %v7144_v57 = vrot.slane %v3109_v38, %v7067_v1  ;;  %v7146_v61 = vrot.slane %v3109_v38, %v3262_v3  ;;  %vm3905_vm9 = vcmp.eq.f32.partialorder %v3643_v47, %v7130_v19  ;;  %vm3906_vm11 = vcmp.eq.f32.partialorder %v3643_v47, %v7132_v15 }
 0xc24   : > { %vm3907_vm14 = vcmp.eq.f32.partialorder %v3648_v14, %v7130_v19  ;;  %v3974_v1 = vsel %vm3905_vm9, %v7135_v37, 0.0  ;;  %v3975_v3 = vsel %vm3906_vm11, %v7139_v20, 0.0  ;;  %vm3908_vm1 = vcmp.eq.f32.partialorder %v3648_v14, %v7132_v15 }
 0xc25   : > { %v3835_v40 = vsel %vm3766_vm12, %v7144_v57, 0.0  ;;  %v3836_v10 = vsel %vm3767_vm13, %v7146_v61, 0.0  ;;  %v3360_v47 = vsel %vm3291_vm8, %v7099_v36, 0.0  ;;  %vm3430_vm2 = vcmp.eq.f32.partialorder %v3173_v9, %v7089_v46 }
 0xc26   : > { %vm3769_vm3 = vcmp.eq.f32.partialorder %v3648_v14, %v7126_v34  ;;  %v3837_v58 = vsel %vm3768_vm0, %v7144_v57, 0.0  ;;  %v3976_v42 = vsel %vm3907_vm14, %v7135_v37, 0.0  ;;  %v3498_v4 = vsel %vm3429_vm15, %v7092_v24, 0.0 }
 0xc27   : > { %v7168_v50 = vadd.f32 %v3974_v1, %v3835_v40  ;;  %v7170_v35 = vadd.f32 %v3975_v3, %v3836_v10  ;;  %v3838_v25 = vsel %vm3769_vm3, %v7146_v61, 0.0  ;;  %vm3292_vm4 = vcmp.eq.f32.partialorder %v3178_v31, %v7082_v45 }
 0xc28   : > { %v3977_v9 = vsel %vm3908_vm1, %v7139_v20, 0.0  ;;  %v3499_v5 = vsel %vm3430_vm2, %v7094_v30, 0.0  ;;  %vm3431_vm5 = vcmp.eq.f32.partialorder %v3178_v31, %v7087_v11  ;;  %vm3432_vm6 = vcmp.eq.f32.partialorder %v3178_v31, %v7089_v46 }
 0xc29   : > { %8179 = vst [vmem:[#allocation4_spill] sm:$0xff] %v7168_v50  ;;  %v7178_v14 = vadd.f32 %v3976_v42, %v3837_v58  ;;  %vm3293_vm7 = vcmp.eq.f32.partialorder %v3178_v31, %v7084_v44  ;;  %v3361_v6 = vsel %vm3292_vm4, %v7097_v63, 0.0  ;;  %v3500_v16 = vsel %vm3431_vm5, %v7092_v24, 0.0  ;;  %v3188_v31 = vpop.permute.xlu0 %3187 }
 0xc2a   : > { %v7183_v54 = vadd.f32 %v3498_v4, %v3359_v41  ;;  %v3362_v23 = vsel %vm3293_vm7, %v7099_v36, 0.0  ;;  %v3501_v38 = vsel %vm3432_vm6, %v7094_v30, 0.0  ;;  %vm3909_vm8 = vcmp.eq.f32.partialorder %v3653_v60, %v7130_v19 }
 0xc2b   : > { %8180 = vst [vmem:[#allocation5_spill] sm:$0xff] %v7178_v14  ;;  %v7188_v40 = vadd.f32 %v3977_v9, %v3838_v25  ;;  %v7190_v10 = vadd.f32 %v3499_v5, %v3360_v47  ;;  %vm3770_vm9 = vcmp.eq.f32.partialorder %v3653_v60, %v7124_v8  ;;  %vm3771_vm11 = vcmp.eq.f32.partialorder %v3653_v60, %v7126_v34  ;;  %v3663_v47 = vpop.permute.xlu1 %3662 }
 0xc2c   : > { %8181 = vst [vmem:[#allocation6_spill] sm:$0xff] %v7183_v54  ;;  %v7194_v1 = vadd.f32 %v3500_v16, %v3361_v6  ;;  %v3839_v41 = vsel %vm3770_vm9, %v7144_v57, 0.0  ;;  %vm3910_vm12 = vcmp.eq.f32.partialorder %v3653_v60, %v7132_v15  ;;  %v3978_v3 = vsel %vm3909_vm8, %v7135_v37, 0.0 }
 0xc2d   : > { %8182 = vst [vmem:[#allocation7_spill] sm:$0xff] %v7188_v40  ;;  %8183 = vst [vmem:[#allocation8_spill] sm:$0xff] %v7190_v10  ;;  %v7199_v58 = vadd.f32 %v3501_v38, %v3362_v23  ;;  %v3840_v42 = vsel %vm3771_vm11, %v7146_v61, 0.0  ;;  %vm3772_vm13 = vcmp.eq.f32.partialorder %v3658_v39, %v7124_v8  ;;  %vm3911_vm14 = vcmp.eq.f32.partialorder %v3658_v39, %v7130_v19  ;;  %v3668_v23 = vpop.permute.xlu0 %3667 }
 0xc2e   : > { %8184 = vst [vmem:[#allocation9_spill] sm:$0xff] %v7194_v1  ;;  %vm3773_vm15 = vcmp.eq.f32.partialorder %v3658_v39, %v7126_v34  ;;  %vm3912_vm0 = vcmp.eq.f32.partialorder %v3658_v39, %v7132_v15  ;;  %vm3294_vm1 = vcmp.eq.f32.partialorder %v3183_v0, %v7082_v45  ;;  %vm3295_vm2 = vcmp.eq.f32.partialorder %v3183_v0, %v7084_v44 }
 0xc2f   : > { %8185 = vst [vmem:[#allocation10_spill] sm:$0xff] %v7199_v58  ;;  %v3979_v60 = vsel %vm3910_vm12, %v7139_v20, 0.0  ;;  %v7209_v4 = vadd.f32 %v3978_v3, %v3839_v41  ;;  %v3841_v25 = vsel %vm3772_vm13, %v7144_v57, 0.0  ;;  %vm3433_vm3 = vcmp.eq.f32.partialorder %v3183_v0, %v7087_v11 }
 0xc30   : > { %v3842_v9 = vsel %vm3773_vm15, %v7146_v61, 0.0  ;;  %v3980_v5 = vsel %vm3911_vm14, %v7135_v37, 0.0  ;;  %vm3434_vm4 = vcmp.eq.f32.partialorder %v3183_v0, %v7089_v46  ;;  %vm3296_vm5 = vcmp.eq.f32.partialorder %v3188_v31, %v7082_v45 }
 0xc31   : > { %8186 = vst [vmem:[#allocation11_spill] sm:$0xff] %v7209_v4  ;;  %v3981_v39 = vsel %vm3912_vm0, %v7139_v20, 0.0  ;;  %v3363_v6 = vsel %vm3294_vm1, %v7097_v63, 0.0  ;;  %v3364_v16 = vsel %vm3295_vm2, %v7099_v36, 0.0  ;;  %vm3297_vm6 = vcmp.eq.f32.partialorder %v3188_v31, %v7084_v44  ;;  %v3193_v4 = vpop.permute.xlu1 %3192 }
 0xc32   : > { %v3502_v38 = vsel %vm3433_vm3, %v7092_v24, 0.0  ;;  %v3503_v41 = vsel %vm3434_vm4, %v7094_v30, 0.0  ;;  %vm3435_vm7 = vcmp.eq.f32.partialorder %v3188_v31, %v7087_v11  ;;  %vm3436_vm8 = vcmp.eq.f32.partialorder %v3188_v31, %v7089_v46 }
 0xc33   : > { %v7225_v0 = vadd.f32 %v3979_v60, %v3840_v42  ;;  %v7227_v3 = vadd.f32 %v3980_v5, %v3841_v25  ;;  %v3365_v1 = vsel %vm3296_vm5, %v7097_v63, 0.0  ;;  %vm3774_vm9 = vcmp.eq.f32.partialorder %v3663_v47, %v7124_v8 }
 0xc34   : > { %v3366_v54 = vsel %vm3297_vm6, %v7099_v36, 0.0  ;;  %v3504_v58 = vsel %vm3435_vm7, %v7092_v24, 0.0  ;;  %v3505_v10 = vsel %vm3436_vm8, %v7094_v30, 0.0  ;;  %vm3775_vm11 = vcmp.eq.f32.partialorder %v3663_v47, %v7126_v34 }
 0xc35   : > { %8187 = vst [vmem:[#allocation12_spill] sm:$0xff] %v7225_v0  ;;  %8188 = vst [vmem:[#allocation13_spill] sm:$0xff] %v7227_v3  ;;  %v7235_v14 = vadd.f32 %v3981_v39, %v3842_v9  ;;  %v7237_v31 = vadd.f32 %v3502_v38, %v3363_v6  ;;  %v7239_v42 = vadd.f32 %v3503_v41, %v3364_v16  ;;  %v3843_v60 = vsel %vm3774_vm9, %v7144_v57, 0.0  ;;  %v3198_v39 = vpop.permute.xlu0 %3197 }
 0xc36   : > { %vm3913_vm12 = vcmp.eq.f32.partialorder %v3663_v47, %v7130_v19  ;;  %vm3914_vm13 = vcmp.eq.f32.partialorder %v3663_v47, %v7132_v15  ;;  %vm3776_vm14 = vcmp.eq.f32.partialorder %v3668_v23, %v7124_v8  ;;  %vm3777_vm15 = vcmp.eq.f32.partialorder %v3668_v23, %v7126_v34 }
 0xc37   : > { %8189 = vst [vmem:[#allocation14_spill] sm:$0xff] %v7235_v14  ;;  %8190 = vst [vmem:[#allocation15_spill] sm:$0xff] %v7237_v31  ;;  %v7246_v25 = vadd.f32 %v3504_v58, %v3365_v1  ;;  %v7248_v5 = vadd.f32 %v3505_v10, %v3366_v54  ;;  %v3844_v9 = vsel %vm3775_vm11, %v7146_v61, 0.0  ;;  %vm3915_vm0 = vcmp.eq.f32.partialorder %v3668_v23, %v7130_v19  ;;  %v7260_v10 = vpop.permute.xlu1 %3672 }
 0xc38   : > { %8191 = vst [vmem:[#allocation16_spill] sm:$0xff] %v7239_v42  ;;  %v3982_v6 = vsel %vm3913_vm12, %v7135_v37, 0.0  ;;  %vm3916_vm1 = vcmp.eq.f32.partialorder %v3668_v23, %v7132_v15  ;;  %vm3298_vm2 = vcmp.eq.f32.partialorder %v3193_v4, %v7082_v45  ;;  %vm3299_vm3 = vcmp.eq.f32.partialorder %v3193_v4, %v7084_v44 }
 0xc39   : > { %8192 = vst [vmem:[#allocation17_spill] sm:$0xff] %v7246_v25  ;;  %8193 = vst [vmem:[#allocation18_spill] sm:$0xff] %v7248_v5  ;;  %v3983_v47 = vsel %vm3914_vm13, %v7139_v20, 0.0  ;;  %v3845_v1 = vsel %vm3776_vm14, %v7144_v57, 0.0  ;;  %v3846_v54 = vsel %vm3777_vm15, %v7146_v61, 0.0  ;;  %vm3437_vm4 = vcmp.eq.f32.partialorder %v3193_v4, %v7087_v11 }
 0xc3a   : > { %v3984_v58 = vsel %vm3915_vm0, %v7135_v37, 0.0  ;;  %vm3438_vm5 = vcmp.eq.f32.partialorder %v3193_v4, %v7089_v46  ;;  %vm3300_vm6 = vcmp.eq.f32.partialorder %v3198_v39, %v7082_v45  ;;  %vm3301_vm7 = vcmp.eq.f32.partialorder %v3198_v39, %v7084_v44 }
 0xc3b   : > { %v3985_v16 = vsel %vm3916_vm1, %v7139_v20, 0.0  ;;  %v3367_v23 = vsel %vm3298_vm2, %v7097_v63, 0.0  ;;  %v3368_v38 = vsel %vm3299_vm3, %v7099_v36, 0.0  ;;  %v3506_v41 = vsel %vm3437_vm4, %v7092_v24, 0.0 }
 0xc3c   : > { %v3507_v25 = vsel %vm3438_vm5, %v7094_v30, 0.0  ;;  %vm3439_vm8 = vcmp.eq.f32.partialorder %v3198_v39, %v7087_v11  ;;  %vm3440_vm9 = vcmp.eq.f32.partialorder %v3198_v39, %v7089_v46  ;;  %vm3778_vm11 = vcmp.eq.f32.partialorder %v7260_v10, %v7124_v8 }
 0xc3d   : > { %v3369_v4 = vsel %vm3300_vm6, %v7097_v63, 0.0  ;;  %v3370_v31 = vsel %vm3301_vm7, %v7099_v36, 0.0  ;;  %v3508_v5 = vsel %vm3439_vm8, %v7092_v24, 0.0  ;;  %v3509_v42 = vsel %vm3440_vm9, %v7094_v30, 0.0 }
 0xc3e   : > { %v7279_v3 = vadd.f32 %v3982_v6, %v3843_v60  ;;  %v7281_v14 = vadd.f32 %v3983_v47, %v3844_v9  ;;  %v7283_v0 = vadd.f32 %v3984_v58, %v3845_v1  ;;  %v7285_v27 = vadd.f32 %v3985_v16, %v3846_v54 }
 0xc3f   : > { %v7287_v39 = vadd.f32 %v3506_v41, %v3367_v23  ;;  %v7289_v50 = vadd.f32 %v3507_v25, %v3368_v38  ;;  %v7292_v26 = vsel %vm3778_vm11, %v7144_v57, 0.0  ;;  %vm3267_vm12 = vcmp.eq.f32.partialorder %v6991_v17, %v7084_v44  ;;  %v3678_v41 = vpop.permute.xlu0 %3677 }
 0xc40   : > { %8194 = vst [vmem:[#allocation19_spill] sm:$0xff] %v7279_v3  ;;  %8195 = vst [vmem:[#allocation20_spill] sm:$0xff] %v7283_v0  ;;  %v7296_v40 = vadd.f32 %v3508_v5, %v3369_v4  ;;  %v7298_v60 = vadd.f32 %v3509_v42, %v3370_v31  ;;  %vm3269_vm13 = vcmp.eq.f32.partialorder %v7002_v18, %v7084_v44  ;;  %v3336_v9 = vsel %vm3267_vm12, %v7099_v36, 0.0 }
 0xc41   : > { %8196 = vst [vmem:[#allocation21_spill] sm:$0xff] %v7285_v27  ;;  %8197 = vst [vmem:[#allocation22_spill] sm:$0xff] %v7287_v39  ;;  %vm3779_vm14 = vcmp.eq.f32.partialorder %v7260_v10, %v7126_v34  ;;  %v3338_v25 = vsel %vm3269_vm13, %v7099_v36, 0.0  ;;  %vm3406_vm15 = vcmp.eq.f32.partialorder %v6991_v17, %v7089_v46  ;;  %vm3408_vm0 = vcmp.eq.f32.partialorder %v7002_v18, %v7089_v46 }
 0xc42   : > { %8198 = vst [vmem:[#allocation23_spill] sm:$0xff] %v7289_v50  ;;  %8199 = vst [vmem:[#allocation24_spill] sm:$0xff] %v7296_v40  ;;  %vm3747_vm1 = vcmp.eq.f32.partialorder %v7013_v51, %v7126_v34  ;;  %v3475_v31 = vsel %vm3406_vm15, %v7094_v30, 0.0  ;;  %v3477_v42 = vsel %vm3408_vm0, %v7094_v30, 0.0  ;;  %vm3749_vm2 = vcmp.eq.f32.partialorder %v7015_v55, %v7126_v34 }
 0xc43   : > { %8200 = vst [vmem:[#allocation25_spill] sm:$0xff] %v7298_v60  ;;  %v3816_v5 = vsel %vm3747_vm1, %v7146_v61, 0.0  ;;  %vm3917_vm3 = vcmp.eq.f32.partialorder %v7260_v10, %v7130_v19  ;;  %vm3918_vm4 = vcmp.eq.f32.partialorder %v7260_v10, %v7132_v15  ;;  %v3818_v6 = vsel %vm3749_vm2, %v7146_v61, 0.0 }
 0xc44   : > { %vm3886_vm5 = vcmp.eq.f32.partialorder %v7013_v51, %v7132_v15  ;;  %v3533_v47 = vadd.f32 %v3475_v31, %v3336_v9  ;;  %v3535_v1 = vadd.f32 %v3477_v42, %v3338_v25  ;;  %vm3888_vm6 = vcmp.eq.f32.partialorder %v7015_v55, %v7132_v15 }
 0xc45   : > { %v3955_v54 = vsel %vm3886_vm5, %v7139_v20, 0.0  ;;  %v3957_v58 = vsel %vm3888_vm6, %v7139_v20, 0.0  ;;  %vm3266_vm7 = vcmp.eq.f32.partialorder %v6991_v17, %v7082_v45  ;;  %vm3268_vm8 = vcmp.eq.f32.partialorder %v7002_v18, %v7082_v45 }
 0xc46   : > { %v4013_v16 = vadd.f32 %v3955_v54, %v3816_v5  ;;  %v4015_v23 = vadd.f32 %v3957_v58, %v3818_v6  ;;  %v3335_v38 = vsel %vm3266_vm7, %v7097_v63, 0.0  ;;  %vm3405_vm9 = vcmp.eq.f32.partialorder %v6991_v17, %v7087_v11 }
 0xc47   : > { %vm3407_vm11 = vcmp.eq.f32.partialorder %v7002_v18, %v7087_v11  ;;  %v3337_v9 = vsel %vm3268_vm8, %v7097_v63, 0.0  ;;  %v3474_v25 = vsel %vm3405_vm9, %v7092_v24, 0.0  ;;  %vm3746_vm12 = vcmp.eq.f32.partialorder %v7013_v51, %v7124_v8 }
 0xc48   : > { %v4071_v4 = vmul.f32 %v4013_v16, %v3533_v47  ;;  %v4073_v31 = vmul.f32 %v4015_v23, %v3535_v1  ;;  %v3476_v42 = vsel %vm3407_vm11, %v7092_v24, 0.0  ;;  %vm3748_vm13 = vcmp.eq.f32.partialorder %v7015_v55, %v7124_v8 }
 0xc49   : > { %v3815_v17 = vsel %vm3746_vm12, %v7144_v57, 0.0  ;;  %v3817_v5 = vsel %vm3748_vm13, %v7144_v57, 0.0  ;;  %vm3885_vm15 = vcmp.eq.f32.partialorder %v7013_v51, %v7130_v19  ;;  %vm3887_vm0 = vcmp.eq.f32.partialorder %v7015_v55, %v7130_v19 }
 0xc4a   : > { %vm3780_vm1 = vcmp.eq.f32.partialorder %v3678_v41, %v7124_v8  ;;  %v5077_v18 = vpack.c.bf16 %v4073_v31, %v4071_v4  ;;  %v3954_v6 = vsel %vm3885_vm15, %v7135_v37, 0.0  ;;  %v3956_v47 = vsel %vm3887_vm0, %v7135_v37, 0.0 }
 0xc4b   : > { %vm3781_vm2 = vcmp.eq.f32.partialorder %v3678_v41, %v7126_v34  ;;  %v3532_v1 = vadd.f32 %v3474_v25, %v3335_v38  ;;  %v3534_v54 = vadd.f32 %v3476_v42, %v3337_v9  ;;  %v4012_v58 = vadd.f32 %v3954_v6, %v3815_v17  ;;  %v3203_v42 = vpop.permute.xlu1 %3202 }
 0xc4c   : > { %v4014_v16 = vadd.f32 %v3956_v47, %v3817_v5  ;;  %v3848_v51 = vsel %vm3779_vm14, %v7146_v61, 0.0  ;;  %v3986_v55 = vsel %vm3917_vm3, %v7135_v37, 0.0  ;;  %v3987_v23 = vsel %vm3918_vm4, %v7139_v20, 0.0  ;;  %5078 = vmatprep.subr.bf16.mxu1 %v5077_v18 }
 0xc4d   : > { %vm3919_vm5 = vcmp.eq.f32.partialorder %v3678_v41, %v7130_v19  ;;  %v4070_v38 = vmul.f32 %v4012_v58, %v3532_v1  ;;  %v3849_v9 = vsel %vm3780_vm1, %v7144_v57, 0.0  ;;  %v3850_v25 = vsel %vm3781_vm2, %v7146_v61, 0.0 }
 0xc4e   : > { %v4072_v4 = vmul.f32 %v4014_v16, %v3534_v54  ;;  %vm3920_vm14 = vcmp.eq.f32.partialorder %v3678_v41, %v7132_v15  ;;  %v3988_v31 = vsel %vm3919_vm5, %v7135_v37, 0.0  ;;  %vm3271_vm3 = vcmp.eq.f32.partialorder %v7028_v48, %v7084_v44 }
 0xc4f   : > { %vm3273_vm4 = vcmp.eq.f32.partialorder %v7026_v53, %v7084_v44  ;;  %vm3410_vm6 = vcmp.eq.f32.partialorder %v7028_v48, %v7089_v46  ;;  %vm3412_vm7 = vcmp.eq.f32.partialorder %v7026_v53, %v7089_v46  ;;  %vm3751_vm8 = vcmp.eq.f32.partialorder %v7041_v33, %v7126_v34 }
 0xc50   : > { %v5079_v10 = vpack.c.bf16 %v4072_v4, %v4070_v38  ;;  %v3340_v17 = vsel %vm3271_vm3, %v7099_v36, 0.0  ;;  %v3479_v5 = vsel %vm3410_vm6, %v7094_v30, 0.0  ;;  %vm3753_vm9 = vcmp.eq.f32.partialorder %v7039_v49, %v7126_v34 }
 0xc51   : > { %v3820_v18 = vsel %vm3751_vm8, %v7146_v61, 0.0  ;;  %v3342_v6 = vsel %vm3273_vm4, %v7099_v36, 0.0  ;;  %v3481_v47 = vsel %vm3412_vm7, %v7094_v30, 0.0  ;;  %v3822_v1 = vsel %vm3753_vm9, %v7146_v61, 0.0 }
 0xc52   : > { %5080 = vmatpush1.bf16.msra.mxu1 %v5079_v10  ;;  %vm3890_vm11 = vcmp.eq.f32.partialorder %v7041_v33, %v7132_v15  ;;  %v3989_v54 = vsel %vm3920_vm14, %v7139_v20, 0.0  ;;  %vm3892_vm12 = vcmp.eq.f32.partialorder %v7039_v49, %v7132_v15  ;;  %vm3302_vm13 = vcmp.eq.f32.partialorder %v3203_v42, %v7082_v45 }
 0xc53   : > { %v3959_v58 = vsel %vm3890_vm11, %v7139_v20, 0.0  ;;  %v7401_v16 = vadd.f32 %v3986_v55, %v7292_v26  ;;  %v3537_v38 = vadd.f32 %v3479_v5, %v3340_v17  ;;  %v3961_v4 = vsel %vm3892_vm12, %v7139_v20, 0.0 }
 0xc54   : > { %v4017_v10 = vadd.f32 %v3959_v58, %v3820_v18  ;;  %v7404_v40 = vadd.f32 %v3987_v23, %v3848_v51  ;;  %v7406_v39 = vadd.f32 %v3988_v31, %v3849_v9  ;;  %v3539_v41 = vadd.f32 %v3481_v47, %v3342_v6  ;;  %v3208_v51 = vpop.permute.xlu0 %3207 }
 0xc55   : > { %v4019_v60 = vadd.f32 %v3961_v4, %v3822_v1  ;;  %v7408_v50 = vadd.f32 %v3989_v54, %v3850_v25  ;;  %vm3303_vm15 = vcmp.eq.f32.partialorder %v3203_v42, %v7084_v44  ;;  %v3371_v3 = vsel %vm3302_vm13, %v7097_v63, 0.0 }
 0xc56   : > { %v4075_v0 = vmul.f32 %v4017_v10, %v3537_v38  ;;  %vm3441_vm0 = vcmp.eq.f32.partialorder %v3203_v42, %v7087_v11  ;;  %vm3442_vm1 = vcmp.eq.f32.partialorder %v3203_v42, %v7089_v46  ;;  %vm3270_vm2 = vcmp.eq.f32.partialorder %v7028_v48, %v7082_v45  ;;  %v3683_v10 = vpop.permute.xlu1 %3682 }
 0xc57   : > { %v4077_v27 = vmul.f32 %v4019_v60, %v3539_v41  ;;  %vm3272_vm5 = vcmp.eq.f32.partialorder %v7026_v53, %v7082_v45  ;;  %v3339_v26 = vsel %vm3270_vm2, %v7097_v63, 0.0  ;;  %vm3409_vm14 = vcmp.eq.f32.partialorder %v7028_v48, %v7087_v11 }
 0xc58   : > { %vm3411_vm3 = vcmp.eq.f32.partialorder %v7026_v53, %v7087_v11  ;;  %v3478_v55 = vsel %vm3409_vm14, %v7092_v24, 0.0  ;;  %vm3750_vm4 = vcmp.eq.f32.partialorder %v7041_v33, %v7124_v8  ;;  %vm3752_vm6 = vcmp.eq.f32.partialorder %v7039_v49, %v7124_v8 }
 0xc59   : > { %v5081_v60 = vpack.c.bf16 %v4077_v27, %v4075_v0  ;;  %v3341_v23 = vsel %vm3272_vm5, %v7097_v63, 0.0  ;;  %v3480_v9 = vsel %vm3411_vm3, %v7092_v24, 0.0  ;;  %v3819_v25 = vsel %vm3750_vm4, %v7144_v57, 0.0 }
 0xc5a   : > { %v3821_v48 = vsel %vm3752_vm6, %v7144_v57, 0.0  ;;  %vm3889_vm7 = vcmp.eq.f32.partialorder %v7041_v33, %v7130_v19  ;;  %vm3891_vm8 = vcmp.eq.f32.partialorder %v7039_v49, %v7130_v19  ;;  %vm3304_vm9 = vcmp.eq.f32.partialorder %v3208_v51, %v7082_v45 }
 0xc5b   : > { %5082 = vmatprep.subr.bf16.mxu1 %v5081_v60  ;;  %vm3305_vm11 = vcmp.eq.f32.partialorder %v3208_v51, %v7084_v44  ;;  %v3372_v53 = vsel %vm3303_vm15, %v7099_v36, 0.0  ;;  %v3536_v27 = vadd.f32 %v3478_v55, %v3339_v26  ;;  %v3958_v0 = vsel %vm3889_vm7, %v7135_v37, 0.0 }
 0xc5c   : > { %v3960_v31 = vsel %vm3891_vm8, %v7135_v37, 0.0  ;;  %v3538_v17 = vadd.f32 %v3480_v9, %v3341_v23  ;;  %v4016_v5 = vadd.f32 %v3958_v0, %v3819_v25  ;;  %vm3443_vm12 = vcmp.eq.f32.partialorder %v3208_v51, %v7087_v11 }
 0xc5d   : > { %v4018_v18 = vadd.f32 %v3960_v31, %v3821_v48  ;;  %v3510_v49 = vsel %vm3441_vm0, %v7092_v24, 0.0  ;;  %v3511_v33 = vsel %vm3442_vm1, %v7094_v30, 0.0  ;;  %v3373_v6 = vsel %vm3304_vm9, %v7097_v63, 0.0 }
 0xc5e   : > { %v3374_v47 = vsel %vm3305_vm11, %v7099_v36, 0.0  ;;  %v4074_v1 = vmul.f32 %v4016_v5, %v3536_v27  ;;  %vm3444_vm13 = vcmp.eq.f32.partialorder %v3208_v51, %v7089_v46  ;;  %v3512_v58 = vsel %vm3443_vm12, %v7092_v24, 0.0 }
 0xc5f   : > { %v4076_v54 = vmul.f32 %v4018_v18, %v3538_v17  ;;  %vm3275_vm15 = vcmp.eq.f32.partialorder %v7045_v21, %v7084_v44  ;;  %vm3277_vm0 = vcmp.eq.f32.partialorder %v7043_v62, %v7084_v44  ;;  %vm3414_vm2 = vcmp.eq.f32.partialorder %v7045_v21, %v7089_v46 }
 0xc60   : > { %vm3416_vm1 = vcmp.eq.f32.partialorder %v7043_v62, %v7089_v46  ;;  %v3344_v38 = vsel %vm3275_vm15, %v7099_v36, 0.0  ;;  %v3346_v4 = vsel %vm3277_vm0, %v7099_v36, 0.0  ;;  %vm3755_vm5 = vcmp.eq.f32.partialorder %v7049_v2, %v7126_v34 }
 0xc61   : > { %v5083_v42 = vpack.c.bf16 %v4076_v54, %v4074_v1  ;;  %v3483_v41 = vsel %vm3414_vm2, %v7094_v30, 0.0  ;;  %v3485_v26 = vsel %vm3416_vm1, %v7094_v30, 0.0  ;;  %vm3757_vm14 = vcmp.eq.f32.partialorder %v7047_v43, %v7126_v34 }
 0xc62   : > { %v3824_v60 = vsel %vm3755_vm5, %v7146_v61, 0.0  ;;  %v3513_v55 = vsel %vm3444_vm13, %v7094_v30, 0.0  ;;  %v3826_v23 = vsel %vm3757_vm14, %v7146_v61, 0.0  ;;  %vm3894_vm3 = vcmp.eq.f32.partialorder %v7049_v2, %v7132_v15 }
 0xc63   : > { %5084 = vmatpush1.bf16.msra.mxu1 %v5083_v42  ;;  %vm3896_vm4 = vcmp.eq.f32.partialorder %v7047_v43, %v7132_v15  ;;  %v7479_v9 = vadd.f32 %v3510_v49, %v3371_v3  ;;  %v3963_v25 = vsel %vm3894_vm3, %v7139_v20, 0.0  ;;  %vm3782_vm6 = vcmp.eq.f32.partialorder %v3683_v10, %v7124_v8 }
 0xc64   : > { %v3965_v48 = vsel %vm3896_vm4, %v7139_v20, 0.0  ;;  %v3541_v27 = vadd.f32 %v3483_v41, %v3344_v38  ;;  %v3543_v0 = vadd.f32 %v3485_v26, %v3346_v4  ;;  %v4021_v51 = vadd.f32 %v3963_v25, %v3824_v60 }
 0xc65   : > { %v4023_v31 = vadd.f32 %v3965_v48, %v3826_v23  ;;  %v7484_v17 = vadd.f32 %v3511_v33, %v3372_v53  ;;  %v7486_v5 = vadd.f32 %v3512_v58, %v3373_v6  ;;  %v7488_v18 = vadd.f32 %v3513_v55, %v3374_v47  ;;  %v3688_v47 = vpop.permute.xlu0 %3687 }
 0xc66   : > { %vm3783_vm7 = vcmp.eq.f32.partialorder %v3683_v10, %v7126_v34  ;;  %v4079_v3 = vmul.f32 %v4021_v51, %v3541_v27  ;;  %v3851_v1 = vsel %vm3782_vm6, %v7144_v57, 0.0  ;;  %vm3274_vm8 = vcmp.eq.f32.partialorder %v7045_v21, %v7082_v45  ;;  %v3213_v51 = vpop.permute.xlu1 %3212 }
 0xc67   : > { %v4081_v49 = vmul.f32 %v4023_v31, %v3543_v0  ;;  %vm3921_vm9 = vcmp.eq.f32.partialorder %v3683_v10, %v7130_v19  ;;  %vm3276_vm11 = vcmp.eq.f32.partialorder %v7043_v62, %v7082_v45  ;;  %v3343_v53 = vsel %vm3274_vm8, %v7097_v63, 0.0 }
 0xc68   : > { %vm3413_vm12 = vcmp.eq.f32.partialorder %v7045_v21, %v7087_v11  ;;  %v3345_v6 = vsel %vm3276_vm11, %v7097_v63, 0.0  ;;  %vm3415_vm13 = vcmp.eq.f32.partialorder %v7043_v62, %v7087_v11  ;;  %vm3754_vm15 = vcmp.eq.f32.partialorder %v7049_v2, %v7124_v8 }
 0xc69   : > { %v5085_v33 = vpack.c.bf16 %v4081_v49, %v4079_v3  ;;  %v3482_v54 = vsel %vm3413_vm12, %v7092_v24, 0.0  ;;  %v3484_v58 = vsel %vm3415_vm13, %v7092_v24, 0.0  ;;  %vm3756_vm0 = vcmp.eq.f32.partialorder %v7047_v43, %v7124_v8 }
 0xc6a   : > { %v3823_v42 = vsel %vm3754_vm15, %v7144_v57, 0.0  ;;  %vm3922_vm2 = vcmp.eq.f32.partialorder %v3683_v10, %v7132_v15  ;;  %v3825_v21 = vsel %vm3756_vm0, %v7144_v57, 0.0  ;;  %vm3893_vm1 = vcmp.eq.f32.partialorder %v7049_v2, %v7130_v19 }
 0xc6b   : > { %5086 = vmatprep.subr.bf16.mxu1 %v5085_v33  ;;  %vm3895_vm5 = vcmp.eq.f32.partialorder %v7047_v43, %v7130_v19  ;;  %v3962_v62 = vsel %vm3893_vm1, %v7135_v37, 0.0  ;;  %vm3784_vm14 = vcmp.eq.f32.partialorder %v3688_v47, %v7124_v8  ;;  %vm3785_vm3 = vcmp.eq.f32.partialorder %v3688_v47, %v7126_v34 }
 0xc6c   : > { %v3964_v38 = vsel %vm3895_vm5, %v7135_v37, 0.0  ;;  %v3540_v4 = vadd.f32 %v3482_v54, %v3343_v53  ;;  %v3542_v41 = vadd.f32 %v3484_v58, %v3345_v6  ;;  %v4020_v26 = vadd.f32 %v3962_v62, %v3823_v42 }
 0xc6d   : > { %v4022_v60 = vadd.f32 %v3964_v38, %v3825_v21  ;;  %v3852_v55 = vsel %vm3783_vm7, %v7146_v61, 0.0  ;;  %v3990_v43 = vsel %vm3921_vm9, %v7135_v37, 0.0  ;;  %v3991_v2 = vsel %vm3922_vm2, %v7139_v20, 0.0 }
 0xc6e   : > { %vm3923_vm4 = vcmp.eq.f32.partialorder %v3688_v47, %v7130_v19  ;;  %v4078_v23 = vmul.f32 %v4020_v26, %v3540_v4  ;;  %v3853_v48 = vsel %vm3784_vm14, %v7144_v57, 0.0  ;;  %v3854_v27 = vsel %vm3785_vm3, %v7146_v61, 0.0 }
 0xc6f   : > { %v4080_v25 = vmul.f32 %v4022_v60, %v3542_v41  ;;  %vm3924_vm6 = vcmp.eq.f32.partialorder %v3688_v47, %v7132_v15  ;;  %v3992_v0 = vsel %vm3923_vm4, %v7135_v37, 0.0  ;;  %vm3279_vm7 = vcmp.eq.f32.partialorder %v7053_v22, %v7084_v44 }
 0xc70   : > { %vm3281_vm8 = vcmp.eq.f32.partialorder %v7051_v7, %v7084_v44  ;;  %vm3418_vm9 = vcmp.eq.f32.partialorder %v7053_v22, %v7089_v46  ;;  %vm3420_vm11 = vcmp.eq.f32.partialorder %v7051_v7, %v7089_v46  ;;  %vm3759_vm12 = vcmp.eq.f32.partialorder %v7057_v13, %v7126_v34 }
 0xc71   : > { %v5087_v10 = vpack.c.bf16 %v4080_v25, %v4078_v23  ;;  %v3348_v31 = vsel %vm3279_vm7, %v7099_v36, 0.0  ;;  %v3487_v3 = vsel %vm3418_vm9, %v7094_v30, 0.0  ;;  %vm3761_vm13 = vcmp.eq.f32.partialorder %v7055_v32, %v7126_v34 }
 0xc72   : > { %v3828_v49 = vsel %vm3759_vm12, %v7146_v61, 0.0  ;;  %v3350_v53 = vsel %vm3281_vm8, %v7099_v36, 0.0  ;;  %v3489_v33 = vsel %vm3420_vm11, %v7094_v30, 0.0  ;;  %v3830_v6 = vsel %vm3761_vm13, %v7146_v61, 0.0 }
 0xc73   : > { %5088 = vmatpush1.bf16.msra.mxu1 %v5087_v10  ;;  %vm3898_vm15 = vcmp.eq.f32.partialorder %v7057_v13, %v7132_v15  ;;  %v3993_v54 = vsel %vm3924_vm6, %v7139_v20, 0.0  ;;  %vm3900_vm0 = vcmp.eq.f32.partialorder %v7055_v32, %v7132_v15  ;;  %vm3306_vm2 = vcmp.eq.f32.partialorder %v3213_v51, %v7082_v45 }
 0xc74   : > { %v3967_v58 = vsel %vm3898_vm15, %v7139_v20, 0.0  ;;  %v7559_v42 = vadd.f32 %v3990_v43, %v3851_v1  ;;  %v3545_v21 = vadd.f32 %v3487_v3, %v3348_v31  ;;  %v3969_v62 = vsel %vm3900_vm0, %v7139_v20, 0.0 }
 0xc75   : > { %v4025_v38 = vadd.f32 %v3967_v58, %v3828_v49  ;;  %v7562_v4 = vadd.f32 %v3991_v2, %v3852_v55  ;;  %v7564_v41 = vadd.f32 %v3992_v0, %v3853_v48  ;;  %v3547_v26 = vadd.f32 %v3489_v33, %v3350_v53  ;;  %v3218_v55 = vpop.permute.xlu0 %3217 }
 0xc76   : > { %v4027_v47 = vadd.f32 %v3969_v62, %v3830_v6  ;;  %v7566_v60 = vadd.f32 %v3993_v54, %v3854_v27  ;;  %vm3307_vm1 = vcmp.eq.f32.partialorder %v3213_v51, %v7084_v44  ;;  %v3375_v25 = vsel %vm3306_vm2, %v7097_v63, 0.0 }
 0xc77   : > { %v4083_v23 = vmul.f32 %v4025_v38, %v3545_v21  ;;  %vm3445_vm5 = vcmp.eq.f32.partialorder %v3213_v51, %v7087_v11  ;;  %vm3446_vm14 = vcmp.eq.f32.partialorder %v3213_v51, %v7089_v46  ;;  %vm3278_vm3 = vcmp.eq.f32.partialorder %v7053_v22, %v7082_v45  ;;  %v7621_v51 = vpop.permute.xlu1 %3692 }
 0xc78   : > { %v4085_v10 = vmul.f32 %v4027_v47, %v3547_v26  ;;  %vm3280_vm4 = vcmp.eq.f32.partialorder %v7051_v7, %v7082_v45  ;;  %v3347_v1 = vsel %vm3278_vm3, %v7097_v63, 0.0  ;;  %vm3417_vm6 = vcmp.eq.f32.partialorder %v7053_v22, %v7087_v11 }
 0xc79   : > { %vm3419_vm7 = vcmp.eq.f32.partialorder %v7051_v7, %v7087_v11  ;;  %v3486_v2 = vsel %vm3417_vm6, %v7092_v24, 0.0  ;;  %vm3758_vm8 = vcmp.eq.f32.partialorder %v7057_v13, %v7124_v8  ;;  %vm3760_vm9 = vcmp.eq.f32.partialorder %v7055_v32, %v7124_v8 }
 0xc7a   : > { %v5089_v43 = vpack.c.bf16 %v4085_v10, %v4083_v23  ;;  %v3349_v48 = vsel %vm3280_vm4, %v7097_v63, 0.0  ;;  %v3488_v27 = vsel %vm3419_vm7, %v7092_v24, 0.0  ;;  %v3827_v0 = vsel %vm3758_vm8, %v7144_v57, 0.0 }
 0xc7b   : > { %v3829_v22 = vsel %vm3760_vm9, %v7144_v57, 0.0  ;;  %v3514_v7 = vsel %vm3445_vm5, %v7092_v24, 0.0  ;;  %vm3897_vm11 = vcmp.eq.f32.partialorder %v7057_v13, %v7130_v19  ;;  %vm3899_vm12 = vcmp.eq.f32.partialorder %v7055_v32, %v7130_v19 }
 0xc7c   : > { %5090 = vmatprep.subr.bf16.mxu1 %v5089_v43  ;;  %vm3308_vm13 = vcmp.eq.f32.partialorder %v3218_v55, %v7082_v45  ;;  %v3376_v31 = vsel %vm3307_vm1, %v7099_v36, 0.0  ;;  %v3544_v3 = vadd.f32 %v3486_v2, %v3347_v1  ;;  %v3966_v49 = vsel %vm3897_vm11, %v7135_v37, 0.0 }
 0xc7d   : > { %v3968_v53 = vsel %vm3899_vm12, %v7135_v37, 0.0  ;;  %v3546_v33 = vadd.f32 %v3488_v27, %v3349_v48  ;;  %v4024_v6 = vadd.f32 %v3966_v49, %v3827_v0  ;;  %vm3447_vm15 = vcmp.eq.f32.partialorder %v3218_v55, %v7087_v11 }
 0xc7e   : > { %v4026_v54 = vadd.f32 %v3968_v53, %v3829_v22  ;;  %v3515_v32 = vsel %vm3446_vm14, %v7094_v30, 0.0  ;;  %v7607_v13 = vadd.f32 %v3514_v7, %v3375_v25  ;;  %vm3309_vm0 = vcmp.eq.f32.partialorder %v3218_v55, %v7084_v44 }
 0xc7f   : > { %v3377_v58 = vsel %vm3308_vm13, %v7097_v63, 0.0  ;;  %v4082_v21 = vmul.f32 %v4024_v6, %v3544_v3  ;;  %vm3448_vm2 = vcmp.eq.f32.partialorder %v3218_v55, %v7089_v46  ;;  %v3516_v38 = vsel %vm3447_vm15, %v7092_v24, 0.0 }
 0xc80   : > { %v4084_v62 = vmul.f32 %v4026_v54, %v3546_v33  ;;  %vm3283_vm1 = vcmp.eq.f32.partialorder %v7061_v56, %v7084_v44  ;;  %vm3285_vm5 = vcmp.eq.f32.partialorder %v7059_v12, %v7084_v44  ;;  %vm3422_vm14 = vcmp.eq.f32.partialorder %v7061_v56, %v7089_v46 }
 0xc81   : > { %vm3424_vm3 = vcmp.eq.f32.partialorder %v7059_v12, %v7089_v46  ;;  %v3352_v47 = vsel %vm3283_vm1, %v7099_v36, 0.0  ;;  %v3491_v23 = vsel %vm3422_vm14, %v7094_v30, 0.0  ;;  %vm3763_vm4 = vcmp.eq.f32.partialorder %v7065_v52, %v7126_v34 }
 0xc82   : > { %v5091_v26 = vpack.c.bf16 %v4084_v62, %v4082_v21  ;;  %v3354_v25 = vsel %vm3285_vm5, %v7099_v36, 0.0  ;;  %v3493_v10 = vsel %vm3424_vm3, %v7094_v30, 0.0  ;;  %vm3765_vm6 = vcmp.eq.f32.partialorder %v7063_v59, %v7126_v34 }
 0xc83   : > { %v3832_v1 = vsel %vm3763_vm4, %v7146_v61, 0.0  ;;  %v3834_v43 = vsel %vm3765_vm6, %v7146_v61, 0.0  ;;  %vm3902_vm7 = vcmp.eq.f32.partialorder %v7065_v52, %v7132_v15  ;;  %vm3904_vm8 = vcmp.eq.f32.partialorder %v7063_v59, %v7132_v15 }
 0xc84   : > { %5092 = vmatpush1.bf16.msra.mxu1 %v5091_v26  ;;  %vm3786_vm9 = vcmp.eq.f32.partialorder %v7621_v51, %v7124_v8  ;;  %v7639_v2 = vadd.f32 %v3515_v32, %v3376_v31  ;;  %v3549_v48 = vadd.f32 %v3491_v23, %v3352_v47  ;;  %v3971_v27 = vsel %vm3902_vm7, %v7139_v20, 0.0 }
 0xc85   : > { %v3973_v0 = vsel %vm3904_vm8, %v7139_v20, 0.0  ;;  %v3551_v22 = vadd.f32 %v3493_v10, %v3354_v25  ;;  %v4029_v7 = vadd.f32 %v3971_v27, %v3832_v1  ;;  %vm3787_vm11 = vcmp.eq.f32.partialorder %v7621_v51, %v7126_v34  ;;  %v3223_v27 = vpop.permute.xlu1 %3222 }
 0xc86   : > { %v4031_v3 = vadd.f32 %v3973_v0, %v3834_v43  ;;  %v3378_v49 = vsel %vm3309_vm0, %v7099_v36, 0.0  ;;  %v3517_v31 = vsel %vm3448_vm2, %v7094_v30, 0.0  ;;  %v7651_v53 = vadd.f32 %v3516_v38, %v3377_v58 }
 0xc87   : > { %v3855_v33 = vsel %vm3786_vm9, %v7144_v57, 0.0  ;;  %v4087_v6 = vmul.f32 %v4029_v7, %v3549_v48  ;;  %vm3282_vm12 = vcmp.eq.f32.partialorder %v7061_v56, %v7082_v45  ;;  %vm3284_vm13 = vcmp.eq.f32.partialorder %v7059_v12, %v7082_v45 }
 0xc88   : > { %v4089_v54 = vmul.f32 %v4031_v3, %v3551_v22  ;;  %v3856_v32 = vsel %vm3787_vm11, %v7146_v61, 0.0  ;;  %v3351_v21 = vsel %vm3282_vm12, %v7097_v63, 0.0  ;;  %v3353_v62 = vsel %vm3284_vm13, %v7097_v63, 0.0 }
 0xc89   : > { %vm3421_vm15 = vcmp.eq.f32.partialorder %v7061_v56, %v7087_v11  ;;  %vm3423_vm0 = vcmp.eq.f32.partialorder %v7059_v12, %v7087_v11  ;;  %vm3762_vm2 = vcmp.eq.f32.partialorder %v7065_v52, %v7124_v8  ;;  %vm3925_vm1 = vcmp.eq.f32.partialorder %v7621_v51, %v7130_v19  ;;  %v3698_v56 = vpop.permute.xlu0 %3697 }
 0xc8a   : > { %v5093_v55 = vpack.c.bf16 %v4089_v54, %v4087_v6  ;;  %v3490_v58 = vsel %vm3421_vm15, %v7092_v24, 0.0  ;;  %v3492_v38 = vsel %vm3423_vm0, %v7092_v24, 0.0  ;;  %vm3764_vm5 = vcmp.eq.f32.partialorder %v7063_v59, %v7124_v8 }
 0xc8b   : > { %v3831_v26 = vsel %vm3762_vm2, %v7144_v57, 0.0  ;;  %vm3926_vm14 = vcmp.eq.f32.partialorder %v7621_v51, %v7132_v15  ;;  %v3833_v12 = vsel %vm3764_vm5, %v7144_v57, 0.0  ;;  %vm3901_vm3 = vcmp.eq.f32.partialorder %v7065_v52, %v7130_v19 }
 0xc8c   : > { %5094 = vmatprep.subr.bf16.mxu1 %v5093_v55  ;;  %vm3903_vm4 = vcmp.eq.f32.partialorder %v7063_v59, %v7130_v19  ;;  %v3548_v47 = vadd.f32 %v3490_v58, %v3351_v21  ;;  %v3550_v23 = vadd.f32 %v3492_v38, %v3353_v62  ;;  %v3970_v25 = vsel %vm3901_vm3, %v7135_v37, 0.0  ;;  %v8201_v59 = vld [vmem:[#allocation7_spill] sm:$0xff]  ;;  %v8203_v58 = vld [vmem:[#allocation4_spill] sm:$0xff] }
 0xc8d   : > { %v3972_v10 = vsel %vm3903_vm4, %v7135_v37, 0.0  ;;  %v4028_v1 = vadd.f32 %v3970_v25, %v3831_v26  ;;  %vm3788_vm6 = vcmp.eq.f32.partialorder %v3698_v56, %v7124_v8  ;;  %vm3789_vm7 = vcmp.eq.f32.partialorder %v3698_v56, %v7126_v34  ;;  %v3228_v21 = vpop.permute.xlu0 %3227  ;;  %v8202_v55 = vld [vmem:[#allocation3_spill] sm:$0xff] }
 0xc8e   : > { %v4030_v43 = vadd.f32 %v3972_v10, %v3833_v12  ;;  %vm3927_vm8 = vcmp.eq.f32.partialorder %v3698_v56, %v7130_v19  ;;  %vm3928_vm9 = vcmp.eq.f32.partialorder %v3698_v56, %v7132_v15  ;;  %v4091_v52 = vmul.f32 %v7170_v35, %v7137_v28 }
 0xc8f   : > { %v4093_v48 = vmul.f32 %v8201_v59, %v7118_v29  ;;  %v3994_v0 = vsel %vm3925_vm1, %v7135_v37, 0.0  ;;  %v3995_v22 = vsel %vm3926_vm14, %v7139_v20, 0.0  ;;  %v4086_v7 = vmul.f32 %v4028_v1, %v3548_v47  ;;  %v8204_v47 = vld [vmem:[#allocation2_spill] sm:$0xff]  ;;  %v8207_v59 = vld [vmem:[#allocation12_spill] sm:$0xff] }
 0xc90   : > { %v4088_v3 = vmul.f32 %v4030_v43, %v3550_v23  ;;  %v3857_v6 = vsel %vm3788_vm6, %v7144_v57, 0.0  ;;  %v3858_v28 = vsel %vm3789_vm7, %v7146_v61, 0.0  ;;  %v3996_v35 = vsel %vm3927_vm8, %v7135_v37, 0.0  ;;  %v8205_v23 = vld [vmem:[#allocation5_spill] sm:$0xff]  ;;  %v3703_v43 = vpop.permute.xlu1 %3702 }
 0xc91   : > { %v3997_v29 = vsel %vm3928_vm9, %v7139_v20, 0.0  ;;  %vm3310_vm11 = vcmp.eq.f32.partialorder %v3223_v27, %v7082_v45  ;;  %vm3311_vm12 = vcmp.eq.f32.partialorder %v3223_v27, %v7084_v44  ;;  %vm3449_vm13 = vcmp.eq.f32.partialorder %v3223_v27, %v7087_v11 }
 0xc92   : > { %v5095_v54 = vpack.c.bf16 %v4088_v3, %v4086_v7  ;;  %v7706_v51 = vadd.f32 %v3517_v31, %v3378_v49  ;;  %v5097_v62 = vpack.c.bf16 %v4093_v48, %v4091_v52  ;;  %vm3450_vm15 = vcmp.eq.f32.partialorder %v3223_v27, %v7089_v46  ;;  %v8206_v52 = vld [vmem:[#allocation8_spill] sm:$0xff]  ;;  %v8208_v27 = vld [vmem:[#allocation10_spill] sm:$0xff]  ;;  %v3708_v3 = vpop.permute.xlu0 %3707 }
 0xc93   : > { %v4090_v38 = vmul.f32 %v8203_v58, %v8202_v55  ;;  %v7711_v26 = vadd.f32 %v3994_v0, %v3855_v33  ;;  %v7713_v56 = vadd.f32 %v3995_v22, %v3856_v32  ;;  %v7715_v12 = vadd.f32 %v3996_v35, %v3857_v6  ;;  %v8209_v0 = vld [vmem:[#allocation14_spill] sm:$0xff]  ;;  %v8212_v58 = vld [vmem:[#allocation9_spill] sm:$0xff] }
 0xc94   : > { %5096 = vmatpush1.bf16.msra.mxu1 %v5095_v54  ;;  %v4092_v25 = vmul.f32 %v8205_v23, %v8204_v47  ;;  %v7719_v10 = vadd.f32 %v3997_v29, %v3858_v28  ;;  %v3379_v49 = vsel %vm3310_vm11, %v7097_v63, 0.0  ;;  %v3380_v31 = vsel %vm3311_vm12, %v7099_v36, 0.0 }
 0xc95   : > { %5098 = vmatprep.subr.bf16.mxu1 %v5097_v62  ;;  %v3518_v1 = vsel %vm3449_vm13, %v7092_v24, 0.0  ;;  %v3519_v33 = vsel %vm3450_vm15, %v7094_v30, 0.0  ;;  %vm3312_vm0 = vcmp.eq.f32.partialorder %v3228_v21, %v7082_v45  ;;  %vm3313_vm2 = vcmp.eq.f32.partialorder %v3228_v21, %v7084_v44  ;;  %v8211_v62 = vld [vmem:[#allocation11_spill] sm:$0xff] }
 0xc96   : > { %v5099_v32 = vpack.c.bf16 %v4092_v25, %v4090_v38  ;;  %vm3451_vm1 = vcmp.eq.f32.partialorder %v3228_v21, %v7087_v11  ;;  %vm3452_vm5 = vcmp.eq.f32.partialorder %v3228_v21, %v7089_v46  ;;  %v4095_v48 = vmul.f32 %v8207_v59, %v8206_v52  ;;  %v8210_v21 = vld [vmem:[#allocation6_spill] sm:$0xff]  ;;  %v8213_v38 = vld [vmem:[#allocation13_spill] sm:$0xff]  ;;  %v3233_v52 = vpop.permute.xlu1 %3232 }
 0xc97   : > { %v4097_v22 = vmul.f32 %v8209_v0, %v8208_v27  ;;  %v7733_v7 = vadd.f32 %v3518_v1, %v3379_v49  ;;  %vm3790_vm14 = vcmp.eq.f32.partialorder %v3703_v43, %v7124_v8  ;;  %vm3791_vm3 = vcmp.eq.f32.partialorder %v3703_v43, %v7126_v34  ;;  %v8215_v0 = vld [vmem:[#allocation18_spill] sm:$0xff] }
 0xc98   : > { %5100 = vmatpush1.bf16.msra.mxu1 %v5099_v32  ;;  %vm3929_vm4 = vcmp.eq.f32.partialorder %v3703_v43, %v7130_v19  ;;  %v3381_v6 = vsel %vm3312_vm0, %v7097_v63, 0.0  ;;  %v3382_v28 = vsel %vm3313_vm2, %v7099_v36, 0.0  ;;  %vm3930_vm6 = vcmp.eq.f32.partialorder %v3703_v43, %v7132_v15 }
 0xc99   : > { %v5101_v35 = vpack.c.bf16 %v4097_v22, %v4095_v48  ;;  %v3520_v29 = vsel %vm3451_vm1, %v7092_v24, 0.0  ;;  %v3521_v54 = vsel %vm3452_vm5, %v7094_v30, 0.0  ;;  %v4094_v55 = vmul.f32 %v8211_v62, %v8210_v21  ;;  %v8214_v48 = vld [vmem:[#allocation16_spill] sm:$0xff]  ;;  %v8216_v22 = vld [vmem:[#allocation21_spill] sm:$0xff]  ;;  %v3238_v62 = vpop.permute.xlu0 %3237 }
 0xc9a   : > { %v4096_v47 = vmul.f32 %v8213_v38, %v8212_v58  ;;  %v3859_v23 = vsel %vm3790_vm14, %v7144_v57, 0.0  ;;  %v3860_v25 = vsel %vm3791_vm3, %v7146_v61, 0.0  ;;  %v3998_v49 = vsel %vm3929_vm4, %v7135_v37, 0.0  ;;  %v8219_v38 = vld [vmem:[#allocation17_spill] sm:$0xff] }
 0xc9b   : > { %5102 = vmatprep.subr.bf16.mxu1 %v5101_v35  ;;  %v3999_v1 = vsel %vm3930_vm6, %v7139_v20, 0.0  ;;  %v7751_v43 = vadd.f32 %v3519_v33, %v3380_v31  ;;  %vm3792_vm7 = vcmp.eq.f32.partialorder %v3708_v3, %v7124_v8  ;;  %vm3931_vm8 = vcmp.eq.f32.partialorder %v3708_v3, %v7130_v19 }
 0xc9c   : > { %v5103_v32 = vpack.c.bf16 %v4096_v47, %v4094_v55  ;;  %v7755_v59 = vadd.f32 %v3520_v29, %v3381_v6  ;;  %vm3793_vm9 = vcmp.eq.f32.partialorder %v3708_v3, %v7126_v34  ;;  %v4099_v27 = vmul.f32 %v7281_v14, %v8214_v48  ;;  %v8220_v47 = vld [vmem:[#allocation20_spill] sm:$0xff] }
 0xc9d   : > { %v4101_v35 = vmul.f32 %v8216_v22, %v8215_v0  ;;  %v7762_v21 = vadd.f32 %v3521_v54, %v3382_v28  ;;  %v7764_v31 = vadd.f32 %v3998_v49, %v3859_v23  ;;  %v7766_v33 = vadd.f32 %v3999_v1, %v3860_v25  ;;  %v8217_v28 = vld [vmem:[#allocation15_spill] sm:$0xff] }
 0xc9e   : > { %5104 = vmatpush1.bf16.msra.mxu1 %v5103_v32  ;;  %vm3932_vm11 = vcmp.eq.f32.partialorder %v3708_v3, %v7132_v15  ;;  %v3861_v6 = vsel %vm3792_vm7, %v7144_v57, 0.0  ;;  %v4000_v29 = vsel %vm3931_vm8, %v7135_v37, 0.0  ;;  %vm3314_vm12 = vcmp.eq.f32.partialorder %v3233_v52, %v7082_v45  ;;  %v8218_v54 = vld [vmem:[#allocation19_spill] sm:$0xff]  ;;  %v3713_v32 = vpop.permute.xlu1 %3712 }
 0xc9f   : > { %v5105_v55 = vpack.c.bf16 %v4101_v35, %v4099_v27  ;;  %v3862_v14 = vsel %vm3793_vm9, %v7146_v61, 0.0  ;;  %vm3453_vm13 = vcmp.eq.f32.partialorder %v3233_v52, %v7087_v11  ;;  %v4098_v58 = vmul.f32 %v8218_v54, %v8217_v28  ;;  %v8221_v27 = vld [vmem:[#allocation23_spill] sm:$0xff] }
 0xca0   : > { %v4100_v23 = vmul.f32 %v8220_v47, %v8219_v38  ;;  %v4001_v3 = vsel %vm3932_vm11, %v7139_v20, 0.0  ;;  %vm3315_vm15 = vcmp.eq.f32.partialorder %v3233_v52, %v7084_v44  ;;  %vm3454_vm0 = vcmp.eq.f32.partialorder %v3233_v52, %v7089_v46  ;;  %v3718_v38 = vpop.permute.xlu0 %3717 }
 0xca1   : > { %5106 = vmatprep.subr.bf16.mxu1 %v5105_v55  ;;  %vm3316_vm2 = vcmp.eq.f32.partialorder %v3238_v62, %v7082_v45  ;;  %v7782_v25 = vadd.f32 %v4000_v29, %v3861_v6  ;;  %v3383_v49 = vsel %vm3314_vm12, %v7097_v63, 0.0  ;;  %vm3317_vm1 = vcmp.eq.f32.partialorder %v3238_v62, %v7084_v44  ;;  %v8222_v6 = vld [vmem:[#allocation25_spill] sm:$0xff] }
 0xca2   : > { %v5107_v1 = vpack.c.bf16 %v4100_v23, %v4098_v58  ;;  %v3522_v48 = vsel %vm3453_vm13, %v7092_v24, 0.0  ;;  %vm3455_vm5 = vcmp.eq.f32.partialorder %v3238_v62, %v7087_v11  ;;  %vm3456_vm14 = vcmp.eq.f32.partialorder %v3238_v62, %v7089_v46  ;;  %v8224_v23 = vld [vmem:[#allocation24_spill] sm:$0xff] }
 0xca3   : > { %v4103_v0 = vmul.f32 %v7404_v40, %v8221_v27  ;;  %v3384_v52 = vsel %vm3315_vm15, %v7099_v36, 0.0  ;;  %v3523_v22 = vsel %vm3454_vm0, %v7094_v30, 0.0  ;;  %v3385_v35 = vsel %vm3316_vm2, %v7097_v63, 0.0 }
 0xca4   : > { %5108 = vmatpush1.bf16.msra.mxu1 %v5107_v1  ;;  %v4105_v29 = vmul.f32 %v7408_v50, %v8222_v6  ;;  %v3386_v55 = vsel %vm3317_vm1, %v7099_v36, 0.0  ;;  %v3524_v28 = vsel %vm3455_vm5, %v7092_v24, 0.0  ;;  %v3525_v54 = vsel %vm3456_vm14, %v7094_v30, 0.0  ;;  %v8223_v50 = vld [vmem:[#allocation22_spill] sm:$0xff] }
 0xca5   : > { %vm3794_vm3 = vcmp.eq.f32.partialorder %v3713_v32, %v7124_v8  ;;  %v7800_v62 = vadd.f32 %v4001_v3, %v3862_v14  ;;  %v7802_v40 = vadd.f32 %v3522_v48, %v3383_v49  ;;  %vm3933_vm4 = vcmp.eq.f32.partialorder %v3713_v32, %v7130_v19  ;;  %v3243_v48 = vpop.permute.xlu1 %3242 }
 0xca6   : > { %v5109_v58 = vpack.c.bf16 %v4105_v29, %v4103_v0  ;;  %vm3795_vm6 = vcmp.eq.f32.partialorder %v3713_v32, %v7126_v34  ;;  %vm3934_vm7 = vcmp.eq.f32.partialorder %v3713_v32, %v7132_v15  ;;  %v4102_v47 = vmul.f32 %v7401_v16, %v8223_v50 }
 0xca7   : > { %v4104_v1 = vmul.f32 %v7406_v39, %v8224_v23  ;;  %v7811_v27 = vadd.f32 %v3523_v22, %v3384_v52  ;;  %v7813_v14 = vadd.f32 %v3524_v28, %v3385_v35  ;;  %v7815_v3 = vadd.f32 %v3525_v54, %v3386_v55 }
 0xca8   : > { %5110 = vmatprep.subr.bf16.mxu1 %v5109_v58  ;;  %v3863_v49 = vsel %vm3794_vm3, %v7144_v57, 0.0  ;;  %v4002_v0 = vsel %vm3933_vm4, %v7135_v37, 0.0  ;;  %vm3796_vm8 = vcmp.eq.f32.partialorder %v3718_v38, %v7124_v8  ;;  %vm3797_vm9 = vcmp.eq.f32.partialorder %v3718_v38, %v7126_v34 }
 0xca9   : > { %v5111_v6 = vpack.c.bf16 %v4104_v1, %v4102_v47  ;;  %v3864_v16 = vsel %vm3795_vm6, %v7146_v61, 0.0  ;;  %v4003_v39 = vsel %vm3934_vm7, %v7139_v20, 0.0  ;;  %v4107_v32 = vmul.f32 %v7562_v4, %v7484_v17  ;;  %v3248_v17 = vpop.permute.xlu0 %3247 }
 0xcaa   : > { %v4109_v52 = vmul.f32 %v7566_v60, %v7488_v18  ;;  %vm3935_vm11 = vcmp.eq.f32.partialorder %v3718_v38, %v7130_v19  ;;  %vm3936_vm12 = vcmp.eq.f32.partialorder %v3718_v38, %v7132_v15  ;;  %vm3318_vm13 = vcmp.eq.f32.partialorder %v3243_v48, %v7082_v45 }
 0xcab   : > { %5112 = vmatpush1.bf16.msra.mxu1 %v5111_v6  ;;  %vm3319_vm15 = vcmp.eq.f32.partialorder %v3243_v48, %v7084_v44  ;;  %v7831_v22 = vadd.f32 %v4002_v0, %v3863_v49  ;;  %v3865_v35 = vsel %vm3796_vm8, %v7144_v57, 0.0  ;;  %v3866_v29 = vsel %vm3797_vm9, %v7146_v61, 0.0 }
 0xcac   : > { %v5113_v55 = vpack.c.bf16 %v4109_v52, %v4107_v32  ;;  %vm3457_vm0 = vcmp.eq.f32.partialorder %v3243_v48, %v7087_v11  ;;  %vm3458_vm2 = vcmp.eq.f32.partialorder %v3243_v48, %v7089_v46  ;;  %v4106_v18 = vmul.f32 %v7559_v42, %v7479_v9  ;;  %v3723_v42 = vpop.permute.xlu1 %3722 }
 0xcad   : > { %v4108_v4 = vmul.f32 %v7564_v41, %v7486_v5  ;;  %v4004_v60 = vsel %vm3935_vm11, %v7135_v37, 0.0  ;;  %v4005_v28 = vsel %vm3936_vm12, %v7139_v20, 0.0  ;;  %v3387_v54 = vsel %vm3318_vm13, %v7097_v63, 0.0 }
 0xcae   : > { %5114 = vmatprep.subr.bf16.mxu1 %v5113_v55  ;;  %v3388_v58 = vsel %vm3319_vm15, %v7099_v36, 0.0  ;;  %v3526_v38 = vsel %vm3457_vm0, %v7092_v24, 0.0  ;;  %v3527_v50 = vsel %vm3458_vm2, %v7094_v30, 0.0  ;;  %vm3320_vm1 = vcmp.eq.f32.partialorder %v3248_v17, %v7082_v45 }
 0xcaf   : > { %v5115_v47 = vpack.c.bf16 %v4108_v4, %v4106_v18  ;;  %v7848_v9 = vadd.f32 %v4003_v39, %v3864_v16  ;;  %vm3321_vm5 = vcmp.eq.f32.partialorder %v3248_v17, %v7084_v44  ;;  %vm3459_vm14 = vcmp.eq.f32.partialorder %v3248_v17, %v7087_v11  ;;  %v3728_v16 = vpop.permute.xlu0 %3727 }
 0xcb0   : > { %v4111_v5 = vmul.f32 %v7713_v56, %v7639_v2  ;;  %v7854_v41 = vadd.f32 %v4004_v60, %v3865_v35  ;;  %v4063_v23 = vadd.f32 %v4005_v28, %v3866_v29  ;;  %vm3460_vm3 = vcmp.eq.f32.partialorder %v3248_v17, %v7089_v46  ;;  %v3253_v55 = vpop.permute.xlu1 %3252 }
 0xcb1   : > { %5116 = vmatpush1.bf16.msra.mxu1 %v5115_v47  ;;  %v4113_v1 = vmul.f32 %v7719_v10, %v7706_v51  ;;  %v7859_v49 = vadd.f32 %v3526_v38, %v3387_v54  ;;  %v3585_v48 = vadd.f32 %v3527_v50, %v3388_v58  ;;  %v3389_v0 = vsel %vm3320_vm1, %v7097_v63, 0.0 }
 0xcb2   : > { %v3528_v6 = vsel %vm3459_vm14, %v7092_v24, 0.0  ;;  %v3390_v2 = vsel %vm3321_vm5, %v7099_v36, 0.0  ;;  %vm3798_vm4 = vcmp.eq.f32.partialorder %v3723_v42, %v7124_v8  ;;  %vm3799_vm6 = vcmp.eq.f32.partialorder %v3723_v42, %v7126_v34 }
 0xcb3   : > { %v5117_v56 = vpack.c.bf16 %v4113_v1, %v4111_v5  ;;  %v3529_v39 = vsel %vm3460_vm3, %v7094_v30, 0.0  ;;  %vm3937_vm7 = vcmp.eq.f32.partialorder %v3723_v42, %v7130_v19  ;;  %v4110_v51 = vmul.f32 %v7711_v26, %v7607_v13  ;;  %v3733_v60 = vpop.permute.xlu0 %3732  ;;  %v5225_v1 = vld [vmem:[%s5494_s24 + $0x28] sm:$0xff] }
 0xcb4   : > { %v4112_v10 = vmul.f32 %v7715_v12, %v7651_v53  ;;  %v3586_v32 = vadd.f32 %v3528_v6, %v3389_v0  ;;  %vm3938_vm8 = vcmp.eq.f32.partialorder %v3723_v42, %v7132_v15  ;;  %vm3800_vm9 = vcmp.eq.f32.partialorder %v3728_v16, %v7124_v8  ;;  %v5228_v0 = vld [vmem:[%s5494_s24 + $0x30] sm:$0xff]  ;;  %v5229_v6 = vld [vmem:[%s5494_s24 + $0x48] sm:$0xff] }
 0xcb5   : > { %5118 = vmatprep.subr.bf16.mxu1 %v5117_v56  ;;  %vm3801_vm11 = vcmp.eq.f32.partialorder %v3728_v16, %v7126_v34  ;;  %v3867_v52 = vsel %vm3798_vm4, %v7144_v57, 0.0  ;;  %v3868_v35 = vsel %vm3799_vm6, %v7146_v61, 0.0  ;;  %vm3939_vm12 = vcmp.eq.f32.partialorder %v3728_v16, %v7130_v19  ;;  %v5232_v56 = vld [vmem:[%s5494_s24 + $0x50] sm:$0xff] }
 0xcb6   : > { %v5119_v29 = vpack.c.bf16 %v4112_v10, %v4110_v51  ;;  %v4006_v13 = vsel %vm3937_vm7, %v7135_v37, 0.0  ;;  %vm3940_vm13 = vcmp.eq.f32.partialorder %v3728_v16, %v7132_v15  ;;  %v4115_v53 = vmul.f32 %v7766_v33, %v7751_v43  ;;  %v5230_v16 = vld [vmem:[%s5494_s24 + $0x40] sm:$0xff]  ;;  %v5235_v10 = vld [vmem:[%s5494_s24 + $0x78] sm:$0xff] }
 0xcb7   : > { %v4117_v26 = vmul.f32 %v7800_v62, %v7762_v21  ;;  %v4007_v12 = vsel %vm3938_vm8, %v7139_v20, 0.0  ;;  %v3869_v17 = vsel %vm3800_vm9, %v7144_v57, 0.0  ;;  %v3870_v18 = vsel %vm3801_vm11, %v7146_v61, 0.0  ;;  %v5234_v51 = vld [vmem:[%s5494_s24 + $0x60] sm:$0xff] }
 0xcb8   : > { %5120 = vmatpush1.bf16.msra.mxu1 %v5119_v29  ;;  %v4008_v4 = vsel %vm3939_vm12, %v7135_v37, 0.0  ;;  %v4009_v28 = vsel %vm3940_vm13, %v7139_v20, 0.0  ;;  %vm3322_vm15 = vcmp.eq.f32.partialorder %v3253_v55, %v7082_v45  ;;  %vm3323_vm0 = vcmp.eq.f32.partialorder %v3253_v55, %v7084_v44  ;;  %v5239_v29 = vld [vmem:[%s5494_s24 + $0x98] sm:$0xff] }
 0xcb9   : > { %v5121_v54 = vpack.c.bf16 %v4117_v26, %v4115_v53  ;;  %v3587_v43 = vadd.f32 %v3529_v39, %v3390_v2  ;;  %vm3462_vm2 = vcmp.eq.f32.partialorder %v3253_v55, %v7089_v46  ;;  %v4114_v21 = vmul.f32 %v7764_v31, %v7733_v7  ;;  %v5231_v2 = vld [vmem:[%s5494_s24 + $0x58] sm:$0xff]  ;;  %v5233_v39 = vld [vmem:[%s5494_s24 + $0x68] sm:$0xff]  ;;  %v5242_v53 = vld [vmem:[%s5494_s24 + $0xa0] sm:$0xff] }
 0xcba   : > { %v4116_v33 = vmul.f32 %v7782_v25, %v7755_v59  ;;  %v4064_v62 = vadd.f32 %v4006_v13, %v3867_v52  ;;  %v4065_v58 = vadd.f32 %v4007_v12, %v3868_v35  ;;  %v4066_v38 = vadd.f32 %v4008_v4, %v3869_v17  ;;  %v5237_v52 = vld [vmem:[%s5494_s24 + $0x88] sm:$0xff]  ;;  %v5238_v35 = vld [vmem:[%s5494_s24 + $0x80] sm:$0xff]  ;;  %v5243_v26 = vld [vmem:[%s5494_s24 + $0xb8] sm:$0xff] }
 0xcbb   : > { %5122 = vmatprep.subr.bf16.mxu1 %v5121_v54  ;;  %vm3803_vm1 = vcmp.eq.f32.partialorder %v3733_v60, %v7126_v34  ;;  %v4067_v50 = vadd.f32 %v4009_v28, %v3870_v18  ;;  %v3391_v45 = vsel %vm3322_vm15, %v7097_v63, 0.0  ;;  %v3392_v44 = vsel %vm3323_vm0, %v7099_v36, 0.0  ;;  %v5241_v13 = vld [vmem:[%s5494_s24 + $0xa8] sm:$0xff]  ;;  %v5244_v12 = vld [vmem:[%s5494_s24 + $0xb0] sm:$0xff]  ;;  %v5246_v18 = vld [vmem:[%s5494_s24 + $0xc0] sm:$0xff] }
 0xcbc   : > { %v5123_v47 = vpack.c.bf16 %v4116_v33, %v4114_v21  ;;  %vm3461_vm5 = vcmp.eq.f32.partialorder %v3253_v55, %v7087_v11  ;;  %v3531_v46 = vsel %vm3462_vm2, %v7094_v30, 0.0  ;;  %vm3942_vm14 = vcmp.eq.f32.partialorder %v3733_v60, %v7132_v15  ;;  %v5240_v55 = vld [vmem:[%s5494_s24 + $0x90] sm:$0xff]  ;;  %v5245_v17 = vld [vmem:[%s5494_s24 + $0xc8] sm:$0xff]  ;;  %v5247_v4 = vld [vmem:[%s5494_s24 + $0xd8] sm:$0xff] }
 0xcbd   : > { %v4119_v7 = vmul.f32 %v7848_v9, %v7811_v27  ;;  %vm3802_vm3 = vcmp.eq.f32.partialorder %v3733_v60, %v7124_v8  ;;  %v3872_v34 = vsel %vm3803_vm1, %v7146_v61, 0.0  ;;  %v4121_v59 = vmul.f32 %v4063_v23, %v7815_v3  ;;  %v5224_v23 = vld [vmem:[%s5494_s24 + $0x10] sm:$0xff]  ;;  %v5249_v28 = vld [vmem:[%s5494_s24 + $0xe8] sm:$0xff]  ;;  %v5250_v54 = vld [vmem:[%s5494_s24 + $0xe0] sm:$0xff] }
 0xcbe   : > { %5124 = vmatpush1.bf16.msra.mxu1 %v5123_v47  ;;  %v4118_v63 = vmul.f32 %v7831_v22, %v7802_v40  ;;  %vm3941_vm4 = vcmp.eq.f32.partialorder %v3733_v60, %v7130_v19  ;;  %v4011_v11 = vsel %vm3942_vm14, %v7139_v20, 0.0  ;;  %v4120_v30 = vmul.f32 %v7854_v41, %v7813_v14  ;;  %v5223_v41 = vld [vmem:[%s5494_s24 + $0x18] sm:$0xff]  ;;  %v5248_v60 = vld [vmem:[%s5494_s24 + $0xd0] sm:$0xff]  ;;  %v5253_v33 = vld [vmem:[%s5494_s24 + $0x108] sm:$0xff] }
 0xcbf   : > { %v4123_v36 = vmul.f32 %v4065_v58, %v3585_v48  ;;  %v3530_v15 = vsel %vm3461_vm5, %v7092_v24, 0.0  ;;  %v3589_v31 = vadd.f32 %v3531_v46, %v3392_v44  ;;  %v5125_v25 = vpack.c.bf16 %v4121_v59, %v4119_v7  ;;  %v5221_v24 = vld [vmem:[%s5494_s24 + $0x8] sm:$0xff]  ;;  %v5227_v48 = vld [vmem:[%s5494_s24 + $0x38] sm:$0xff]  ;;  %v5252_v21 = vld [vmem:[%s5494_s24 + $0xf0] sm:$0xff] }
 0xcc0   : > { %v4125_v27 = vmul.f32 %v4067_v50, %v3587_v43  ;;  %v5127_v61 = vpack.c.bf16 %v4120_v30, %v4118_v63  ;;  %v4122_v3 = vmul.f32 %v4064_v62, %v7859_v49  ;;  %v4124_v9 = vmul.f32 %v4066_v38, %v3586_v32  ;;  %v5226_v49 = vld [vmem:[%s5494_s24 + $0x20] sm:$0xff]  ;;  %v5236_v32 = vld [vmem:[%s5494_s24 + $0x70] sm:$0xff]  ;;  %v5251_v43 = vld [vmem:[%s5494_s24 + $0xf8] sm:$0xff] }
 0xcc1   : > { %vm4128_vm6 = vcmask 793600   ;;  %v3871_v19 = vsel %vm3802_vm3, %v7144_v57, 0.0  ;;  %v4010_v20 = vsel %vm3941_vm4, %v7135_v37, 0.0  ;;  %v4069_v40 = vadd.f32 %v4011_v11, %v3872_v34  ;;  %5126 = vmatprep.subr.bf16.mxu1 %v5125_v25  ;;  %v5222_v57 = vld [vmem:[%s5494_s24] sm:$0xff]  ;;  %v5255_v58 = vld [vmem:[%s5494_s24 + $0x118] sm:$0xff]  ;;  %v5256_v38 = vld [vmem:[%s5494_s24 + $0x110] sm:$0xff] }
 0xcc2   : > { %v5129_v14 = vpack.c.bf16 %v4125_v27, %v4123_v36  ;;  %4718 = vmatprep.mubr.msk.f32.mxu1 %vm4128_vm6, %v5221_v24  ;;  %5128 = vmatpush1.bf16.msra.mxu1 %v5127_v61  ;;  %v3588_v22 = vadd.f32 %v3530_v15, %v3391_v45  ;;  %v4068_v5 = vadd.f32 %v4010_v20, %v3871_v19  ;;  %v5254_v62 = vld [vmem:[%s5494_s24 + $0x100] sm:$0xff]  ;;  %v5257_v50 = vld [vmem:[%s5494_s24 + $0x128] sm:$0xff]  ;;  %v5259_v44 = vld [vmem:[%s5494_s24 + $0x138] sm:$0xff] }
 0xcc3   : > { %v5131_v42 = vpack.c.bf16 %v4124_v9, %v4122_v3  ;;  %v4127_v8 = vmul.f32 %v4069_v40, %v3589_v31  ;;  %v5258_v45 = vld [vmem:[%s5494_s24 + $0x120] sm:$0xff]  ;;  %v5260_v47 = vld [vmem:[%s5494_s24 + $0x130] sm:$0xff]  ;;  %v5261_v46 = vld [vmem:[%s5494_s24 + $0x148] sm:$0xff] }
 0xcc4   : > { %5130 = vmatprep.subr.bf16.mxu1 %v5129_v14  ;;  %v4126_v37 = vmul.f32 %v4068_v5, %v3588_v22  ;;  %v5262_v7 = vld [vmem:[%s5494_s24 + $0x140] sm:$0xff]  ;;  %v5263_v34 = vld [vmem:[%s5494_s24 + $0x158] sm:$0xff]  ;;  %v5264_v59 = vld [vmem:[%s5494_s24 + $0x150] sm:$0xff] }
 0xcc5   : > { %v5265_v63 = vld [vmem:[%s5494_s24 + $0x168] sm:$0xff]  ;;  %v5266_v11 = vld [vmem:[%s5494_s24 + $0x160] sm:$0xff]  ;;  %v5267_v30 = vld [vmem:[%s5494_s24 + $0x178] sm:$0xff] }
 0xcc6   : > { %5132 = vmatpush1.bf16.msra.mxu1 %v5131_v42  ;;  %v5268_v36 = vld [vmem:[%s5494_s24 + $0x170] sm:$0xff]  ;;  %v5269_v15 = vld [vmem:[%s5494_s24 + $0x188] sm:$0xff]  ;;  %v5270_v31 = vld [vmem:[%s5494_s24 + $0x180] sm:$0xff] }
 0xcc7   : > { %4716 = vmatprep.subr.msk.mxu1 %vm2627_vm10, %v4127_v8  ;;  %v5271_v25 = vld [vmem:[%s5494_s24 + $0x198] sm:$0xff]  ;;  %v5272_v27 = vld [vmem:[%s5494_s24 + $0x190] sm:$0xff]  ;;  %v5273_v61 = vld [vmem:[%s5494_s24 + $0x1a8] sm:$0xff] }
 0xcc8   : > { %v5274_v3 = vld [vmem:[%s5494_s24 + $0x1a0] sm:$0xff]  ;;  %v5275_v9 = vld [vmem:[%s5494_s24 + $0x1b8] sm:$0xff]  ;;  %v5276_v19 = vld [vmem:[%s5494_s24 + $0x1b0] sm:$0xff] }
 0xcc9   : > { %v5277_v20 = vld [vmem:[%s5494_s24 + $0x1c8] sm:$0xff]  ;;  %v5278_v40 = vld [vmem:[%s5494_s24 + $0x1c0] sm:$0xff]  ;;  %v5279_v14 = vld [vmem:[%s5494_s24 + $0x1d8] sm:$0xff] }
 0xcca   : > { %4717 = vmatpush1.msk.msra.mxu1 %vm2627_vm10, %v4126_v37  ;;  %v5280_v24 = vld [vmem:[%s5494_s24 + $0x1d0] sm:$0xff]  ;;  %v5281_v22 = vld [vmem:[%s5494_s24 + $0x1e8] sm:$0xff]  ;;  %v5282_v5 = vld [vmem:[%s5494_s24 + $0x1e0] sm:$0xff] }
 0xccb   : > { %4296 = vmatmul.mubr.f32.vlgmr.msra.gmra.mrb[70].mxu1 %v5222_v57  ;;  %v5283_v42 = vld [vmem:[%s5494_s24 + $0x1f8] sm:$0xff]  ;;  %v5284_v8 = vld [vmem:[%s5494_s24 + $0x1f0] sm:$0xff] }
 0xccc   : > { %4719 = vmatprep.mubr.msk.f32.mxu1 %vm4128_vm6, %v5223_v41 }
 0xccf   : > { %4302 = vmatmul.mubr.f32.gmra.mrb[72].mxu1 %v5224_v23 }
 0xcd0   : > { %4720 = vmatprep.mubr.msk.f32.mxu1 %vm4128_vm6, %v5225_v1 }
 0xcd3   : > { %4308 = vmatmul.mubr.f32.gmra.mrb[74].mxu1 %v5226_v49 }
 0xcd4   : > { %4721 = vmatprep.mubr.msk.f32.mxu1 %vm4128_vm6, %v5227_v48 }
 0xcd7   : > { %4314 = vmatmul.mubr.f32.gmra.mrb[76].mxu1 %v5228_v0 }
 0xcd8   : > { %4722 = vmatprep.mubr.msk.f32.mxu1 %vm4128_vm6, %v5229_v6 }
 0xcdb   : > { %4320 = vmatmul.mubr.f32.gmra.mrb[78].mxu1 %v5230_v16 }
 0xcdc   : > { %4723 = vmatprep.mubr.msk.f32.mxu1 %vm4128_vm6, %v5231_v2 }
 0xcdf   : > { %4326 = vmatmul.mubr.f32.gmra.mrb[80].mxu1 %v5232_v56 }
 0xce0   : > { %4724 = vmatprep.mubr.msk.f32.mxu1 %vm4128_vm6, %v5233_v39 }
 0xce3   : > { %4332 = vmatmul.mubr.f32.gmra.mrb[82].mxu1 %v5234_v51 }
 0xce4   : > { %4725 = vmatprep.mubr.msk.f32.mxu1 %vm4128_vm6, %v5235_v10 }
 0xce7   : > { %4338 = vmatmul.mubr.f32.gmra.mrb[84].mxu1 %v5236_v32 }
 0xce8   : > { %4726 = vmatprep.mubr.msk.f32.mxu1 %vm4128_vm6, %v5237_v52 }
 0xceb   : > { %4344 = vmatmul.mubr.f32.gmra.mrb[86].mxu1 %v5238_v35 }
 0xcec   : > { %4727 = vmatprep.mubr.msk.f32.mxu1 %vm4128_vm6, %v5239_v29 }
 0xcef   : > { %4350 = vmatmul.mubr.f32.gmra.mrb[88].mxu1 %v5240_v55 }
 0xcf0   : > { %4728 = vmatprep.mubr.msk.f32.mxu1 %vm4128_vm6, %v5241_v13 }
 0xcf3   : > { %4356 = vmatmul.mubr.f32.gmra.mrb[90].mxu1 %v5242_v53 }
 0xcf4   : > { %4729 = vmatprep.mubr.msk.f32.mxu1 %vm4128_vm6, %v5243_v26 }
 0xcf7   : > { %4362 = vmatmul.mubr.f32.gmra.mrb[92].mxu1 %v5244_v12 }
 0xcf8   : > { %4730 = vmatprep.mubr.msk.f32.mxu1 %vm4128_vm6, %v5245_v17 }
 0xcfb   : > { %4368 = vmatmul.mubr.f32.gmra.mrb[94].mxu1 %v5246_v18 }
 0xcfc   : > { %4731 = vmatprep.mubr.msk.f32.mxu1 %vm4128_vm6, %v5247_v4 }
 0xcff   : > { %4374 = vmatmul.mubr.f32.gmra.mrb[96].mxu1 %v5248_v60 }
 0xd00   : > { %4732 = vmatprep.mubr.msk.f32.mxu1 %vm4128_vm6, %v5249_v28 }
 0xd03   : > { %4380 = vmatmul.mubr.f32.gmra.mrb[98].mxu1 %v5250_v54 }
 0xd04   : > { %4733 = vmatprep.mubr.msk.f32.mxu1 %vm4128_vm6, %v5251_v43 }
 0xd07   : > { %4386 = vmatmul.mubr.f32.gmra.mrb[100].mxu1 %v5252_v21 }
 0xd08   : > { %4734 = vmatprep.mubr.msk.f32.mxu1 %vm4128_vm6, %v5253_v33 }
 0xd0b   : > { %4392 = vmatmul.mubr.f32.gmra.mrb[102].mxu1 %v5254_v62 }
 0xd0c   : > { %4735 = vmatprep.mubr.msk.f32.mxu1 %vm4128_vm6, %v5255_v58 }
 0xd0f   : > { %4398 = vmatmul.mubr.f32.gmra.mrb[104].mxu1 %v5256_v38 }
 0xd10   : > { %4736 = vmatprep.mubr.msk.f32.mxu1 %vm4128_vm6, %v5257_v50 }
 0xd13   : > { %4404 = vmatmul.mubr.f32.gmra.mrb[106].mxu1 %v5258_v45 }
 0xd14   : > { %4737 = vmatprep.mubr.msk.f32.mxu1 %vm4128_vm6, %v5259_v44 }
 0xd17   : > { %4410 = vmatmul.mubr.f32.gmra.mrb[108].mxu1 %v5260_v47 }
 0xd18   : > { %4738 = vmatprep.mubr.msk.f32.mxu1 %vm4128_vm6, %v5261_v46 }
 0xd1b   : > { %4416 = vmatmul.mubr.f32.gmra.mrb[110].mxu1 %v5262_v7 }
 0xd1c   : > { %4739 = vmatprep.mubr.msk.f32.mxu1 %vm4128_vm6, %v5263_v34 }
 0xd1f   : > { %4422 = vmatmul.mubr.f32.gmra.mrb[112].mxu1 %v5264_v59 }
 0xd20   : > { %4740 = vmatprep.mubr.msk.f32.mxu1 %vm4128_vm6, %v5265_v63 }
 0xd23   : > { %4428 = vmatmul.mubr.f32.gmra.mrb[114].mxu1 %v5266_v11 }
 0xd24   : > { %4741 = vmatprep.mubr.msk.f32.mxu1 %vm4128_vm6, %v5267_v30 }
 0xd27   : > { %4434 = vmatmul.mubr.f32.gmra.mrb[116].mxu1 %v5268_v36 }
 0xd28   : > { %4742 = vmatprep.mubr.msk.f32.mxu1 %vm4128_vm6, %v5269_v15 }
 0xd2b   : > { %4440 = vmatmul.mubr.f32.gmra.mrb[118].mxu1 %v5270_v31 }
 0xd2c   : > { %4743 = vmatprep.mubr.msk.f32.mxu1 %vm4128_vm6, %v5271_v25 }
 0xd2f   : > { %4446 = vmatmul.mubr.f32.gmra.mrb[120].mxu1 %v5272_v27 }
 0xd30   : > { %4744 = vmatprep.mubr.msk.f32.mxu1 %vm4128_vm6, %v5273_v61 }
 0xd33   : > { %4452 = vmatmul.mubr.f32.gmra.mrb[122].mxu1 %v5274_v3 }
 0xd34   : > { %4745 = vmatprep.mubr.msk.f32.mxu1 %vm4128_vm6, %v5275_v9 }
 0xd37   : > { %4458 = vmatmul.mubr.f32.gmra.mrb[124].mxu1 %v5276_v19 }
 0xd38   : > { %4746 = vmatprep.mubr.msk.f32.mxu1 %vm4128_vm6, %v5277_v20 }
 0xd3b   : > { %4464 = vmatmul.mubr.f32.gmra.mrb[126].mxu1 %v5278_v40 }
 0xd3c   : > { %4747 = vmatprep.mubr.msk.f32.mxu1 %vm4128_vm6, %v5279_v14 }
 0xd3f   : > { %4470 = vmatmul.mubr.f32.gmra.mrb[128].mxu1 %v5280_v24 }
 0xd40   : > { %4748 = vmatprep.mubr.msk.f32.mxu1 %vm4128_vm6, %v5281_v22 }
 0xd43   : > { %4476 = vmatmul.mubr.f32.gmra.mrb[130].mxu1 %v5282_v5 }
 0xd44   : > { %4749 = vmatprep.mubr.msk.f32.mxu1 %vm4128_vm6, %v5283_v42 }
 0xd47   : > { %4482 = vmatmul.mubr.f32.gmra.mrb[132].mxu1 %v5284_v8 }
 0xd9e   : > { %v4297_v37 = vpop.f32.mrb[70].mxu1 }
 0xd9f   : > { %4488 = vst [vmem:[%s8021_s30] sm:$0xff] %v4297_v37  ;;  %v4299_v57 = vpop.f32.mrb[71].mxu1 }
 0xda0   : > { %4489 = vst.msk [vmem:[%s8021_s30 + $0x8] sm:$0xff] %vm4128_vm6, %v4299_v57 }
 0xda2   : > { %v4303_v41 = vpop.f32.mrb[72].mxu1 }
 0xda3   : > { %4490 = vst [vmem:[%s8021_s30 + $0x10] sm:$0xff] %v4303_v41  ;;  %v4305_v23 = vpop.f32.mrb[73].mxu1 }
 0xda4   : > { %4491 = vst.msk [vmem:[%s8021_s30 + $0x18] sm:$0xff] %vm4128_vm6, %v4305_v23 }
 0xda6   : > { %v4309_v1 = vpop.f32.mrb[74].mxu1 }
 0xda7   : > { %4492 = vst [vmem:[%s8021_s30 + $0x20] sm:$0xff] %v4309_v1  ;;  %v4311_v49 = vpop.f32.mrb[75].mxu1 }
 0xda8   : > { %4493 = vst.msk [vmem:[%s8021_s30 + $0x28] sm:$0xff] %vm4128_vm6, %v4311_v49 }
 0xdaa   : > { %v4315_v48 = vpop.f32.mrb[76].mxu1 }
 0xdab   : > { %4494 = vst [vmem:[%s8021_s30 + $0x30] sm:$0xff] %v4315_v48  ;;  %v4317_v0 = vpop.f32.mrb[77].mxu1 }
 0xdac   : > { %4495 = vst.msk [vmem:[%s8021_s30 + $0x38] sm:$0xff] %vm4128_vm6, %v4317_v0 }
 0xdae   : > { %v4321_v6 = vpop.f32.mrb[78].mxu1 }
 0xdaf   : > { %4496 = vst [vmem:[%s8021_s30 + $0x40] sm:$0xff] %v4321_v6  ;;  %v4323_v16 = vpop.f32.mrb[79].mxu1 }
 0xdb0   : > { %4497 = vst.msk [vmem:[%s8021_s30 + $0x48] sm:$0xff] %vm4128_vm6, %v4323_v16 }
 0xdb2   : > { %v4327_v2 = vpop.f32.mrb[80].mxu1 }
 0xdb3   : > { %4498 = vst [vmem:[%s8021_s30 + $0x50] sm:$0xff] %v4327_v2  ;;  %v4329_v56 = vpop.f32.mrb[81].mxu1 }
 0xdb4   : > { %4499 = vst.msk [vmem:[%s8021_s30 + $0x58] sm:$0xff] %vm4128_vm6, %v4329_v56 }
 0xdb6   : > { %v4333_v39 = vpop.f32.mrb[82].mxu1 }
 0xdb7   : > { %4500 = vst [vmem:[%s8021_s30 + $0x60] sm:$0xff] %v4333_v39  ;;  %v4335_v51 = vpop.f32.mrb[83].mxu1 }
 0xdb8   : > { %4501 = vst.msk [vmem:[%s8021_s30 + $0x68] sm:$0xff] %vm4128_vm6, %v4335_v51 }
 0xdba   : > { %v4339_v10 = vpop.f32.mrb[84].mxu1 }
 0xdbb   : > { %4502 = vst [vmem:[%s8021_s30 + $0x70] sm:$0xff] %v4339_v10  ;;  %v4341_v32 = vpop.f32.mrb[85].mxu1 }
 0xdbc   : > { %4503 = vst.msk [vmem:[%s8021_s30 + $0x78] sm:$0xff] %vm4128_vm6, %v4341_v32 }
 0xdbe   : > { %v4345_v52 = vpop.f32.mrb[86].mxu1 }
 0xdbf   : > { %4504 = vst [vmem:[%s8021_s30 + $0x80] sm:$0xff] %v4345_v52  ;;  %v4347_v35 = vpop.f32.mrb[87].mxu1 }
 0xdc0   : > { %4505 = vst.msk [vmem:[%s8021_s30 + $0x88] sm:$0xff] %vm4128_vm6, %v4347_v35 }
 0xdc2   : > { %v4351_v29 = vpop.f32.mrb[88].mxu1 }
 0xdc3   : > { %4506 = vst [vmem:[%s8021_s30 + $0x90] sm:$0xff] %v4351_v29  ;;  %v4353_v55 = vpop.f32.mrb[89].mxu1 }
 0xdc4   : > { %4507 = vst.msk [vmem:[%s8021_s30 + $0x98] sm:$0xff] %vm4128_vm6, %v4353_v55 }
 0xdc6   : > { %v4357_v13 = vpop.f32.mrb[90].mxu1 }
 0xdc7   : > { %4508 = vst [vmem:[%s8021_s30 + $0xa0] sm:$0xff] %v4357_v13  ;;  %v4359_v53 = vpop.f32.mrb[91].mxu1 }
 0xdc8   : > { %4509 = vst.msk [vmem:[%s8021_s30 + $0xa8] sm:$0xff] %vm4128_vm6, %v4359_v53 }
 0xdca   : > { %v4363_v26 = vpop.f32.mrb[92].mxu1 }
 0xdcb   : > { %4510 = vst [vmem:[%s8021_s30 + $0xb0] sm:$0xff] %v4363_v26  ;;  %v4365_v12 = vpop.f32.mrb[93].mxu1 }
 0xdcc   : > { %4511 = vst.msk [vmem:[%s8021_s30 + $0xb8] sm:$0xff] %vm4128_vm6, %v4365_v12 }
 0xdce   : > { %v4369_v17 = vpop.f32.mrb[94].mxu1 }
 0xdcf   : > { %4512 = vst [vmem:[%s8021_s30 + $0xc0] sm:$0xff] %v4369_v17  ;;  %v4371_v18 = vpop.f32.mrb[95].mxu1 }
 0xdd0   : > { %4513 = vst.msk [vmem:[%s8021_s30 + $0xc8] sm:$0xff] %vm4128_vm6, %v4371_v18 }
 0xdd2   : > { %v4375_v4 = vpop.f32.mrb[96].mxu1 }
 0xdd3   : > { %4514 = vst [vmem:[%s8021_s30 + $0xd0] sm:$0xff] %v4375_v4  ;;  %v4377_v60 = vpop.f32.mrb[97].mxu1 }
 0xdd4   : > { %4515 = vst.msk [vmem:[%s8021_s30 + $0xd8] sm:$0xff] %vm4128_vm6, %v4377_v60 }
 0xdd6   : > { %v4381_v28 = vpop.f32.mrb[98].mxu1 }
 0xdd7   : > { %4516 = vst [vmem:[%s8021_s30 + $0xe0] sm:$0xff] %v4381_v28  ;;  %v4383_v54 = vpop.f32.mrb[99].mxu1 }
 0xdd8   : > { %4517 = vst.msk [vmem:[%s8021_s30 + $0xe8] sm:$0xff] %vm4128_vm6, %v4383_v54 }
 0xdda   : > { %v4387_v43 = vpop.f32.mrb[100].mxu1 }
 0xddb   : > { %4518 = vst [vmem:[%s8021_s30 + $0xf0] sm:$0xff] %v4387_v43  ;;  %v4389_v21 = vpop.f32.mrb[101].mxu1 }
 0xddc   : > { %4519 = vst.msk [vmem:[%s8021_s30 + $0xf8] sm:$0xff] %vm4128_vm6, %v4389_v21 }
 0xdde   : > { %v4393_v33 = vpop.f32.mrb[102].mxu1 }
 0xddf   : > { %4520 = vst [vmem:[%s8021_s30 + $0x100] sm:$0xff] %v4393_v33  ;;  %v4395_v62 = vpop.f32.mrb[103].mxu1 }
 0xde0   : > { %4521 = vst.msk [vmem:[%s8021_s30 + $0x108] sm:$0xff] %vm4128_vm6, %v4395_v62 }
 0xde2   : > { %v4399_v58 = vpop.f32.mrb[104].mxu1 }
 0xde3   : > { %4522 = vst [vmem:[%s8021_s30 + $0x110] sm:$0xff] %v4399_v58  ;;  %v4401_v38 = vpop.f32.mrb[105].mxu1 }
 0xde4   : > { %4523 = vst.msk [vmem:[%s8021_s30 + $0x118] sm:$0xff] %vm4128_vm6, %v4401_v38 }
 0xde6   : > { %v4405_v50 = vpop.f32.mrb[106].mxu1 }
 0xde7   : > { %4524 = vst [vmem:[%s8021_s30 + $0x120] sm:$0xff] %v4405_v50  ;;  %v4407_v45 = vpop.f32.mrb[107].mxu1 }
 0xde8   : > { %4525 = vst.msk [vmem:[%s8021_s30 + $0x128] sm:$0xff] %vm4128_vm6, %v4407_v45 }
 0xdea   : > { %v4411_v44 = vpop.f32.mrb[108].mxu1 }
 0xdeb   : > { %4526 = vst [vmem:[%s8021_s30 + $0x130] sm:$0xff] %v4411_v44  ;;  %v4413_v47 = vpop.f32.mrb[109].mxu1 }
 0xdec   : > { %4527 = vst.msk [vmem:[%s8021_s30 + $0x138] sm:$0xff] %vm4128_vm6, %v4413_v47 }
 0xdee   : > { %v4417_v46 = vpop.f32.mrb[110].mxu1 }
 0xdef   : > { %4528 = vst [vmem:[%s8021_s30 + $0x140] sm:$0xff] %v4417_v46  ;;  %v4419_v7 = vpop.f32.mrb[111].mxu1 }
 0xdf0   : > { %4529 = vst.msk [vmem:[%s8021_s30 + $0x148] sm:$0xff] %vm4128_vm6, %v4419_v7 }
 0xdf2   : > { %v4423_v34 = vpop.f32.mrb[112].mxu1 }
 0xdf3   : > { %4530 = vst [vmem:[%s8021_s30 + $0x150] sm:$0xff] %v4423_v34  ;;  %v4425_v59 = vpop.f32.mrb[113].mxu1 }
 0xdf4   : > { %4531 = vst.msk [vmem:[%s8021_s30 + $0x158] sm:$0xff] %vm4128_vm6, %v4425_v59 }
 0xdf6   : > { %v4429_v63 = vpop.f32.mrb[114].mxu1 }
 0xdf7   : > { %4532 = vst [vmem:[%s8021_s30 + $0x160] sm:$0xff] %v4429_v63  ;;  %v4431_v11 = vpop.f32.mrb[115].mxu1 }
 0xdf8   : > { %4533 = vst.msk [vmem:[%s8021_s30 + $0x168] sm:$0xff] %vm4128_vm6, %v4431_v11 }
 0xdfa   : > { %v4435_v30 = vpop.f32.mrb[116].mxu1 }
 0xdfb   : > { %4534 = vst [vmem:[%s8021_s30 + $0x170] sm:$0xff] %v4435_v30  ;;  %v4437_v36 = vpop.f32.mrb[117].mxu1 }
 0xdfc   : > { %4535 = vst.msk [vmem:[%s8021_s30 + $0x178] sm:$0xff] %vm4128_vm6, %v4437_v36 }
 0xdfe   : > { %v4441_v15 = vpop.f32.mrb[118].mxu1 }
 0xdff   : > { %4536 = vst [vmem:[%s8021_s30 + $0x180] sm:$0xff] %v4441_v15  ;;  %v4443_v31 = vpop.f32.mrb[119].mxu1 }
 0xe00   : > { %4537 = vst.msk [vmem:[%s8021_s30 + $0x188] sm:$0xff] %vm4128_vm6, %v4443_v31 }
 0xe02   : > { %v4447_v25 = vpop.f32.mrb[120].mxu1 }
 0xe03   : > { %4538 = vst [vmem:[%s8021_s30 + $0x190] sm:$0xff] %v4447_v25  ;;  %v4449_v27 = vpop.f32.mrb[121].mxu1 }
 0xe04   : > { %4539 = vst.msk [vmem:[%s8021_s30 + $0x198] sm:$0xff] %vm4128_vm6, %v4449_v27 }
 0xe06   : > { %v4453_v61 = vpop.f32.mrb[122].mxu1 }
 0xe07   : > { %4540 = vst [vmem:[%s8021_s30 + $0x1a0] sm:$0xff] %v4453_v61  ;;  %v4455_v3 = vpop.f32.mrb[123].mxu1 }
 0xe08   : > { %4541 = vst.msk [vmem:[%s8021_s30 + $0x1a8] sm:$0xff] %vm4128_vm6, %v4455_v3 }
 0xe0a   : > { %v4459_v9 = vpop.f32.mrb[124].mxu1 }
 0xe0b   : > { %4542 = vst [vmem:[%s8021_s30 + $0x1b0] sm:$0xff] %v4459_v9  ;;  %v4461_v19 = vpop.f32.mrb[125].mxu1 }
 0xe0c   : > { %4543 = vst.msk [vmem:[%s8021_s30 + $0x1b8] sm:$0xff] %vm4128_vm6, %v4461_v19 }
 0xe0e   : > { %v4465_v20 = vpop.f32.mrb[126].mxu1 }
 0xe0f   : > { %4544 = vst [vmem:[%s8021_s30 + $0x1c0] sm:$0xff] %v4465_v20  ;;  %v4467_v40 = vpop.f32.mrb[127].mxu1 }
 0xe10   : > { %4545 = vst.msk [vmem:[%s8021_s30 + $0x1c8] sm:$0xff] %vm4128_vm6, %v4467_v40 }
 0xe12   : > { %v4471_v14 = vpop.f32.mrb[128].mxu1 }
 0xe13   : > { %4546 = vst [vmem:[%s8021_s30 + $0x1d0] sm:$0xff] %v4471_v14  ;;  %v4473_v24 = vpop.f32.mrb[129].mxu1 }
 0xe14   : > { %4547 = vst.msk [vmem:[%s8021_s30 + $0x1d8] sm:$0xff] %vm4128_vm6, %v4473_v24 }
 0xe16   : > { %v4477_v22 = vpop.f32.mrb[130].mxu1 }
 0xe17   : > { %4548 = vst [vmem:[%s8021_s30 + $0x1e0] sm:$0xff] %v4477_v22  ;;  %v4479_v5 = vpop.f32.mrb[131].mxu1 }
 0xe18   : > { %4549 = vst.msk [vmem:[%s8021_s30 + $0x1e8] sm:$0xff] %vm4128_vm6, %v4479_v5 }
 0xe1a   : > { %v4483_v42 = vpop.f32.mrb[132].mxu1 }
 0xe1b   : > { %4550 = vst [vmem:[%s8021_s30 + $0x1f0] sm:$0xff] %v4483_v42  ;;  %v4485_v8 = vpop.f32.mrb[133].mxu1 }
 0xe1c   : > { %4551 = vst.msk [vmem:[%s8021_s30 + $0x1f8] sm:$0xff] %vm4128_vm6, %v4485_v8 }
 0xe1d PF: > { %s29_s27 = sadd.s32 1, %s5291_s27  }
 0xe1e   : > { %p26_p4 = scmp.ge.s32.totalorder %s29_s27, 4  }
 0xe20   :  { %28 = sbr.rel (!%p26_p4) target bundleno = 5 (0x5), region = 133 }

</bundles_post_ra>
